<compile_context>
chip_gen: v7x
topology: tpu7x:2x2x1
jax: 0.10.0
libtpu: 0.0.40
codegen_flags: <defaults>
</compile_context>

<pallas_src>
import math
from functools import partial

import jax
import jax.numpy as jnp
from jax import lax
from jax.experimental import pallas as pl
from jax.experimental.pallas import tpu as pltpu

CLAMP_LO = 1e-6
CLAMP_HI = 0.99999
_NCOEF = 9  # a_x, b_x, c_x, a_y, b_y, c_y, mscale(=1-cls), contrast, brightness


# ----------------------------------------------------------------------------
# Batcher odd-even merge sorting network (power-of-two size), generated once.
# ----------------------------------------------------------------------------
def _oddeven_merge(lo, hi, r):
    step = r * 2
    if step < hi - lo:
        yield from _oddeven_merge(lo, hi, step)
        yield from _oddeven_merge(lo + r, hi, step)
        for i in range(lo + r, hi - r, step):
            yield (i, i + r)
    else:
        yield (lo, lo + r)


def _oddeven_merge_sort(lo, hi):
    if (hi - lo) >= 1:
        mid = lo + ((hi - lo) // 2)
        yield from _oddeven_merge_sort(lo, mid)
        yield from _oddeven_merge_sort(mid + 1, hi)
        yield from _oddeven_merge(lo, hi, 1)


_SORT64_PAIRS = tuple(_oddeven_merge_sort(0, 63))


def _validate_sort_network():
    import random
    rng = random.Random(0)
    for _ in range(8):
        xs = [rng.random() for _ in range(64)]
        ys = list(xs)
        for i, j in _SORT64_PAIRS:
            if ys[i] > ys[j]:
                ys[i], ys[j] = ys[j], ys[i]
        assert ys == sorted(xs), "sorting network is broken"


_validate_sort_network()


# ----------------------------------------------------------------------------
# Kernel 1: 7x7 median pool ("same", reflect padded in the wrapper)
# ----------------------------------------------------------------------------
def _median7_kernel(xp_ref, o_ref, *, W, TH, n_strips):
    # xp_ref: (1, H+6, W+6) full padded channel; o_ref: (1, TH, W) output strip.
    if n_strips == 1:
        def win(dy, dx):
            return xp_ref[0, dy:dy + TH, dx:dx + W]
    else:
        r0 = pl.program_id(1) * TH
        if TH % 8 == 0:
            r0 = pl.multiple_of(r0, 8)

        def win(dy, dx):
            return xp_ref[0, pl.ds(r0 + dy, TH), dx:dx + W]

    wins = [win(dy, dx) for dy in range(7) for dx in range(7)]   # 49 x (TH, W)

    # 25th order statistic of 49 via a Batcher network padded to 64 with +inf;
    # the +inf entries are resolved at trace time (no emitted ops), and ops not
    # feeding sorted position 24 are dead code for the compiler.
    vals = wins + [None] * (64 - 49)                  # None == +inf sentinel
    for i, j in _SORT64_PAIRS:
        a, b = vals[i], vals[j]
        if b is None:                                 # (x,+inf)/(+inf,+inf): ordered
            continue
        if a is None:                                 # (+inf, x): swap
            vals[i], vals[j] = b, None
            continue
        vals[i] = jnp.minimum(a, b)
        vals[j] = jnp.maximum(a, b)
    assert vals[24] is not None
    o_ref[0] = vals[24]


def _choose_strip_height(H, target=32):
    th = H
    for cand in range(8, min(H, target) + 1, 8):
        if H % cand == 0:
            th = cand
    return th


def median_pool_7x7(x):
    C, H, W = x.shape
    xpad = jnp.pad(x, ((0, 0), (3, 3), (3, 3)), mode="reflect")
    TH = _choose_strip_height(H)
    n_strips = H // TH
    return pl.pallas_call(
        partial(_median7_kernel, W=W, TH=TH, n_strips=n_strips),
        out_shape=jax.ShapeDtypeStruct((C, H, W), jnp.float32),
        grid=(C, n_strips),
        in_specs=[pl.BlockSpec((1, H + 6, W + 6), lambda c, h: (c, 0, 0))],
        out_specs=pl.BlockSpec((1, TH, W), lambda c, h: (c, h, 0)),
        compiler_params=pltpu.CompilerParams(
            dimension_semantics=("parallel", "arbitrary")),
    )(xpad)


# ----------------------------------------------------------------------------
# Kernel 2 (fused): augment (contrast/brightness/noise/clamp) + affine
# grid_sample (bilinear, zeros, align_corners=False) + clamp + mask multiply.
# Grid = (sample, output-pixel lane tile); zero-coverage tiles are skipped.
# ----------------------------------------------------------------------------
def _warp_kernel(coef_ref, skip_ref, patch_ref, noise_ref,
                 adv_t_ref, msk_t_ref, masked_ref,
                 *, Hp, Wp, Hout, Wout, TP, n_tiles):
    s = pl.program_id(0)
    t = pl.program_id(1)
    skip = skip_ref[s * n_tiles + t]

    @pl.when(skip != 0)
    def _():
        # zero-coverage tile: adv_t clamps to CLAMP_LO, mask and product are 0
        adv_t_ref[0] = jnp.full((3, TP), CLAMP_LO, jnp.float32)
        msk_t_ref[0] = jnp.zeros((3, TP), jnp.float32)
        masked_ref[0] = jnp.zeros((3, TP), jnp.float32)

    @pl.when(skip == 0)
    def _():
        base = s * _NCOEF
        a_x = coef_ref[base + 0]; b_x = coef_ref[base + 1]; c_x = coef_ref[base + 2]
        a_y = coef_ref[base + 3]; b_y = coef_ref[base + 4]; c_y = coef_ref[base + 5]
        mscale = coef_ref[base + 6]
        con = coef_ref[base + 7]; bri = coef_ref[base + 8]

        # fused contrast / brightness / noise + clamp, channel-stacked (3*Hp, Wp)
        adv = jnp.clip(patch_ref[...] * con + bri + noise_ref[0],
                       CLAMP_LO, CLAMP_HI)

        # output-pixel coords of this lane tile (align_corners=False grid)
        li = lax.broadcasted_iota(jnp.int32, (1, TP), 1).astype(jnp.float32)
        pf = li + (t * TP).astype(jnp.float32)
        rowf = jnp.floor((pf + 0.5) / float(Wout))   # +0.5: robust integer recovery
        colf = pf - rowf * float(Wout)
        xb = (2.0 * colf + 1.0) / float(Wout) - 1.0
        yb = (2.0 * rowf + 1.0) / float(Hout) - 1.0
        src_x = a_x * xb + b_x * yb + c_x            # (1, TP) un-padded patch coords
        src_y = a_y * xb + b_y * yb + c_y

        vv = lax.broadcasted_iota(jnp.int32, (Wp, TP), 0).astype(jnp.float32)
        uu = lax.broadcasted_iota(jnp.int32, (Hp, TP), 0).astype(jnp.float32)
        wx = jnp.maximum(1.0 - jnp.abs(src_x - vv), 0.0)   # (Wp, TP) bilinear weights
        wy = jnp.maximum(1.0 - jnp.abs(src_y - uu), 0.0)   # (Hp, TP)

        # closed-form coverage == sum(wx,0)*sum(wy,0); mask is constant per label
        cov_x = jnp.clip(1.0 + jnp.minimum(src_x, 0.0)
                         - jnp.maximum(src_x - (Wp - 1.0), 0.0), 0.0, 1.0)
        cov_y = jnp.clip(1.0 + jnp.minimum(src_y, 0.0)
                         - jnp.maximum(src_y - (Hp - 1.0), 0.0), 0.0, 1.0)
        msk_t = jnp.broadcast_to(mscale * (cov_x * cov_y), (3, TP))

        # one channel-stacked MXU matmul, then the y-weight reduce per channel
        m1 = jnp.dot(adv, wx, preferred_element_type=jnp.float32)   # (3*Hp, TP)
        rows = [jnp.sum(wy * m1[c * Hp:(c + 1) * Hp], axis=0, keepdims=True)
                for c in range(3)]
        adv_t = jnp.clip(jnp.concatenate(rows, axis=0), CLAMP_LO, CLAMP_HI)

        adv_t_ref[0] = adv_t
        msk_t_ref[0] = msk_t
        masked_ref[0] = adv_t * msk_t


def _choose_lane_tile(P, cap):
    # largest multiple of 128 that divides P and is <= cap (falls back to P)
    tp = P
    for cand in range(128, min(P, cap) + 1, 128):
        if P % cand == 0:
            tp = cand
    return tp


def warp_patches(pooled2d, noise3d, coef_flat, skip_flat, Hp, Wp, img_size, tp):
    BN = noise3d.shape[0]
    P = img_size * img_size
    n_tiles = P // tp
    out_sds = jax.ShapeDtypeStruct((BN, 3, P), jnp.float32)
    kernel = partial(_warp_kernel, Hp=Hp, Wp=Wp, Hout=img_size, Wout=img_size,
                     TP=tp, n_tiles=n_tiles)
    return pl.pallas_call(
        kernel,
        out_shape=(out_sds, out_sds, out_sds),
        grid=(BN, n_tiles),
        in_specs=[
            pl.BlockSpec(memory_space=pltpu.MemorySpace.SMEM),        # coef (BN*9,) f32
            pl.BlockSpec(memory_space=pltpu.MemorySpace.SMEM),        # skip (BN*nt,) i32
            pl.BlockSpec((3 * Hp, Wp), lambda s, t: (0, 0)),          # pooled patch
            pl.BlockSpec((1, 3 * Hp, Wp), lambda s, t: (s, 0, 0)),    # per-sample noise
        ],
        out_specs=(
            pl.BlockSpec((1, 3, tp), lambda s, t: (s, 0, t)),
            pl.BlockSpec((1, 3, tp), lambda s, t: (s, 0, t)),
            pl.BlockSpec((1, 3, tp), lambda s, t: (s, 0, t)),
        ),
        compiler_params=pltpu.CompilerParams(
            dimension_semantics=("parallel", "arbitrary")),
        # TODO(synk): at production sizes also set vmem_limit_bytes per chip
        # (v7x: ~40-48MB with tp~4096; v5e/v6e: ~80-96MB with tp~8192).
    )(coef_flat, skip_flat, pooled2d, noise3d)


def _skip_flags(A_x, B_x, C_x, A_y, B_y, C_y, Hp, Wp, img_size, tp):
    """Conservative per-(sample, lane-tile) zero-coverage test (1 = safe to skip)."""
    P = img_size * img_size
    nt = P // tp
    tiles = jnp.arange(nt)
    r_lo = (tiles * tp) // img_size
    r_hi = ((tiles + 1) * tp - 1) // img_size
    yb_lo = (2.0 * r_lo.astype(jnp.float32) + 1.0) / img_size - 1.0
    yb_hi = (2.0 * r_hi.astype(jnp.float32) + 1.0) / img_size - 1.0
    xb_lo = 1.0 / img_size - 1.0
    xb_hi = (2.0 * (img_size - 1) + 1.0) / img_size - 1.0

    def irange(a, b, c):
        ax_lo = jnp.minimum(a * xb_lo, a * xb_hi)[:, None]
        ax_hi = jnp.maximum(a * xb_lo, a * xb_hi)[:, None]
        by_lo = jnp.minimum(b[:, None] * yb_lo[None, :], b[:, None] * yb_hi[None, :])
        by_hi = jnp.maximum(b[:, None] * yb_lo[None, :], b[:, None] * yb_hi[None, :])
        return c[:, None] + ax_lo + by_lo, c[:, None] + ax_hi + by_hi

    m = 1e-3                                        # conservative margin
    sx_lo, sx_hi = irange(A_x, B_x, C_x)
    sy_lo, sy_hi = irange(A_y, B_y, C_y)
    hit = ((sx_hi > -1.0 - m) & (sx_lo < Wp + m)
           & (sy_hi > -1.0 - m) & (sy_lo < Hp + m))
    return jnp.where(hit, 0, 1).astype(jnp.int32).reshape(-1)


# ----------------------------------------------------------------------------
# Full forward (Pallas path)
# ----------------------------------------------------------------------------
def patch_transformer_forward(adv_patch, lab_batch, img_size, rand,
                              do_rotate=True, rand_loc=True, tp_cap=4096):
    adv_patch = adv_patch.astype(jnp.float32)
    C, Hp, Wp = adv_patch.shape
    assert C == 3 and Hp == Wp
    B, NL, _ = lab_batch.shape
    BN = B * NL

    pooled = median_pool_7x7(adv_patch)                                    # kernel 1

    contrast = rand["contrast"].reshape(BN).astype(jnp.float32)
    brightness = rand["brightness"].reshape(BN).astype(jnp.float32)
    noise = rand["noise"].reshape(BN, C, Hp, Wp).astype(jnp.float32)

    # adv_patch_set == adv_batch[0, 0]: a single tiny sample, plain JAX
    adv_patch_set = jnp.clip(pooled * contrast[0] + brightness[0] + noise[0],
                             CLAMP_LO, CLAMP_HI)

    # --- per-label affine coefficients (tiny scalar math, plain JAX) ---
    lab = lab_batch.astype(jnp.float32)
    cls = lab[:, :, 0].reshape(BN)
    tgt_x = lab[:, :, 1].reshape(BN)
    tgt_y = lab[:, :, 2].reshape(BN)
    tw = lab[:, :, 3].reshape(BN)
    th = lab[:, :, 4].reshape(BN)
    target_size = jnp.sqrt((tw * img_size * 0.2) ** 2 + (th * img_size * 0.2) ** 2)
    if rand_loc:
        tgt_x = tgt_x + tw * rand["loc_off_x"].astype(jnp.float32)
        tgt_y = tgt_y + th * rand["loc_off_y"].astype(jnp.float32)
    tgt_y = tgt_y - 0.05
    scale = target_size / float(Wp)
    angle = (rand["angle"].astype(jnp.float32) if do_rotate
             else jnp.zeros((BN,), jnp.float32))
    tx = (-tgt_x + 0.5) * 2.0
    ty = (-tgt_y + 0.5) * 2.0
    sin_a, cos_a = jnp.sin(angle), jnp.cos(angle)
    t00 = cos_a / scale; t01 = sin_a / scale; t02 = (tx * cos_a + ty * sin_a) / scale
    t10 = -sin_a / scale; t11 = cos_a / scale; t12 = (-tx * sin_a + ty * cos_a) / scale

    pad = (img_size - Wp) / 2
    left_off = int(pad + 0.5)          # ConstantPad2d left / top amounts
    top_off = int(pad + 0.5)
    half = img_size / 2.0
    A_x = t00 * half; B_x = t01 * half; C_x = (t02 + 1.0) * half - 0.5 - left_off
    A_y = t10 * half; B_y = t11 * half; C_y = (t12 + 1.0) * half - 0.5 - top_off
    mscale = 1.0 - cls

    coef = jnp.stack([A_x, B_x, C_x, A_y, B_y, C_y, mscale, contrast, brightness],
                     axis=-1).astype(jnp.float32).reshape(BN * _NCOEF)    # 1-D SMEM

    P = img_size * img_size
    tp = _choose_lane_tile(P, tp_cap)
    skip = _skip_flags(A_x, B_x, C_x, A_y, B_y, C_y, Hp, Wp, img_size, tp)

    pooled2d = pooled.reshape(3 * Hp, Wp)
    noise3d = noise.reshape(BN, 3 * Hp, Wp)
    adv_t_f, msk_t_f, masked_f = warp_patches(pooled2d, noise3d, coef, skip,
                                              Hp, Wp, img_size, tp)        # kernel 2
    shp = (B, NL, C, img_size, img_size)
    return (masked_f.reshape(shp), adv_t_f.reshape(shp),
            msk_t_f.reshape(shp), adv_patch_set)


# ----------------------------------------------------------------------------
# Plain-JAX reference mirroring the PyTorch forward, for verification
# ----------------------------------------------------------------------------
def _affine_grid_sample_ref(img, theta, Ho, Wo):
    C, Hin, Win = img.shape
    xb = (2.0 * jnp.arange(Wo, dtype=jnp.float32) + 1.0) / Wo - 1.0
    yb = (2.0 * jnp.arange(Ho, dtype=jnp.float32) + 1.0) / Ho - 1.0
    xbg = jnp.broadcast_to(xb[None, :], (Ho, Wo))
    ybg = jnp.broadcast_to(yb[:, None], (Ho, Wo))
    xt = theta[0, 0] * xbg + theta[0, 1] * ybg + theta[0, 2]
    yt = theta[1, 0] * xbg + theta[1, 1] * ybg + theta[1, 2]
    ix = ((xt + 1.0) * Win - 1.0) / 2.0
    iy = ((yt + 1.0) * Hin - 1.0) / 2.0
    x0 = jnp.floor(ix); y0 = jnp.floor(iy)

    def fetch(xi, yi):
        valid = (xi >= 0) & (xi <= Win - 1) & (yi >= 0) & (yi <= Hin - 1)
        xc = jnp.clip(xi, 0, Win - 1).astype(jnp.int32)
        yc = jnp.clip(yi, 0, Hin - 1).astype(jnp.int32)
        return img[:, yc, xc] * valid[None].astype(img.dtype)

    wx1 = ix - x0; wx0 = 1.0 - wx1
    wy1 = iy - y0; wy0 = 1.0 - wy1
    return (fetch(x0, y0) * (wx0 * wy0)[None] + fetch(x0 + 1, y0) * (wx1 * wy0)[None]
            + fetch(x0, y0 + 1) * (wx0 * wy1)[None] + fetch(x0 + 1, y0 + 1) * (wx1 * wy1)[None])


def _reference_forward(adv_patch, lab_batch, img_size, rand, do_rotate=True, rand_loc=True):
    adv_patch = adv_patch.astype(jnp.float32)
    C, Hp, Wp = adv_patch.shape
    B, NL, _ = lab_batch.shape
    BN = B * NL
    xp = jnp.pad(adv_patch, ((0, 0), (3, 3), (3, 3)), mode="reflect")
    wins = jnp.stack([xp[:, dy:dy + Hp, dx:dx + Wp]
                      for dy in range(7) for dx in range(7)], axis=0)
    pooled = jnp.median(wins, axis=0)
    adv = (pooled[None, None] * rand["contrast"][:, :, None, None, None]
           + rand["brightness"][:, :, None, None, None] + rand["noise"])
    adv = jnp.clip(adv, 1e-6, 0.99999)
    adv_patch_set = adv[0, 0]
    cls = lab_batch[:, :, 0].astype(jnp.float32)
    msk = jnp.broadcast_to((1.0 - cls)[:, :, None, None, None], adv.shape)
    pad = (img_size - Wp) / 2
    lo, ro, to, bo = int(pad + 0.5), int(pad), int(pad + 0.5), int(pad)
    padw = ((0, 0), (0, 0), (0, 0), (to, bo), (lo, ro))
    adv_p = jnp.pad(adv, padw)
    msk_p = jnp.pad(msk, padw)

    lab = lab_batch.astype(jnp.float32)
    tgt_x = lab[:, :, 1].reshape(BN); tgt_y = lab[:, :, 2].reshape(BN)
    tw = lab[:, :, 3].reshape(BN); th = lab[:, :, 4].reshape(BN)
    target_size = jnp.sqrt((tw * img_size * 0.2) ** 2 + (th * img_size * 0.2) ** 2)
    if rand_loc:
        tgt_x = tgt_x + tw * rand["loc_off_x"]
        tgt_y = tgt_y + th * rand["loc_off_y"]
    tgt_y = tgt_y - 0.05
    scale = target_size / float(Wp)
    angle = rand["angle"] if do_rotate else jnp.zeros((BN,), jnp.float32)
    tx = (-tgt_x + 0.5) * 2.0; ty = (-tgt_y + 0.5) * 2.0
    s_, c_ = jnp.sin(angle), jnp.cos(angle)
    theta = jnp.stack([
        jnp.stack([c_ / scale, s_ / scale, (tx * c_ + ty * s_) / scale], axis=-1),
        jnp.stack([-s_ / scale, c_ / scale, (-tx * s_ + ty * c_) / scale], axis=-1),
    ], axis=1)                                                   # (BN, 2, 3)

    sampler = jax.vmap(_affine_grid_sample_ref, in_axes=(0, 0, None, None))
    adv_t = sampler(adv_p.reshape(BN, C, img_size, img_size), theta, img_size, img_size)
    msk_t = sampler(msk_p.reshape(BN, C, img_size, img_size), theta, img_size, img_size)
    adv_t = jnp.clip(adv_t, 1e-6, 0.99999)
    shp = (B, NL, C, img_size, img_size)
    adv_t = adv_t.reshape(shp); msk_t = msk_t.reshape(shp)
    return adv_t * msk_t, adv_t, msk_t, adv_patch_set


if __name__ == "__main__":
    key = jax.random.PRNGKey(0)
    ks = jax.random.split(key, 9)
    B, NL = 2, 3
    C, Hp, Wp = 3, 16, 16
    img_size = 32
    BN = B * NL

    adv_patch = jax.random.uniform(ks[0], (C, Hp, Wp), jnp.float32)
    cls_col = jnp.array([0.0, 0.0, 1.0, 0.0, 1.0, 1.0], jnp.float32).reshape(B, NL, 1)
    xy = jax.random.uniform(ks[1], (B, NL, 2), jnp.float32, minval=0.3, maxval=0.7)
    wh = jax.random.uniform(ks[2], (B, NL, 2), jnp.float32, minval=0.4, maxval=0.9)
    lab_batch = jnp.concatenate([cls_col, xy, wh], axis=-1)      # (B, NL, 5)

    rand = {
        "contrast": jax.random.uniform(ks[3], (B, NL), jnp.float32, minval=0.8, maxval=1.2),
        "brightness": jax.random.uniform(ks[4], (B, NL), jnp.float32, minval=-0.1, maxval=0.1),
        "noise": jax.random.uniform(ks[5], (B, NL, C, Hp, Wp), jnp.float32,
                                    minval=-1.0, maxval=1.0) * 0.1,
        "angle": jax.random.uniform(ks[6], (BN,), jnp.float32,
                                    minval=-20 / 180 * math.pi, maxval=20 / 180 * math.pi),
        "loc_off_x": jax.random.uniform(ks[7], (BN,), jnp.float32, minval=-0.4, maxval=0.4),
        "loc_off_y": jax.random.uniform(ks[8], (BN,), jnp.float32, minval=-0.4, maxval=0.4),
    }

    # tp_cap=512 -> two lane tiles per sample at this toy size, exercising both
    # the computed and the skipped tile paths.
    outs = patch_transformer_forward(adv_patch, lab_batch, img_size, rand,
                                     do_rotate=True, rand_loc=True, tp_cap=512)
    outs = jax.block_until_ready(outs)
    refs = _reference_forward(adv_patch, lab_batch, img_size, rand,
                              do_rotate=True, rand_loc=True)

    names = ["adv_batch_masked", "adv_batch_t", "msk_batch_t", "adv_patch_set"]
    for name, o, r in zip(names, outs, refs):
        assert o.shape == r.shape, (name, o.shape, r.shape)
        err = float(jnp.max(jnp.abs(o - r)))
        assert jnp.allclose(o, r, atol=1e-3, rtol=1e-3), (name, err)

    print("KERNEL_OK")
</pallas_src>

<mosaic_0001>
module attributes {stable_mosaic.version = 11 : i64} {
  func.func @_median7_kernel(%arg0: i32, %arg1: i32, %arg2: memref<1x22x22xf32, #tpu.memory_space<vmem>>, %arg3: memref<1x16x16xf32, #tpu.memory_space<vmem>>) attributes {dimension_semantics = [#tpu.dimension_semantics<parallel>, #tpu.dimension_semantics<arbitrary>], iteration_bounds = array<i64: 3, 1>, scalar_prefetch = 0 : i64, scratch_operands = 0 : i64, tpu.core_type = #tpu.core_type<tc>, window_params = [{transform_indices = @transform_0, window_bounds = array<i64: 1, 22, 22>}, {transform_indices = @transform_1, window_bounds = array<i64: 1, 16, 16>}]} {
    %c0 = arith.constant 0 : index
    %c0_0 = arith.constant 0 : index
    %c0_1 = arith.constant 0 : index
    %0 = vector.load %arg2[%c0, %c0_0, %c0_1] : memref<1x22x22xf32, #tpu.memory_space<vmem>>, vector<1x16x16xf32>
    %1 = vector.shape_cast %0 : vector<1x16x16xf32> to vector<16x16xf32>
    %c0_2 = arith.constant 0 : index
    %c0_3 = arith.constant 0 : index
    %c1 = arith.constant 1 : index
    %2 = vector.load %arg2[%c0_2, %c0_3, %c1] : memref<1x22x22xf32, #tpu.memory_space<vmem>>, vector<1x16x16xf32>
    %3 = vector.shape_cast %2 : vector<1x16x16xf32> to vector<16x16xf32>
    %c0_4 = arith.constant 0 : index
    %c0_5 = arith.constant 0 : index
    %c2 = arith.constant 2 : index
    %4 = vector.load %arg2[%c0_4, %c0_5, %c2] : memref<1x22x22xf32, #tpu.memory_space<vmem>>, vector<1x16x16xf32>
    %5 = vector.shape_cast %4 : vector<1x16x16xf32> to vector<16x16xf32>
    %c0_6 = arith.constant 0 : index
    %c0_7 = arith.constant 0 : index
    %c3 = arith.constant 3 : index
    %6 = vector.load %arg2[%c0_6, %c0_7, %c3] : memref<1x22x22xf32, #tpu.memory_space<vmem>>, vector<1x16x16xf32>
    %7 = vector.shape_cast %6 : vector<1x16x16xf32> to vector<16x16xf32>
    %c0_8 = arith.constant 0 : index
    %c0_9 = arith.constant 0 : index
    %c4 = arith.constant 4 : index
    %8 = vector.load %arg2[%c0_8, %c0_9, %c4] : memref<1x22x22xf32, #tpu.memory_space<vmem>>, vector<1x16x16xf32>
    %9 = vector.shape_cast %8 : vector<1x16x16xf32> to vector<16x16xf32>
    %c0_10 = arith.constant 0 : index
    %c0_11 = arith.constant 0 : index
    %c5 = arith.constant 5 : index
    %10 = vector.load %arg2[%c0_10, %c0_11, %c5] : memref<1x22x22xf32, #tpu.memory_space<vmem>>, vector<1x16x16xf32>
    %11 = vector.shape_cast %10 : vector<1x16x16xf32> to vector<16x16xf32>
    %c0_12 = arith.constant 0 : index
    %c0_13 = arith.constant 0 : index
    %c6 = arith.constant 6 : index
    %12 = vector.load %arg2[%c0_12, %c0_13, %c6] : memref<1x22x22xf32, #tpu.memory_space<vmem>>, vector<1x16x16xf32>
    %13 = vector.shape_cast %12 : vector<1x16x16xf32> to vector<16x16xf32>
    %c0_14 = arith.constant 0 : index
    %c1_15 = arith.constant 1 : index
    %c0_16 = arith.constant 0 : index
    %14 = vector.load %arg2[%c0_14, %c1_15, %c0_16] : memref<1x22x22xf32, #tpu.memory_space<vmem>>, vector<1x16x16xf32>
    %15 = vector.shape_cast %14 : vector<1x16x16xf32> to vector<16x16xf32>
    %c0_17 = arith.constant 0 : index
    %c1_18 = arith.constant 1 : index
    %c1_19 = arith.constant 1 : index
    %16 = vector.load %arg2[%c0_17, %c1_18, %c1_19] : memref<1x22x22xf32, #tpu.memory_space<vmem>>, vector<1x16x16xf32>
    %17 = vector.shape_cast %16 : vector<1x16x16xf32> to vector<16x16xf32>
    %c0_20 = arith.constant 0 : index
    %c1_21 = arith.constant 1 : index
    %c2_22 = arith.constant 2 : index
    %18 = vector.load %arg2[%c0_20, %c1_21, %c2_22] : memref<1x22x22xf32, #tpu.memory_space<vmem>>, vector<1x16x16xf32>
    %19 = vector.shape_cast %18 : vector<1x16x16xf32> to vector<16x16xf32>
    %c0_23 = arith.constant 0 : index
    %c1_24 = arith.constant 1 : index
    %c3_25 = arith.constant 3 : index
    %20 = vector.load %arg2[%c0_23, %c1_24, %c3_25] : memref<1x22x22xf32, #tpu.memory_space<vmem>>, vector<1x16x16xf32>
    %21 = vector.shape_cast %20 : vector<1x16x16xf32> to vector<16x16xf32>
    %c0_26 = arith.constant 0 : index
    %c1_27 = arith.constant 1 : index
    %c4_28 = arith.constant 4 : index
    %22 = vector.load %arg2[%c0_26, %c1_27, %c4_28] : memref<1x22x22xf32, #tpu.memory_space<vmem>>, vector<1x16x16xf32>
    %23 = vector.shape_cast %22 : vector<1x16x16xf32> to vector<16x16xf32>
    %c0_29 = arith.constant 0 : index
    %c1_30 = arith.constant 1 : index
    %c5_31 = arith.constant 5 : index
    %24 = vector.load %arg2[%c0_29, %c1_30, %c5_31] : memref<1x22x22xf32, #tpu.memory_space<vmem>>, vector<1x16x16xf32>
    %25 = vector.shape_cast %24 : vector<1x16x16xf32> to vector<16x16xf32>
    %c0_32 = arith.constant 0 : index
    %c1_33 = arith.constant 1 : index
    %c6_34 = arith.constant 6 : index
    %26 = vector.load %arg2[%c0_32, %c1_33, %c6_34] : memref<1x22x22xf32, #tpu.memory_space<vmem>>, vector<1x16x16xf32>
    %27 = vector.shape_cast %26 : vector<1x16x16xf32> to vector<16x16xf32>
    %c0_35 = arith.constant 0 : index
    %c2_36 = arith.constant 2 : index
    %c0_37 = arith.constant 0 : index
    %28 = vector.load %arg2[%c0_35, %c2_36, %c0_37] : memref<1x22x22xf32, #tpu.memory_space<vmem>>, vector<1x16x16xf32>
    %29 = vector.shape_cast %28 : vector<1x16x16xf32> to vector<16x16xf32>
    %c0_38 = arith.constant 0 : index
    %c2_39 = arith.constant 2 : index
    %c1_40 = arith.constant 1 : index
    %30 = vector.load %arg2[%c0_38, %c2_39, %c1_40] : memref<1x22x22xf32, #tpu.memory_space<vmem>>, vector<1x16x16xf32>
    %31 = vector.shape_cast %30 : vector<1x16x16xf32> to vector<16x16xf32>
    %c0_41 = arith.constant 0 : index
    %c2_42 = arith.constant 2 : index
    %c2_43 = arith.constant 2 : index
    %32 = vector.load %arg2[%c0_41, %c2_42, %c2_43] : memref<1x22x22xf32, #tpu.memory_space<vmem>>, vector<1x16x16xf32>
    %33 = vector.shape_cast %32 : vector<1x16x16xf32> to vector<16x16xf32>
    %c0_44 = arith.constant 0 : index
    %c2_45 = arith.constant 2 : index
    %c3_46 = arith.constant 3 : index
    %34 = vector.load %arg2[%c0_44, %c2_45, %c3_46] : memref<1x22x22xf32, #tpu.memory_space<vmem>>, vector<1x16x16xf32>
    %35 = vector.shape_cast %34 : vector<1x16x16xf32> to vector<16x16xf32>
    %c0_47 = arith.constant 0 : index
    %c2_48 = arith.constant 2 : index
    %c4_49 = arith.constant 4 : index
    %36 = vector.load %arg2[%c0_47, %c2_48, %c4_49] : memref<1x22x22xf32, #tpu.memory_space<vmem>>, vector<1x16x16xf32>
    %37 = vector.shape_cast %36 : vector<1x16x16xf32> to vector<16x16xf32>
    %c0_50 = arith.constant 0 : index
    %c2_51 = arith.constant 2 : index
    %c5_52 = arith.constant 5 : index
    %38 = vector.load %arg2[%c0_50, %c2_51, %c5_52] : memref<1x22x22xf32, #tpu.memory_space<vmem>>, vector<1x16x16xf32>
    %39 = vector.shape_cast %38 : vector<1x16x16xf32> to vector<16x16xf32>
    %c0_53 = arith.constant 0 : index
    %c2_54 = arith.constant 2 : index
    %c6_55 = arith.constant 6 : index
    %40 = vector.load %arg2[%c0_53, %c2_54, %c6_55] : memref<1x22x22xf32, #tpu.memory_space<vmem>>, vector<1x16x16xf32>
    %41 = vector.shape_cast %40 : vector<1x16x16xf32> to vector<16x16xf32>
    %c0_56 = arith.constant 0 : index
    %c3_57 = arith.constant 3 : index
    %c0_58 = arith.constant 0 : index
    %42 = vector.load %arg2[%c0_56, %c3_57, %c0_58] : memref<1x22x22xf32, #tpu.memory_space<vmem>>, vector<1x16x16xf32>
    %43 = vector.shape_cast %42 : vector<1x16x16xf32> to vector<16x16xf32>
    %c0_59 = arith.constant 0 : index
    %c3_60 = arith.constant 3 : index
    %c1_61 = arith.constant 1 : index
    %44 = vector.load %arg2[%c0_59, %c3_60, %c1_61] : memref<1x22x22xf32, #tpu.memory_space<vmem>>, vector<1x16x16xf32>
    %45 = vector.shape_cast %44 : vector<1x16x16xf32> to vector<16x16xf32>
    %c0_62 = arith.constant 0 : index
    %c3_63 = arith.constant 3 : index
    %c2_64 = arith.constant 2 : index
    %46 = vector.load %arg2[%c0_62, %c3_63, %c2_64] : memref<1x22x22xf32, #tpu.memory_space<vmem>>, vector<1x16x16xf32>
    %47 = vector.shape_cast %46 : vector<1x16x16xf32> to vector<16x16xf32>
    %c0_65 = arith.constant 0 : index
    %c3_66 = arith.constant 3 : index
    %c3_67 = arith.constant 3 : index
    %48 = vector.load %arg2[%c0_65, %c3_66, %c3_67] : memref<1x22x22xf32, #tpu.memory_space<vmem>>, vector<1x16x16xf32>
    %49 = vector.shape_cast %48 : vector<1x16x16xf32> to vector<16x16xf32>
    %c0_68 = arith.constant 0 : index
    %c3_69 = arith.constant 3 : index
    %c4_70 = arith.constant 4 : index
    %50 = vector.load %arg2[%c0_68, %c3_69, %c4_70] : memref<1x22x22xf32, #tpu.memory_space<vmem>>, vector<1x16x16xf32>
    %51 = vector.shape_cast %50 : vector<1x16x16xf32> to vector<16x16xf32>
    %c0_71 = arith.constant 0 : index
    %c3_72 = arith.constant 3 : index
    %c5_73 = arith.constant 5 : index
    %52 = vector.load %arg2[%c0_71, %c3_72, %c5_73] : memref<1x22x22xf32, #tpu.memory_space<vmem>>, vector<1x16x16xf32>
    %53 = vector.shape_cast %52 : vector<1x16x16xf32> to vector<16x16xf32>
    %c0_74 = arith.constant 0 : index
    %c3_75 = arith.constant 3 : index
    %c6_76 = arith.constant 6 : index
    %54 = vector.load %arg2[%c0_74, %c3_75, %c6_76] : memref<1x22x22xf32, #tpu.memory_space<vmem>>, vector<1x16x16xf32>
    %55 = vector.shape_cast %54 : vector<1x16x16xf32> to vector<16x16xf32>
    %c0_77 = arith.constant 0 : index
    %c4_78 = arith.constant 4 : index
    %c0_79 = arith.constant 0 : index
    %56 = vector.load %arg2[%c0_77, %c4_78, %c0_79] : memref<1x22x22xf32, #tpu.memory_space<vmem>>, vector<1x16x16xf32>
    %57 = vector.shape_cast %56 : vector<1x16x16xf32> to vector<16x16xf32>
    %c0_80 = arith.constant 0 : index
    %c4_81 = arith.constant 4 : index
    %c1_82 = arith.constant 1 : index
    %58 = vector.load %arg2[%c0_80, %c4_81, %c1_82] : memref<1x22x22xf32, #tpu.memory_space<vmem>>, vector<1x16x16xf32>
    %59 = vector.shape_cast %58 : vector<1x16x16xf32> to vector<16x16xf32>
    %c0_83 = arith.constant 0 : index
    %c4_84 = arith.constant 4 : index
    %c2_85 = arith.constant 2 : index
    %60 = vector.load %arg2[%c0_83, %c4_84, %c2_85] : memref<1x22x22xf32, #tpu.memory_space<vmem>>, vector<1x16x16xf32>
    %61 = vector.shape_cast %60 : vector<1x16x16xf32> to vector<16x16xf32>
    %c0_86 = arith.constant 0 : index
    %c4_87 = arith.constant 4 : index
    %c3_88 = arith.constant 3 : index
    %62 = vector.load %arg2[%c0_86, %c4_87, %c3_88] : memref<1x22x22xf32, #tpu.memory_space<vmem>>, vector<1x16x16xf32>
    %63 = vector.shape_cast %62 : vector<1x16x16xf32> to vector<16x16xf32>
    %c0_89 = arith.constant 0 : index
    %c4_90 = arith.constant 4 : index
    %c4_91 = arith.constant 4 : index
    %64 = vector.load %arg2[%c0_89, %c4_90, %c4_91] : memref<1x22x22xf32, #tpu.memory_space<vmem>>, vector<1x16x16xf32>
    %65 = vector.shape_cast %64 : vector<1x16x16xf32> to vector<16x16xf32>
    %c0_92 = arith.constant 0 : index
    %c4_93 = arith.constant 4 : index
    %c5_94 = arith.constant 5 : index
    %66 = vector.load %arg2[%c0_92, %c4_93, %c5_94] : memref<1x22x22xf32, #tpu.memory_space<vmem>>, vector<1x16x16xf32>
    %67 = vector.shape_cast %66 : vector<1x16x16xf32> to vector<16x16xf32>
    %c0_95 = arith.constant 0 : index
    %c4_96 = arith.constant 4 : index
    %c6_97 = arith.constant 6 : index
    %68 = vector.load %arg2[%c0_95, %c4_96, %c6_97] : memref<1x22x22xf32, #tpu.memory_space<vmem>>, vector<1x16x16xf32>
    %69 = vector.shape_cast %68 : vector<1x16x16xf32> to vector<16x16xf32>
    %c0_98 = arith.constant 0 : index
    %c5_99 = arith.constant 5 : index
    %c0_100 = arith.constant 0 : index
    %70 = vector.load %arg2[%c0_98, %c5_99, %c0_100] : memref<1x22x22xf32, #tpu.memory_space<vmem>>, vector<1x16x16xf32>
    %71 = vector.shape_cast %70 : vector<1x16x16xf32> to vector<16x16xf32>
    %c0_101 = arith.constant 0 : index
    %c5_102 = arith.constant 5 : index
    %c1_103 = arith.constant 1 : index
    %72 = vector.load %arg2[%c0_101, %c5_102, %c1_103] : memref<1x22x22xf32, #tpu.memory_space<vmem>>, vector<1x16x16xf32>
    %73 = vector.shape_cast %72 : vector<1x16x16xf32> to vector<16x16xf32>
    %c0_104 = arith.constant 0 : index
    %c5_105 = arith.constant 5 : index
    %c2_106 = arith.constant 2 : index
    %74 = vector.load %arg2[%c0_104, %c5_105, %c2_106] : memref<1x22x22xf32, #tpu.memory_space<vmem>>, vector<1x16x16xf32>
    %75 = vector.shape_cast %74 : vector<1x16x16xf32> to vector<16x16xf32>
    %c0_107 = arith.constant 0 : index
    %c5_108 = arith.constant 5 : index
    %c3_109 = arith.constant 3 : index
    %76 = vector.load %arg2[%c0_107, %c5_108, %c3_109] : memref<1x22x22xf32, #tpu.memory_space<vmem>>, vector<1x16x16xf32>
    %77 = vector.shape_cast %76 : vector<1x16x16xf32> to vector<16x16xf32>
    %c0_110 = arith.constant 0 : index
    %c5_111 = arith.constant 5 : index
    %c4_112 = arith.constant 4 : index
    %78 = vector.load %arg2[%c0_110, %c5_111, %c4_112] : memref<1x22x22xf32, #tpu.memory_space<vmem>>, vector<1x16x16xf32>
    %79 = vector.shape_cast %78 : vector<1x16x16xf32> to vector<16x16xf32>
    %c0_113 = arith.constant 0 : index
    %c5_114 = arith.constant 5 : index
    %c5_115 = arith.constant 5 : index
    %80 = vector.load %arg2[%c0_113, %c5_114, %c5_115] : memref<1x22x22xf32, #tpu.memory_space<vmem>>, vector<1x16x16xf32>
    %81 = vector.shape_cast %80 : vector<1x16x16xf32> to vector<16x16xf32>
    %c0_116 = arith.constant 0 : index
    %c5_117 = arith.constant 5 : index
    %c6_118 = arith.constant 6 : index
    %82 = vector.load %arg2[%c0_116, %c5_117, %c6_118] : memref<1x22x22xf32, #tpu.memory_space<vmem>>, vector<1x16x16xf32>
    %83 = vector.shape_cast %82 : vector<1x16x16xf32> to vector<16x16xf32>
    %c0_119 = arith.constant 0 : index
    %c6_120 = arith.constant 6 : index
    %c0_121 = arith.constant 0 : index
    %84 = vector.load %arg2[%c0_119, %c6_120, %c0_121] : memref<1x22x22xf32, #tpu.memory_space<vmem>>, vector<1x16x16xf32>
    %85 = vector.shape_cast %84 : vector<1x16x16xf32> to vector<16x16xf32>
    %c0_122 = arith.constant 0 : index
    %c6_123 = arith.constant 6 : index
    %c1_124 = arith.constant 1 : index
    %86 = vector.load %arg2[%c0_122, %c6_123, %c1_124] : memref<1x22x22xf32, #tpu.memory_space<vmem>>, vector<1x16x16xf32>
    %87 = vector.shape_cast %86 : vector<1x16x16xf32> to vector<16x16xf32>
    %c0_125 = arith.constant 0 : index
    %c6_126 = arith.constant 6 : index
    %c2_127 = arith.constant 2 : index
    %88 = vector.load %arg2[%c0_125, %c6_126, %c2_127] : memref<1x22x22xf32, #tpu.memory_space<vmem>>, vector<1x16x16xf32>
    %89 = vector.shape_cast %88 : vector<1x16x16xf32> to vector<16x16xf32>
    %c0_128 = arith.constant 0 : index
    %c6_129 = arith.constant 6 : index
    %c3_130 = arith.constant 3 : index
    %90 = vector.load %arg2[%c0_128, %c6_129, %c3_130] : memref<1x22x22xf32, #tpu.memory_space<vmem>>, vector<1x16x16xf32>
    %91 = vector.shape_cast %90 : vector<1x16x16xf32> to vector<16x16xf32>
    %c0_131 = arith.constant 0 : index
    %c6_132 = arith.constant 6 : index
    %c4_133 = arith.constant 4 : index
    %92 = vector.load %arg2[%c0_131, %c6_132, %c4_133] : memref<1x22x22xf32, #tpu.memory_space<vmem>>, vector<1x16x16xf32>
    %93 = vector.shape_cast %92 : vector<1x16x16xf32> to vector<16x16xf32>
    %c0_134 = arith.constant 0 : index
    %c6_135 = arith.constant 6 : index
    %c5_136 = arith.constant 5 : index
    %94 = vector.load %arg2[%c0_134, %c6_135, %c5_136] : memref<1x22x22xf32, #tpu.memory_space<vmem>>, vector<1x16x16xf32>
    %95 = vector.shape_cast %94 : vector<1x16x16xf32> to vector<16x16xf32>
    %c0_137 = arith.constant 0 : index
    %c6_138 = arith.constant 6 : index
    %c6_139 = arith.constant 6 : index
    %96 = vector.load %arg2[%c0_137, %c6_138, %c6_139] : memref<1x22x22xf32, #tpu.memory_space<vmem>>, vector<1x16x16xf32>
    %97 = vector.shape_cast %96 : vector<1x16x16xf32> to vector<16x16xf32>
    %98 = arith.minimumf %1, %3 : vector<16x16xf32>
    %99 = arith.maximumf %1, %3 : vector<16x16xf32>
    %100 = arith.minimumf %5, %7 : vector<16x16xf32>
    %101 = arith.maximumf %5, %7 : vector<16x16xf32>
    %102 = arith.minimumf %98, %100 : vector<16x16xf32>
    %103 = arith.maximumf %98, %100 : vector<16x16xf32>
    %104 = arith.minimumf %99, %101 : vector<16x16xf32>
    %105 = arith.maximumf %99, %101 : vector<16x16xf32>
    %106 = arith.minimumf %104, %103 : vector<16x16xf32>
    %107 = arith.maximumf %104, %103 : vector<16x16xf32>
    %108 = arith.minimumf %9, %11 : vector<16x16xf32>
    %109 = arith.maximumf %9, %11 : vector<16x16xf32>
    %110 = arith.minimumf %13, %15 : vector<16x16xf32>
    %111 = arith.maximumf %13, %15 : vector<16x16xf32>
    %112 = arith.minimumf %108, %110 : vector<16x16xf32>
    %113 = arith.maximumf %108, %110 : vector<16x16xf32>
    %114 = arith.minimumf %109, %111 : vector<16x16xf32>
    %115 = arith.maximumf %109, %111 : vector<16x16xf32>
    %116 = arith.minimumf %114, %113 : vector<16x16xf32>
    %117 = arith.maximumf %114, %113 : vector<16x16xf32>
    %118 = arith.minimumf %102, %112 : vector<16x16xf32>
    %119 = arith.maximumf %102, %112 : vector<16x16xf32>
    %120 = arith.minimumf %107, %117 : vector<16x16xf32>
    %121 = arith.maximumf %107, %117 : vector<16x16xf32>
    %122 = arith.minimumf %120, %119 : vector<16x16xf32>
    %123 = arith.maximumf %120, %119 : vector<16x16xf32>
    %124 = arith.minimumf %106, %116 : vector<16x16xf32>
    %125 = arith.maximumf %106, %116 : vector<16x16xf32>
    %126 = arith.minimumf %105, %115 : vector<16x16xf32>
    %127 = arith.maximumf %105, %115 : vector<16x16xf32>
    %128 = arith.minimumf %126, %125 : vector<16x16xf32>
    %129 = arith.maximumf %126, %125 : vector<16x16xf32>
    %130 = arith.minimumf %124, %122 : vector<16x16xf32>
    %131 = arith.maximumf %124, %122 : vector<16x16xf32>
    %132 = arith.minimumf %128, %123 : vector<16x16xf32>
    %133 = arith.maximumf %128, %123 : vector<16x16xf32>
    %134 = arith.minimumf %129, %121 : vector<16x16xf32>
    %135 = arith.maximumf %129, %121 : vector<16x16xf32>
    %136 = arith.minimumf %17, %19 : vector<16x16xf32>
    %137 = arith.maximumf %17, %19 : vector<16x16xf32>
    %138 = arith.minimumf %21, %23 : vector<16x16xf32>
    %139 = arith.maximumf %21, %23 : vector<16x16xf32>
    %140 = arith.minimumf %136, %138 : vector<16x16xf32>
    %141 = arith.maximumf %136, %138 : vector<16x16xf32>
    %142 = arith.minimumf %137, %139 : vector<16x16xf32>
    %143 = arith.maximumf %137, %139 : vector<16x16xf32>
    %144 = arith.minimumf %142, %141 : vector<16x16xf32>
    %145 = arith.maximumf %142, %141 : vector<16x16xf32>
    %146 = arith.minimumf %25, %27 : vector<16x16xf32>
    %147 = arith.maximumf %25, %27 : vector<16x16xf32>
    %148 = arith.minimumf %29, %31 : vector<16x16xf32>
    %149 = arith.maximumf %29, %31 : vector<16x16xf32>
    %150 = arith.minimumf %146, %148 : vector<16x16xf32>
    %151 = arith.maximumf %146, %148 : vector<16x16xf32>
    %152 = arith.minimumf %147, %149 : vector<16x16xf32>
    %153 = arith.maximumf %147, %149 : vector<16x16xf32>
    %154 = arith.minimumf %152, %151 : vector<16x16xf32>
    %155 = arith.maximumf %152, %151 : vector<16x16xf32>
    %156 = arith.minimumf %140, %150 : vector<16x16xf32>
    %157 = arith.maximumf %140, %150 : vector<16x16xf32>
    %158 = arith.minimumf %145, %155 : vector<16x16xf32>
    %159 = arith.maximumf %145, %155 : vector<16x16xf32>
    %160 = arith.minimumf %158, %157 : vector<16x16xf32>
    %161 = arith.maximumf %158, %157 : vector<16x16xf32>
    %162 = arith.minimumf %144, %154 : vector<16x16xf32>
    %163 = arith.maximumf %144, %154 : vector<16x16xf32>
    %164 = arith.minimumf %143, %153 : vector<16x16xf32>
    %165 = arith.maximumf %143, %153 : vector<16x16xf32>
    %166 = arith.minimumf %164, %163 : vector<16x16xf32>
    %167 = arith.maximumf %164, %163 : vector<16x16xf32>
    %168 = arith.minimumf %162, %160 : vector<16x16xf32>
    %169 = arith.maximumf %162, %160 : vector<16x16xf32>
    %170 = arith.minimumf %166, %161 : vector<16x16xf32>
    %171 = arith.maximumf %166, %161 : vector<16x16xf32>
    %172 = arith.minimumf %167, %159 : vector<16x16xf32>
    %173 = arith.maximumf %167, %159 : vector<16x16xf32>
    %174 = arith.minimumf %118, %156 : vector<16x16xf32>
    %175 = arith.maximumf %118, %156 : vector<16x16xf32>
    %176 = arith.minimumf %133, %171 : vector<16x16xf32>
    %177 = arith.maximumf %133, %171 : vector<16x16xf32>
    %178 = arith.minimumf %176, %175 : vector<16x16xf32>
    %179 = arith.maximumf %176, %175 : vector<16x16xf32>
    %180 = arith.minimumf %131, %169 : vector<16x16xf32>
    %181 = arith.maximumf %131, %169 : vector<16x16xf32>
    %182 = arith.minimumf %135, %173 : vector<16x16xf32>
    %183 = arith.maximumf %135, %173 : vector<16x16xf32>
    %184 = arith.minimumf %182, %181 : vector<16x16xf32>
    %185 = arith.maximumf %182, %181 : vector<16x16xf32>
    %186 = arith.minimumf %180, %178 : vector<16x16xf32>
    %187 = arith.maximumf %180, %178 : vector<16x16xf32>
    %188 = arith.minimumf %184, %179 : vector<16x16xf32>
    %189 = arith.maximumf %184, %179 : vector<16x16xf32>
    %190 = arith.minimumf %185, %177 : vector<16x16xf32>
    %191 = arith.maximumf %185, %177 : vector<16x16xf32>
    %192 = arith.minimumf %130, %168 : vector<16x16xf32>
    %193 = arith.maximumf %130, %168 : vector<16x16xf32>
    %194 = arith.minimumf %134, %172 : vector<16x16xf32>
    %195 = arith.maximumf %134, %172 : vector<16x16xf32>
    %196 = arith.minimumf %194, %193 : vector<16x16xf32>
    %197 = arith.maximumf %194, %193 : vector<16x16xf32>
    %198 = arith.minimumf %132, %170 : vector<16x16xf32>
    %199 = arith.maximumf %132, %170 : vector<16x16xf32>
    %200 = arith.minimumf %127, %165 : vector<16x16xf32>
    %201 = arith.maximumf %127, %165 : vector<16x16xf32>
    %202 = arith.minimumf %200, %199 : vector<16x16xf32>
    %203 = arith.maximumf %200, %199 : vector<16x16xf32>
    %204 = arith.minimumf %198, %196 : vector<16x16xf32>
    %205 = arith.maximumf %198, %196 : vector<16x16xf32>
    %206 = arith.minimumf %202, %197 : vector<16x16xf32>
    %207 = arith.maximumf %202, %197 : vector<16x16xf32>
    %208 = arith.minimumf %203, %195 : vector<16x16xf32>
    %209 = arith.maximumf %203, %195 : vector<16x16xf32>
    %210 = arith.minimumf %192, %186 : vector<16x16xf32>
    %211 = arith.maximumf %192, %186 : vector<16x16xf32>
    %212 = arith.minimumf %204, %187 : vector<16x16xf32>
    %213 = arith.maximumf %204, %187 : vector<16x16xf32>
    %214 = arith.minimumf %205, %188 : vector<16x16xf32>
    %215 = arith.maximumf %205, %188 : vector<16x16xf32>
    %216 = arith.minimumf %206, %189 : vector<16x16xf32>
    %217 = arith.maximumf %206, %189 : vector<16x16xf32>
    %218 = arith.minimumf %207, %190 : vector<16x16xf32>
    %219 = arith.maximumf %207, %190 : vector<16x16xf32>
    %220 = arith.minimumf %208, %191 : vector<16x16xf32>
    %221 = arith.maximumf %208, %191 : vector<16x16xf32>
    %222 = arith.minimumf %209, %183 : vector<16x16xf32>
    %223 = arith.maximumf %209, %183 : vector<16x16xf32>
    %224 = arith.minimumf %33, %35 : vector<16x16xf32>
    %225 = arith.maximumf %33, %35 : vector<16x16xf32>
    %226 = arith.minimumf %37, %39 : vector<16x16xf32>
    %227 = arith.maximumf %37, %39 : vector<16x16xf32>
    %228 = arith.minimumf %224, %226 : vector<16x16xf32>
    %229 = arith.maximumf %224, %226 : vector<16x16xf32>
    %230 = arith.minimumf %225, %227 : vector<16x16xf32>
    %231 = arith.maximumf %225, %227 : vector<16x16xf32>
    %232 = arith.minimumf %230, %229 : vector<16x16xf32>
    %233 = arith.maximumf %230, %229 : vector<16x16xf32>
    %234 = arith.minimumf %41, %43 : vector<16x16xf32>
    %235 = arith.maximumf %41, %43 : vector<16x16xf32>
    %236 = arith.minimumf %45, %47 : vector<16x16xf32>
    %237 = arith.maximumf %45, %47 : vector<16x16xf32>
    %238 = arith.minimumf %234, %236 : vector<16x16xf32>
    %239 = arith.maximumf %234, %236 : vector<16x16xf32>
    %240 = arith.minimumf %235, %237 : vector<16x16xf32>
    %241 = arith.maximumf %235, %237 : vector<16x16xf32>
    %242 = arith.minimumf %240, %239 : vector<16x16xf32>
    %243 = arith.maximumf %240, %239 : vector<16x16xf32>
    %244 = arith.minimumf %228, %238 : vector<16x16xf32>
    %245 = arith.maximumf %228, %238 : vector<16x16xf32>
    %246 = arith.minimumf %233, %243 : vector<16x16xf32>
    %247 = arith.maximumf %233, %243 : vector<16x16xf32>
    %248 = arith.minimumf %246, %245 : vector<16x16xf32>
    %249 = arith.maximumf %246, %245 : vector<16x16xf32>
    %250 = arith.minimumf %232, %242 : vector<16x16xf32>
    %251 = arith.maximumf %232, %242 : vector<16x16xf32>
    %252 = arith.minimumf %231, %241 : vector<16x16xf32>
    %253 = arith.maximumf %231, %241 : vector<16x16xf32>
    %254 = arith.minimumf %252, %251 : vector<16x16xf32>
    %255 = arith.maximumf %252, %251 : vector<16x16xf32>
    %256 = arith.minimumf %250, %248 : vector<16x16xf32>
    %257 = arith.maximumf %250, %248 : vector<16x16xf32>
    %258 = arith.minimumf %254, %249 : vector<16x16xf32>
    %259 = arith.maximumf %254, %249 : vector<16x16xf32>
    %260 = arith.minimumf %255, %247 : vector<16x16xf32>
    %261 = arith.maximumf %255, %247 : vector<16x16xf32>
    %262 = arith.minimumf %49, %51 : vector<16x16xf32>
    %263 = arith.maximumf %49, %51 : vector<16x16xf32>
    %264 = arith.minimumf %53, %55 : vector<16x16xf32>
    %265 = arith.maximumf %53, %55 : vector<16x16xf32>
    %266 = arith.minimumf %262, %264 : vector<16x16xf32>
    %267 = arith.maximumf %262, %264 : vector<16x16xf32>
    %268 = arith.minimumf %263, %265 : vector<16x16xf32>
    %269 = arith.maximumf %263, %265 : vector<16x16xf32>
    %270 = arith.minimumf %268, %267 : vector<16x16xf32>
    %271 = arith.maximumf %268, %267 : vector<16x16xf32>
    %272 = arith.minimumf %57, %59 : vector<16x16xf32>
    %273 = arith.maximumf %57, %59 : vector<16x16xf32>
    %274 = arith.minimumf %61, %63 : vector<16x16xf32>
    %275 = arith.maximumf %61, %63 : vector<16x16xf32>
    %276 = arith.minimumf %272, %274 : vector<16x16xf32>
    %277 = arith.maximumf %272, %274 : vector<16x16xf32>
    %278 = arith.minimumf %273, %275 : vector<16x16xf32>
    %279 = arith.maximumf %273, %275 : vector<16x16xf32>
    %280 = arith.minimumf %278, %277 : vector<16x16xf32>
    %281 = arith.maximumf %278, %277 : vector<16x16xf32>
    %282 = arith.minimumf %266, %276 : vector<16x16xf32>
    %283 = arith.maximumf %266, %276 : vector<16x16xf32>
    %284 = arith.minimumf %271, %281 : vector<16x16xf32>
    %285 = arith.maximumf %271, %281 : vector<16x16xf32>
    %286 = arith.minimumf %284, %283 : vector<16x16xf32>
    %287 = arith.maximumf %284, %283 : vector<16x16xf32>
    %288 = arith.minimumf %270, %280 : vector<16x16xf32>
    %289 = arith.maximumf %270, %280 : vector<16x16xf32>
    %290 = arith.minimumf %269, %279 : vector<16x16xf32>
    %291 = arith.maximumf %269, %279 : vector<16x16xf32>
    %292 = arith.minimumf %290, %289 : vector<16x16xf32>
    %293 = arith.maximumf %290, %289 : vector<16x16xf32>
    %294 = arith.minimumf %288, %286 : vector<16x16xf32>
    %295 = arith.maximumf %288, %286 : vector<16x16xf32>
    %296 = arith.minimumf %292, %287 : vector<16x16xf32>
    %297 = arith.maximumf %292, %287 : vector<16x16xf32>
    %298 = arith.minimumf %293, %285 : vector<16x16xf32>
    %299 = arith.maximumf %293, %285 : vector<16x16xf32>
    %300 = arith.minimumf %244, %282 : vector<16x16xf32>
    %301 = arith.maximumf %244, %282 : vector<16x16xf32>
    %302 = arith.minimumf %259, %297 : vector<16x16xf32>
    %303 = arith.maximumf %259, %297 : vector<16x16xf32>
    %304 = arith.minimumf %302, %301 : vector<16x16xf32>
    %305 = arith.maximumf %302, %301 : vector<16x16xf32>
    %306 = arith.minimumf %257, %295 : vector<16x16xf32>
    %307 = arith.maximumf %257, %295 : vector<16x16xf32>
    %308 = arith.minimumf %261, %299 : vector<16x16xf32>
    %309 = arith.maximumf %261, %299 : vector<16x16xf32>
    %310 = arith.minimumf %308, %307 : vector<16x16xf32>
    %311 = arith.maximumf %308, %307 : vector<16x16xf32>
    %312 = arith.minimumf %306, %304 : vector<16x16xf32>
    %313 = arith.maximumf %306, %304 : vector<16x16xf32>
    %314 = arith.minimumf %310, %305 : vector<16x16xf32>
    %315 = arith.maximumf %310, %305 : vector<16x16xf32>
    %316 = arith.minimumf %311, %303 : vector<16x16xf32>
    %317 = arith.maximumf %311, %303 : vector<16x16xf32>
    %318 = arith.minimumf %256, %294 : vector<16x16xf32>
    %319 = arith.maximumf %256, %294 : vector<16x16xf32>
    %320 = arith.minimumf %260, %298 : vector<16x16xf32>
    %321 = arith.maximumf %260, %298 : vector<16x16xf32>
    %322 = arith.minimumf %320, %319 : vector<16x16xf32>
    %323 = arith.maximumf %320, %319 : vector<16x16xf32>
    %324 = arith.minimumf %258, %296 : vector<16x16xf32>
    %325 = arith.maximumf %258, %296 : vector<16x16xf32>
    %326 = arith.minimumf %253, %291 : vector<16x16xf32>
    %327 = arith.maximumf %253, %291 : vector<16x16xf32>
    %328 = arith.minimumf %326, %325 : vector<16x16xf32>
    %329 = arith.maximumf %326, %325 : vector<16x16xf32>
    %330 = arith.minimumf %324, %322 : vector<16x16xf32>
    %331 = arith.maximumf %324, %322 : vector<16x16xf32>
    %332 = arith.minimumf %328, %323 : vector<16x16xf32>
    %333 = arith.maximumf %328, %323 : vector<16x16xf32>
    %334 = arith.minimumf %329, %321 : vector<16x16xf32>
    %335 = arith.maximumf %329, %321 : vector<16x16xf32>
    %336 = arith.minimumf %318, %312 : vector<16x16xf32>
    %337 = arith.maximumf %318, %312 : vector<16x16xf32>
    %338 = arith.minimumf %330, %313 : vector<16x16xf32>
    %339 = arith.maximumf %330, %313 : vector<16x16xf32>
    %340 = arith.minimumf %331, %314 : vector<16x16xf32>
    %341 = arith.maximumf %331, %314 : vector<16x16xf32>
    %342 = arith.minimumf %332, %315 : vector<16x16xf32>
    %343 = arith.maximumf %332, %315 : vector<16x16xf32>
    %344 = arith.minimumf %333, %316 : vector<16x16xf32>
    %345 = arith.maximumf %333, %316 : vector<16x16xf32>
    %346 = arith.minimumf %334, %317 : vector<16x16xf32>
    %347 = arith.maximumf %334, %317 : vector<16x16xf32>
    %348 = arith.minimumf %335, %309 : vector<16x16xf32>
    %349 = arith.maximumf %335, %309 : vector<16x16xf32>
    %350 = arith.minimumf %174, %300 : vector<16x16xf32>
    %351 = arith.maximumf %174, %300 : vector<16x16xf32>
    %352 = arith.minimumf %217, %343 : vector<16x16xf32>
    %353 = arith.maximumf %217, %343 : vector<16x16xf32>
    %354 = arith.minimumf %352, %351 : vector<16x16xf32>
    %355 = arith.maximumf %352, %351 : vector<16x16xf32>
    %356 = arith.minimumf %213, %339 : vector<16x16xf32>
    %357 = arith.maximumf %213, %339 : vector<16x16xf32>
    %358 = arith.minimumf %221, %347 : vector<16x16xf32>
    %359 = arith.maximumf %221, %347 : vector<16x16xf32>
    %360 = arith.minimumf %358, %357 : vector<16x16xf32>
    %361 = arith.maximumf %358, %357 : vector<16x16xf32>
    %362 = arith.minimumf %356, %354 : vector<16x16xf32>
    %363 = arith.maximumf %356, %354 : vector<16x16xf32>
    %364 = arith.minimumf %360, %355 : vector<16x16xf32>
    %365 = arith.maximumf %360, %355 : vector<16x16xf32>
    %366 = arith.minimumf %361, %353 : vector<16x16xf32>
    %367 = arith.maximumf %361, %353 : vector<16x16xf32>
    %368 = arith.minimumf %211, %337 : vector<16x16xf32>
    %369 = arith.maximumf %211, %337 : vector<16x16xf32>
    %370 = arith.minimumf %219, %345 : vector<16x16xf32>
    %371 = arith.maximumf %219, %345 : vector<16x16xf32>
    %372 = arith.minimumf %370, %369 : vector<16x16xf32>
    %373 = arith.maximumf %370, %369 : vector<16x16xf32>
    %374 = arith.minimumf %215, %341 : vector<16x16xf32>
    %375 = arith.maximumf %215, %341 : vector<16x16xf32>
    %376 = arith.minimumf %223, %349 : vector<16x16xf32>
    %377 = arith.minimumf %376, %375 : vector<16x16xf32>
    %378 = arith.maximumf %376, %375 : vector<16x16xf32>
    %379 = arith.minimumf %374, %372 : vector<16x16xf32>
    %380 = arith.maximumf %374, %372 : vector<16x16xf32>
    %381 = arith.minimumf %377, %373 : vector<16x16xf32>
    %382 = arith.maximumf %377, %373 : vector<16x16xf32>
    %383 = arith.minimumf %378, %371 : vector<16x16xf32>
    %384 = arith.maximumf %378, %371 : vector<16x16xf32>
    %385 = arith.minimumf %368, %362 : vector<16x16xf32>
    %386 = arith.maximumf %368, %362 : vector<16x16xf32>
    %387 = arith.minimumf %379, %363 : vector<16x16xf32>
    %388 = arith.maximumf %379, %363 : vector<16x16xf32>
    %389 = arith.minimumf %380, %364 : vector<16x16xf32>
    %390 = arith.maximumf %380, %364 : vector<16x16xf32>
    %391 = arith.minimumf %381, %365 : vector<16x16xf32>
    %392 = arith.maximumf %381, %365 : vector<16x16xf32>
    %393 = arith.minimumf %382, %366 : vector<16x16xf32>
    %394 = arith.maximumf %382, %366 : vector<16x16xf32>
    %395 = arith.minimumf %383, %367 : vector<16x16xf32>
    %396 = arith.maximumf %383, %367 : vector<16x16xf32>
    %397 = arith.minimumf %384, %359 : vector<16x16xf32>
    %398 = arith.maximumf %384, %359 : vector<16x16xf32>
    %399 = arith.minimumf %210, %336 : vector<16x16xf32>
    %400 = arith.maximumf %210, %336 : vector<16x16xf32>
    %401 = arith.minimumf %218, %344 : vector<16x16xf32>
    %402 = arith.maximumf %218, %344 : vector<16x16xf32>
    %403 = arith.minimumf %401, %400 : vector<16x16xf32>
    %404 = arith.maximumf %401, %400 : vector<16x16xf32>
    %405 = arith.minimumf %214, %340 : vector<16x16xf32>
    %406 = arith.maximumf %214, %340 : vector<16x16xf32>
    %407 = arith.minimumf %222, %348 : vector<16x16xf32>
    %408 = arith.maximumf %222, %348 : vector<16x16xf32>
    %409 = arith.minimumf %407, %406 : vector<16x16xf32>
    %410 = arith.maximumf %407, %406 : vector<16x16xf32>
    %411 = arith.minimumf %405, %403 : vector<16x16xf32>
    %412 = arith.maximumf %405, %403 : vector<16x16xf32>
    %413 = arith.minimumf %409, %404 : vector<16x16xf32>
    %414 = arith.maximumf %409, %404 : vector<16x16xf32>
    %415 = arith.minimumf %410, %402 : vector<16x16xf32>
    %416 = arith.maximumf %410, %402 : vector<16x16xf32>
    %417 = arith.minimumf %212, %338 : vector<16x16xf32>
    %418 = arith.maximumf %212, %338 : vector<16x16xf32>
    %419 = arith.minimumf %220, %346 : vector<16x16xf32>
    %420 = arith.maximumf %220, %346 : vector<16x16xf32>
    %421 = arith.minimumf %419, %418 : vector<16x16xf32>
    %422 = arith.maximumf %419, %418 : vector<16x16xf32>
    %423 = arith.minimumf %216, %342 : vector<16x16xf32>
    %424 = arith.maximumf %216, %342 : vector<16x16xf32>
    %425 = arith.minimumf %201, %327 : vector<16x16xf32>
    %426 = arith.minimumf %425, %424 : vector<16x16xf32>
    %427 = arith.maximumf %425, %424 : vector<16x16xf32>
    %428 = arith.minimumf %423, %421 : vector<16x16xf32>
    %429 = arith.maximumf %423, %421 : vector<16x16xf32>
    %430 = arith.minimumf %426, %422 : vector<16x16xf32>
    %431 = arith.maximumf %426, %422 : vector<16x16xf32>
    %432 = arith.minimumf %427, %420 : vector<16x16xf32>
    %433 = arith.maximumf %427, %420 : vector<16x16xf32>
    %434 = arith.minimumf %417, %411 : vector<16x16xf32>
    %435 = arith.maximumf %417, %411 : vector<16x16xf32>
    %436 = arith.minimumf %428, %412 : vector<16x16xf32>
    %437 = arith.maximumf %428, %412 : vector<16x16xf32>
    %438 = arith.minimumf %429, %413 : vector<16x16xf32>
    %439 = arith.maximumf %429, %413 : vector<16x16xf32>
    %440 = arith.minimumf %430, %414 : vector<16x16xf32>
    %441 = arith.maximumf %430, %414 : vector<16x16xf32>
    %442 = arith.minimumf %431, %415 : vector<16x16xf32>
    %443 = arith.maximumf %431, %415 : vector<16x16xf32>
    %444 = arith.minimumf %432, %416 : vector<16x16xf32>
    %445 = arith.maximumf %432, %416 : vector<16x16xf32>
    %446 = arith.minimumf %433, %408 : vector<16x16xf32>
    %447 = arith.minimumf %399, %385 : vector<16x16xf32>
    %448 = arith.maximumf %399, %385 : vector<16x16xf32>
    %449 = arith.minimumf %434, %386 : vector<16x16xf32>
    %450 = arith.maximumf %434, %386 : vector<16x16xf32>
    %451 = arith.minimumf %435, %387 : vector<16x16xf32>
    %452 = arith.maximumf %435, %387 : vector<16x16xf32>
    %453 = arith.minimumf %436, %388 : vector<16x16xf32>
    %454 = arith.maximumf %436, %388 : vector<16x16xf32>
    %455 = arith.minimumf %437, %389 : vector<16x16xf32>
    %456 = arith.maximumf %437, %389 : vector<16x16xf32>
    %457 = arith.minimumf %438, %390 : vector<16x16xf32>
    %458 = arith.maximumf %438, %390 : vector<16x16xf32>
    %459 = arith.minimumf %439, %391 : vector<16x16xf32>
    %460 = arith.maximumf %439, %391 : vector<16x16xf32>
    %461 = arith.minimumf %440, %392 : vector<16x16xf32>
    %462 = arith.maximumf %440, %392 : vector<16x16xf32>
    %463 = arith.minimumf %441, %393 : vector<16x16xf32>
    %464 = arith.maximumf %441, %393 : vector<16x16xf32>
    %465 = arith.minimumf %442, %394 : vector<16x16xf32>
    %466 = arith.maximumf %442, %394 : vector<16x16xf32>
    %467 = arith.minimumf %443, %395 : vector<16x16xf32>
    %468 = arith.maximumf %443, %395 : vector<16x16xf32>
    %469 = arith.minimumf %444, %396 : vector<16x16xf32>
    %470 = arith.maximumf %444, %396 : vector<16x16xf32>
    %471 = arith.minimumf %445, %397 : vector<16x16xf32>
    %472 = arith.maximumf %445, %397 : vector<16x16xf32>
    %473 = arith.minimumf %446, %398 : vector<16x16xf32>
    %474 = arith.minimumf %65, %67 : vector<16x16xf32>
    %475 = arith.maximumf %65, %67 : vector<16x16xf32>
    %476 = arith.minimumf %69, %71 : vector<16x16xf32>
    %477 = arith.maximumf %69, %71 : vector<16x16xf32>
    %478 = arith.minimumf %474, %476 : vector<16x16xf32>
    %479 = arith.maximumf %474, %476 : vector<16x16xf32>
    %480 = arith.minimumf %475, %477 : vector<16x16xf32>
    %481 = arith.maximumf %475, %477 : vector<16x16xf32>
    %482 = arith.minimumf %480, %479 : vector<16x16xf32>
    %483 = arith.maximumf %480, %479 : vector<16x16xf32>
    %484 = arith.minimumf %73, %75 : vector<16x16xf32>
    %485 = arith.maximumf %73, %75 : vector<16x16xf32>
    %486 = arith.minimumf %77, %79 : vector<16x16xf32>
    %487 = arith.maximumf %77, %79 : vector<16x16xf32>
    %488 = arith.minimumf %484, %486 : vector<16x16xf32>
    %489 = arith.maximumf %484, %486 : vector<16x16xf32>
    %490 = arith.minimumf %485, %487 : vector<16x16xf32>
    %491 = arith.maximumf %485, %487 : vector<16x16xf32>
    %492 = arith.minimumf %490, %489 : vector<16x16xf32>
    %493 = arith.maximumf %490, %489 : vector<16x16xf32>
    %494 = arith.minimumf %478, %488 : vector<16x16xf32>
    %495 = arith.maximumf %478, %488 : vector<16x16xf32>
    %496 = arith.minimumf %483, %493 : vector<16x16xf32>
    %497 = arith.maximumf %483, %493 : vector<16x16xf32>
    %498 = arith.minimumf %496, %495 : vector<16x16xf32>
    %499 = arith.maximumf %496, %495 : vector<16x16xf32>
    %500 = arith.minimumf %482, %492 : vector<16x16xf32>
    %501 = arith.maximumf %482, %492 : vector<16x16xf32>
    %502 = arith.minimumf %481, %491 : vector<16x16xf32>
    %503 = arith.maximumf %481, %491 : vector<16x16xf32>
    %504 = arith.minimumf %502, %501 : vector<16x16xf32>
    %505 = arith.maximumf %502, %501 : vector<16x16xf32>
    %506 = arith.minimumf %500, %498 : vector<16x16xf32>
    %507 = arith.maximumf %500, %498 : vector<16x16xf32>
    %508 = arith.minimumf %504, %499 : vector<16x16xf32>
    %509 = arith.maximumf %504, %499 : vector<16x16xf32>
    %510 = arith.minimumf %505, %497 : vector<16x16xf32>
    %511 = arith.maximumf %505, %497 : vector<16x16xf32>
    %512 = arith.minimumf %81, %83 : vector<16x16xf32>
    %513 = arith.maximumf %81, %83 : vector<16x16xf32>
    %514 = arith.minimumf %85, %87 : vector<16x16xf32>
    %515 = arith.maximumf %85, %87 : vector<16x16xf32>
    %516 = arith.minimumf %512, %514 : vector<16x16xf32>
    %517 = arith.maximumf %512, %514 : vector<16x16xf32>
    %518 = arith.minimumf %513, %515 : vector<16x16xf32>
    %519 = arith.maximumf %513, %515 : vector<16x16xf32>
    %520 = arith.minimumf %518, %517 : vector<16x16xf32>
    %521 = arith.maximumf %518, %517 : vector<16x16xf32>
    %522 = arith.minimumf %89, %91 : vector<16x16xf32>
    %523 = arith.maximumf %89, %91 : vector<16x16xf32>
    %524 = arith.minimumf %93, %95 : vector<16x16xf32>
    %525 = arith.maximumf %93, %95 : vector<16x16xf32>
    %526 = arith.minimumf %522, %524 : vector<16x16xf32>
    %527 = arith.maximumf %522, %524 : vector<16x16xf32>
    %528 = arith.minimumf %523, %525 : vector<16x16xf32>
    %529 = arith.maximumf %523, %525 : vector<16x16xf32>
    %530 = arith.minimumf %528, %527 : vector<16x16xf32>
    %531 = arith.maximumf %528, %527 : vector<16x16xf32>
    %532 = arith.minimumf %516, %526 : vector<16x16xf32>
    %533 = arith.maximumf %516, %526 : vector<16x16xf32>
    %534 = arith.minimumf %521, %531 : vector<16x16xf32>
    %535 = arith.maximumf %521, %531 : vector<16x16xf32>
    %536 = arith.minimumf %534, %533 : vector<16x16xf32>
    %537 = arith.maximumf %534, %533 : vector<16x16xf32>
    %538 = arith.minimumf %520, %530 : vector<16x16xf32>
    %539 = arith.maximumf %520, %530 : vector<16x16xf32>
    %540 = arith.minimumf %519, %529 : vector<16x16xf32>
    %541 = arith.maximumf %519, %529 : vector<16x16xf32>
    %542 = arith.minimumf %540, %539 : vector<16x16xf32>
    %543 = arith.maximumf %540, %539 : vector<16x16xf32>
    %544 = arith.minimumf %538, %536 : vector<16x16xf32>
    %545 = arith.maximumf %538, %536 : vector<16x16xf32>
    %546 = arith.minimumf %542, %537 : vector<16x16xf32>
    %547 = arith.maximumf %542, %537 : vector<16x16xf32>
    %548 = arith.minimumf %543, %535 : vector<16x16xf32>
    %549 = arith.maximumf %543, %535 : vector<16x16xf32>
    %550 = arith.minimumf %494, %532 : vector<16x16xf32>
    %551 = arith.maximumf %494, %532 : vector<16x16xf32>
    %552 = arith.minimumf %509, %547 : vector<16x16xf32>
    %553 = arith.maximumf %509, %547 : vector<16x16xf32>
    %554 = arith.minimumf %552, %551 : vector<16x16xf32>
    %555 = arith.maximumf %552, %551 : vector<16x16xf32>
    %556 = arith.minimumf %507, %545 : vector<16x16xf32>
    %557 = arith.maximumf %507, %545 : vector<16x16xf32>
    %558 = arith.minimumf %511, %549 : vector<16x16xf32>
    %559 = arith.maximumf %511, %549 : vector<16x16xf32>
    %560 = arith.minimumf %558, %557 : vector<16x16xf32>
    %561 = arith.maximumf %558, %557 : vector<16x16xf32>
    %562 = arith.minimumf %556, %554 : vector<16x16xf32>
    %563 = arith.maximumf %556, %554 : vector<16x16xf32>
    %564 = arith.minimumf %560, %555 : vector<16x16xf32>
    %565 = arith.maximumf %560, %555 : vector<16x16xf32>
    %566 = arith.minimumf %561, %553 : vector<16x16xf32>
    %567 = arith.maximumf %561, %553 : vector<16x16xf32>
    %568 = arith.minimumf %506, %544 : vector<16x16xf32>
    %569 = arith.maximumf %506, %544 : vector<16x16xf32>
    %570 = arith.minimumf %510, %548 : vector<16x16xf32>
    %571 = arith.maximumf %510, %548 : vector<16x16xf32>
    %572 = arith.minimumf %570, %569 : vector<16x16xf32>
    %573 = arith.maximumf %570, %569 : vector<16x16xf32>
    %574 = arith.minimumf %508, %546 : vector<16x16xf32>
    %575 = arith.maximumf %508, %546 : vector<16x16xf32>
    %576 = arith.minimumf %503, %541 : vector<16x16xf32>
    %577 = arith.maximumf %503, %541 : vector<16x16xf32>
    %578 = arith.minimumf %576, %575 : vector<16x16xf32>
    %579 = arith.maximumf %576, %575 : vector<16x16xf32>
    %580 = arith.minimumf %574, %572 : vector<16x16xf32>
    %581 = arith.maximumf %574, %572 : vector<16x16xf32>
    %582 = arith.minimumf %578, %573 : vector<16x16xf32>
    %583 = arith.maximumf %578, %573 : vector<16x16xf32>
    %584 = arith.minimumf %579, %571 : vector<16x16xf32>
    %585 = arith.maximumf %579, %571 : vector<16x16xf32>
    %586 = arith.minimumf %568, %562 : vector<16x16xf32>
    %587 = arith.maximumf %568, %562 : vector<16x16xf32>
    %588 = arith.minimumf %580, %563 : vector<16x16xf32>
    %589 = arith.maximumf %580, %563 : vector<16x16xf32>
    %590 = arith.minimumf %581, %564 : vector<16x16xf32>
    %591 = arith.maximumf %581, %564 : vector<16x16xf32>
    %592 = arith.minimumf %582, %565 : vector<16x16xf32>
    %593 = arith.maximumf %582, %565 : vector<16x16xf32>
    %594 = arith.minimumf %583, %566 : vector<16x16xf32>
    %595 = arith.maximumf %583, %566 : vector<16x16xf32>
    %596 = arith.minimumf %584, %567 : vector<16x16xf32>
    %597 = arith.maximumf %584, %567 : vector<16x16xf32>
    %598 = arith.minimumf %585, %559 : vector<16x16xf32>
    %599 = arith.maximumf %585, %559 : vector<16x16xf32>
    %600 = arith.minimumf %550, %97 : vector<16x16xf32>
    %601 = arith.maximumf %550, %97 : vector<16x16xf32>
    %602 = arith.minimumf %593, %601 : vector<16x16xf32>
    %603 = arith.maximumf %593, %601 : vector<16x16xf32>
    %604 = arith.minimumf %589, %602 : vector<16x16xf32>
    %605 = arith.maximumf %589, %602 : vector<16x16xf32>
    %606 = arith.minimumf %597, %603 : vector<16x16xf32>
    %607 = arith.maximumf %597, %603 : vector<16x16xf32>
    %608 = arith.minimumf %591, %595 : vector<16x16xf32>
    %609 = arith.maximumf %591, %595 : vector<16x16xf32>
    %610 = arith.minimumf %587, %604 : vector<16x16xf32>
    %611 = arith.maximumf %587, %604 : vector<16x16xf32>
    %612 = arith.minimumf %608, %605 : vector<16x16xf32>
    %613 = arith.maximumf %608, %605 : vector<16x16xf32>
    %614 = arith.minimumf %609, %606 : vector<16x16xf32>
    %615 = arith.maximumf %609, %606 : vector<16x16xf32>
    %616 = arith.minimumf %599, %607 : vector<16x16xf32>
    %617 = arith.maximumf %599, %607 : vector<16x16xf32>
    %618 = arith.minimumf %590, %594 : vector<16x16xf32>
    %619 = arith.maximumf %590, %594 : vector<16x16xf32>
    %620 = arith.minimumf %592, %596 : vector<16x16xf32>
    %621 = arith.maximumf %592, %596 : vector<16x16xf32>
    %622 = arith.minimumf %588, %618 : vector<16x16xf32>
    %623 = arith.maximumf %588, %618 : vector<16x16xf32>
    %624 = arith.minimumf %620, %619 : vector<16x16xf32>
    %625 = arith.maximumf %620, %619 : vector<16x16xf32>
    %626 = arith.minimumf %621, %598 : vector<16x16xf32>
    %627 = arith.maximumf %621, %598 : vector<16x16xf32>
    %628 = arith.minimumf %586, %610 : vector<16x16xf32>
    %629 = arith.maximumf %586, %610 : vector<16x16xf32>
    %630 = arith.minimumf %622, %611 : vector<16x16xf32>
    %631 = arith.maximumf %622, %611 : vector<16x16xf32>
    %632 = arith.minimumf %623, %612 : vector<16x16xf32>
    %633 = arith.maximumf %623, %612 : vector<16x16xf32>
    %634 = arith.minimumf %624, %613 : vector<16x16xf32>
    %635 = arith.maximumf %624, %613 : vector<16x16xf32>
    %636 = arith.minimumf %625, %614 : vector<16x16xf32>
    %637 = arith.maximumf %625, %614 : vector<16x16xf32>
    %638 = arith.minimumf %626, %615 : vector<16x16xf32>
    %639 = arith.maximumf %626, %615 : vector<16x16xf32>
    %640 = arith.minimumf %627, %616 : vector<16x16xf32>
    %641 = arith.maximumf %627, %616 : vector<16x16xf32>
    %642 = arith.minimumf %577, %617 : vector<16x16xf32>
    %643 = arith.maximumf %577, %617 : vector<16x16xf32>
    %644 = arith.maximumf %350, %600 : vector<16x16xf32>
    %645 = arith.minimumf %462, %643 : vector<16x16xf32>
    %646 = arith.maximumf %645, %644 : vector<16x16xf32>
    %647 = arith.maximumf %454, %635 : vector<16x16xf32>
    %648 = arith.minimumf %470, %647 : vector<16x16xf32>
    %649 = arith.minimumf %648, %646 : vector<16x16xf32>
    %650 = arith.maximumf %450, %631 : vector<16x16xf32>
    %651 = arith.minimumf %466, %650 : vector<16x16xf32>
    %652 = arith.minimumf %458, %639 : vector<16x16xf32>
    %653 = arith.maximumf %652, %651 : vector<16x16xf32>
    %654 = arith.maximumf %653, %649 : vector<16x16xf32>
    %655 = arith.maximumf %448, %629 : vector<16x16xf32>
    %656 = arith.maximumf %464, %655 : vector<16x16xf32>
    %657 = arith.maximumf %456, %637 : vector<16x16xf32>
    %658 = arith.minimumf %472, %657 : vector<16x16xf32>
    %659 = arith.minimumf %658, %656 : vector<16x16xf32>
    %660 = arith.maximumf %452, %633 : vector<16x16xf32>
    %661 = arith.minimumf %468, %660 : vector<16x16xf32>
    %662 = arith.minimumf %460, %641 : vector<16x16xf32>
    %663 = arith.maximumf %662, %661 : vector<16x16xf32>
    %664 = arith.minimumf %663, %659 : vector<16x16xf32>
    %665 = arith.maximumf %664, %654 : vector<16x16xf32>
    %666 = arith.maximumf %447, %628 : vector<16x16xf32>
    %667 = arith.maximumf %463, %666 : vector<16x16xf32>
    %668 = arith.maximumf %455, %636 : vector<16x16xf32>
    %669 = arith.minimumf %471, %668 : vector<16x16xf32>
    %670 = arith.minimumf %669, %667 : vector<16x16xf32>
    %671 = arith.maximumf %451, %632 : vector<16x16xf32>
    %672 = arith.minimumf %467, %671 : vector<16x16xf32>
    %673 = arith.minimumf %459, %640 : vector<16x16xf32>
    %674 = arith.maximumf %673, %672 : vector<16x16xf32>
    %675 = arith.maximumf %674, %670 : vector<16x16xf32>
    %676 = arith.maximumf %449, %630 : vector<16x16xf32>
    %677 = arith.maximumf %465, %676 : vector<16x16xf32>
    %678 = arith.maximumf %457, %638 : vector<16x16xf32>
    %679 = arith.minimumf %473, %678 : vector<16x16xf32>
    %680 = arith.minimumf %679, %677 : vector<16x16xf32>
    %681 = arith.maximumf %453, %634 : vector<16x16xf32>
    %682 = arith.minimumf %469, %681 : vector<16x16xf32>
    %683 = arith.minimumf %461, %642 : vector<16x16xf32>
    %684 = arith.maximumf %683, %682 : vector<16x16xf32>
    %685 = arith.minimumf %684, %680 : vector<16x16xf32>
    %686 = arith.minimumf %685, %675 : vector<16x16xf32>
    %687 = arith.maximumf %686, %665 : vector<16x16xf32>
    %c0_140 = arith.constant 0 : index
    %c0_141 = arith.constant 0 : index
    %c0_142 = arith.constant 0 : index
    %688 = vector.load %arg3[%c0_140, %c0_141, %c0_142] : memref<1x16x16xf32, #tpu.memory_space<vmem>>, vector<1x16x16xf32>
    %689 = vector.shape_cast %688 : vector<1x16x16xf32> to vector<16x16xf32>
    %690 = vector.shape_cast %687 : vector<16x16xf32> to vector<1x16x16xf32>
    tpu.vector_store %arg3[%c0_140, %c0_141, %c0_142], %690 {strides = array<i32>} : memref<1x16x16xf32, #tpu.memory_space<vmem>>, vector<1x16x16xf32>,
    return
  }
  func.func @transform_0(%arg0: i32, %arg1: i32) -> (i32, i32, i32) {
    %c0_i32 = arith.constant 0 : i32
    %c0_i32_0 = arith.constant 0 : i32
    %c0_i32_1 = arith.constant 0 : i32
    return %arg0, %c0_i32, %c0_i32_0 : i32, i32, i32
  }
  func.func @transform_1(%arg0: i32, %arg1: i32) -> (i32, i32, i32) {
    %c0_i32 = arith.constant 0 : i32
    %c0_i32_0 = arith.constant 0 : i32
    return %arg0, %arg1, %c0_i32 : i32, i32, i32
  }
}

</mosaic_0001>

<bundles_post_ra>
// kernel: tpu_custom_call.1
= control target key start
LH: loop header
LB: loop body
LE: loop exit
PB: predicated region body
PF: predicated region fallthrough
CT: control target
= control target key end

     0   :  { %6 = vsyncpa [#allocation3], 0  ;;  %s5053_s0 = inlined_call_operand.hbm [shape: f32[3,22,22], index: 0, kind: input, shape index: {}]   ;;  %s5054_s1 = inlined_call_operand.hbm [shape: f32[3,16,16], index: 1, kind: output, shape index: {}]  }
   0x1   :  { %8 = vsyncpa [#allocation3 + $0x1], 0 }
   0x2   :  { %9 = vsyncpa [#allocation4], 0 }
   0x3   :  { %11 = vsyncpa [#allocation4 + $0x1], 0  ;;  %s2523_s6 = smov 0   ;;  %s2525_s7 = smov 0  }
   0x4   :  { %s2527_s8 = smov 0   ;;  %s2529_s9 = smov 0  }
   0x5   :  { %s2531_s10 = smov 0   ;;  %s2533_s11 = smov 0  }
   0x6 LB: > { %s2299_s12 = sadd.s32 4294967295, %s2499_s11   ;;  %s2300_s13 = sadd.s32 4294967294, %s2499_s11   ;;  %s2499_s11 = sphi %s2533_s11, %s17_s11   ;;  %s2495_s10 = sphi %s2531_s10, %s5676_s10   ;;  %s2491_s9 = sphi %s2529_s9, %s5675_s9   ;;  %s2487_s8 = sphi %s2527_s8, %s5674_s8   ;;  %s2483_s7 = sphi %s2525_s7, %s5673_s7   ;;  %s2479_s6 = sphi %s2523_s6, %s5672_s6  }
   0x7   : > { %s29_s14 = sadd.s32 1, %s2495_s10  ;;  %s36_s15 = sadd.s32 1, %s2487_s8 }
   0x8   : > { %p31_p0 = scmp.ge.s32.totalorder %s29_s14, 3  ;;  %p43_p1 = scmp.ne.s32.totalorder %s2487_s8, %s2483_s7 }
   0x9   : > { %p44_p2 = scmp.eq.s32.totalorder %s2499_s11, 0  ;;  %p49_p3 = scmp.ne.s32.totalorder %s2483_s7, %s2479_s6 }
   0xa   : > { %s5678_s14 = smov (%p31_p0, %s29_s14), 0  ;;  %p50_p5 = scmp.eq.s32.totalorder %s2299_s12, 0 }
   0xb   : > { %p2564_p4 = por %p44_p2, %p43_p1  ;;  %s33_s17 = ssub.s32 %s2495_s10, %s5678_s14 }
   0xc   : > { %p75_p6 = scmp.eq.s32.totalorder %s2299_s12, 2  ;;  %p34_p7 = scmp.eq.s32.totalorder %s33_s17, 0 }
   0xd   : > { %p2570_p8 = por %p50_p5, %p49_p3  ;;  %p81_p10 = scmp.eq.s32.totalorder %s2300_s13, 2 }
   0xe   : > { %p2574_p9 = por %p75_p6, %p43_p1  ;;  %p2327_p12 = scmp.lt.s32.totalorder %s2499_s11, 3 }
   0xf   : > { %s2579_s20 = scalar_select %p34_p7, %s2487_s8, %s36_s15  }
  0x10   : > { %s5258_s19 = scalar_select %p2574_p9, 1, 0 }
  0x11   : > { %p2581_p11 = por %p81_p10, %p49_p3  ;;  %s101_s22 = sand.u32 1, %s2487_s8  }
  0x12   : > { %s2312_s23 = smul.u32 24, %s101_s22  ;;  %p2590_p13 = pnand %p2327_p12, %p2564_p4 }
  0x13   : > { %s5259_s21 = scalar_select %p2581_p11, 1, 0 }
  0x14   : > { %s2313_s24 = smul.u32 384, %s2495_s10  ;;  %s105_s29 = scalar_lea.vmem [#allocation2], %s2312_s23 }
  0x15   : > { %s112_s30 = sshll.u32 %s105_s29, 4  ;;  %s2602_s2 = scalar_lea.sflag [#allocation3], %s101_s22  ;;  %s2599_s30 = int_to_ptr.vmem [resolvable:$true] %s112_s30 }
  0x16   : > { %s2597_s28 = scalar_lea.hbm %s5053_s0, %s2313_s24  ;;  %p2389_p2 = pneg %p2590_p13 }
  0x17   : > { %s2387_s3 = scalar_lea.hbm %s2597_s28, 384  ;;  %s2392_s12 = scalar_lea.hbm %s5053_s0, 1152 }
  0x18   : > { %p2388_p1 = scmp.ne.s32.totalorder %s2597_s28, %s2387_s3  ;;  %p2393_p5 = scmp.lt.u32.totalorder %s2597_s28, %s5053_s0 }
  0x19   : > { %p2394_p6 = scmp.lt.u32.totalorder %s2392_s12, %s2387_s3  ;;  %p2396_p10 = scmp.lt.u32.totalorder %s2387_s3, %s2597_s28 }
  0x1a   : > { %p2390_p3 = pnand %p2389_p2, %p2388_p1 }
  0x1b   : > { %p2395_p7 = por %p2394_p6, %p2393_p5 }
  0x1c   : > { %p2391_p4 = pneg %p2390_p3 }
  0x1d   : > { %p2397_p12 = por %p2396_p10, %p2395_p7 }
  0x1f   : > { %p2398_p0 = pnand %p2397_p12, %p2391_p4 }
  0x21   : > { %2401 = shalt.err (!%p2398_p0)
}
  0x22   : > { %s2402_s16 = scalar_lea.vmem %s2599_s30, 384  ;;  %s2501_s17 = smov [#allocation2]  }
  0x23   : > { %p2403_p1 = scmp.ne.s32.totalorder %s2599_s30, %s2402_s16  ;;  %s2407_s22 = sshll.u32 %s2501_s17, 4  ;;  %s2408_s22 = int_to_ptr.vmem [resolvable:$false] %s2407_s22 }
  0x24   : > { %s2409_s23 = scalar_lea.vmem %s2408_s22, 768  ;;  %p2410_p9 = scmp.lt.s32.totalorder %s2599_s30, %s2408_s22 }
  0x25   : > { %p2405_p3 = pnand %p2403_p1, %p2389_p2  ;;  %p2411_p5 = scmp.lt.s32.totalorder %s2409_s23, %s2402_s16 }
  0x27   : > { %p2406_p11 = pneg %p2405_p3  ;;  %p2412_p6 = por %p2411_p5, %p2410_p9 }
  0x29   : > { %p2413_p7 = pnand %p2412_p6, %p2406_p11 }
  0x2b   : > { %2416 = shalt.err (!%p2413_p7)
}
  0x2c   : > { %s2502_s24 = smov 128   ;;  %s2503_s26 = smov 8  }
  0x2d   : > { %2322 = dma.hbm_to_vmem [thread:$0]  (!%p2590_p13), %s2597_s28, 384, %s2599_s30, %s2602_s2, %s2502_s24, %s2502_s24, %s2503_s26  }
  0x2e   : > { %p120_p0 = scmp.lt.s32.totalorder %s2499_s11, 4  ;;  %p5261_p2 = scmp.ge.s32.totalorder %s2499_s11, 1 }
  0x30   : > { %p121_p4 = pnand %p5261_p2, %p120_p0 }
  0x32   : > { %124 = sbr.rel (%p121_p4) target bundleno = 948 (0x3b4), region = 24 }
  0x39   : > { %s2634_s27 = sand.u32 1, %s2483_s7  }
  0x3a   : > { %s2314_s29 = smul.u32 24, %s2634_s27  ;;  %s127_s3 = scalar_lea.sflag [#allocation3], %s2634_s27 }
  0x3c   : > { %s2638_s4 = scalar_lea.vmem [#allocation2], %s2314_s29 }
  0x3d   : > { %2470 = dma.done.wait (%p2570_p8), %s127_s3, 384  }
  0x3e   : > { %2472 = vsyncadd (%p2570_p8), %s127_s3, 4294966912  ;;  %v150_v0 = vld [vmem:[%s2638_s4] sm:$0xff]  ;;  %s2504_s25 = smov 127   ;;  %v2647_v1 = vld [vmem:[%s2638_s4 + $0x9] sm:$0xff]  ;;  %s2505_s28 = smov 6   ;;  %vm2196_vm0 = vcmask 130048  }
  0x3f   : > { %166 = vrot.lane.b32.xlu0 %v150_v0, %s2504_s25  ;;  %v151_v2 = vld [vmem:[%s2638_s4 + $0x8] sm:$0xff]  ;;  %208 = vrot.lane.b32.xlu1 %v2647_v1, %s2505_s28  ;;  %s2506_s18 = smov 126   ;;  %s2507_s30 = smov 5  }
  0x40   : > { %v152_v3 = vld [vmem:[%s2638_s4 + $0x1] sm:$0xff]  ;;  %v2657_v4 = vld [vmem:[%s2638_s4 + $0xa] sm:$0xff]  ;;  %s2508_s2 = smov 124   ;;  %s2509_s5 = smov 3  }
  0x41   : > { %v2663_v5 = vld [vmem:[%s2638_s4 + $0xb] sm:$0xff]  ;;  %v2667_v6 = vld [vmem:[%s2638_s4 + $0x2] sm:$0xff]  ;;  %s2305_s12 = sshll.u32 %s2634_s27, 4  ;;  %s2311_s13 = sshll.u32 %s2491_s9, 8 }
  0x42   : > { %v2674_v7 = vld [vmem:[%s2638_s4 + $0x3] sm:$0xff]  ;;  %v2679_v8 = vld [vmem:[%s2638_s4 + $0xc] sm:$0xff]  ;;  %s148_s15 = scalar_lea.vmem [#allocation5], %s2305_s12  ;;  %s5003_s23 = scalar_lea.hbm %s5054_s1, %s2311_s13 }
  0x43   : > { %168 = vrot.lane.b32.xlu0 %v151_v2, %s2504_s25  ;;  %314 = vrot.lane.b32.xlu1 %v2647_v1, %s2504_s25  ;;  %v2686_v9 = vld [vmem:[%s2638_s4 + $0xe] sm:$0xff]  ;;  %v2691_v10 = vld [vmem:[%s2638_s4 + $0x4] sm:$0xff]  ;;  %s2215_s16 = sshll.u32 %s148_s15, 4  ;;  %s2200_s9 = scalar_lea.sflag [#allocation4], %s2634_s27  ;;  %s5005_s16 = int_to_ptr.vmem [resolvable:$true] %s2215_s16 }
  0x44   : > { %v2696_v11 = vld [vmem:[%s2638_s4 + $0xd] sm:$0xff]  ;;  %v2708_v13 = vld [vmem:[%s2638_s4 + $0x5] sm:$0xff]  ;;  %s2417_s24 = scalar_lea.vmem %s5005_s16, 256  ;;  %p5670_p9 = scmp.ne.s32.totalorder %s5258_s19, 0 }
  0x45   : > { %v2701_v12 = vld [vmem:[%s2638_s4 + $0x6] sm:$0xff]  ;;  %p2418_p8 = scmp.ne.s32.totalorder %s5005_s16, %s2417_s24  ;;  %s2510_s26 = smov [#allocation5]  }
  0x46   : > { %s2421_s29 = sshll.u32 %s2510_s26, 4  ;;  %s2422_s29 = int_to_ptr.vmem [resolvable:$false] %s2421_s29 }
  0x47   : > { %206 = vrot.lane.b32.xlu0 %v152_v3, %s2505_s28  ;;  %354 = vrot.lane.b32.xlu1 %v2657_v4, %s2504_s25  ;;  %p2419_p11 = pnand %p2418_p8, %p5670_p9  ;;  %s2423_s3 = scalar_lea.vmem %s2422_s29, 512 }
  0x48   : > { %p2424_p10 = scmp.lt.s32.totalorder %s5005_s16, %s2422_s29  ;;  %p2425_p12 = scmp.lt.s32.totalorder %s2423_s3, %s2417_s24 }
  0x49   : > { %p2420_p13 = pneg %p2419_p11 }
  0x4a   : > { %p2426_p1 = por %p2425_p12, %p2424_p10 }
  0x4b   : > { %312 = vrot.lane.b32.xlu0 %v152_v3, %s2504_s25  ;;  %650 = vrot.lane.b32.xlu1 %v2663_v5, %s2505_s28 }
  0x4c   : > { %p2427_p3 = pnand %p2426_p1, %p2420_p13 }
  0x4f   : > { %352 = vrot.lane.b32.xlu0 %v2667_v6, %s2504_s25  ;;  %660 = vrot.lane.b32.xlu1 %v2663_v5, %s2504_s25 }
  0x53   : > { %648 = vrot.lane.b32.xlu0 %v2674_v7, %s2505_s28  ;;  %792 = vrot.lane.b32.xlu1 %v2679_v8, %s2504_s25 }
  0x57   : > { %658 = vrot.lane.b32.xlu0 %v2674_v7, %s2504_s25  ;;  %1586 = vrot.lane.b32.xlu1 %v2686_v9, %s2504_s25 }
  0x5b   : > { %790 = vrot.lane.b32.xlu0 %v2691_v10, %s2504_s25  ;;  %1478 = vrot.lane.b32.xlu1 %v2696_v11, %s2504_s25 }
  0x5f   : > { %1584 = vrot.lane.b32.xlu0 %v2701_v12, %s2504_s25  ;;  %1438 = vrot.lane.b32.xlu1 %v2708_v13, %s2505_s28 }
  0x63   : > { %1476 = vrot.lane.b32.xlu0 %v2708_v13, %s2504_s25 }
  0x67   : > { %1440 = vrot.lane.b32.xlu0 %v2696_v11, %s2505_s28 }
  0xb1   : > { %v167_v14 = vpop.permute.xlu0 %166  ;;  %v209_v20 = vpop.permute.xlu1 %208 }
  0xb2   : > { %v2716_v15 = vmin.f32 %v150_v0, %v167_v14  ;;  %v2718_v16 = vmax.f32 %v150_v0, %v167_v14  ;;  %v213_v24 = vmin.f32 %v151_v2, %v209_v20  ;;  %v215_v28 = vmax.f32 %v151_v2, %v209_v20 }
  0xb4   : > { %5262 = vst [vmem:[#allocation8_spill] sm:$0xff] %v2716_v15  ;;  %5263 = vst [vmem:[#allocation9_spill] sm:$0xff] %v2718_v16  ;;  %190 = vrot.lane.b32.xlu0 %v2718_v16, %s2506_s18  ;;  %178 = vrot.lane.b32.xlu1 %v2716_v15, %s2506_s18 }
  0xb5   : > { %v169_v17 = vpop.permute.xlu0 %168  ;;  %v315_v27 = vpop.permute.xlu1 %314 }
  0xb6   : > { %v2724_v18 = vmin.f32 %v151_v2, %v169_v17  ;;  %v2728_v21 = vmax.f32 %v151_v2, %v169_v17  ;;  %v2743_v30 = vmin.f32 %v2647_v1, %v315_v27  ;;  %v2753_v34 = vmax.f32 %v2647_v1, %v315_v27 }
  0xb8   : > { %5264 = vst [vmem:[#allocation10_spill] sm:$0xff] %v2724_v18  ;;  %180 = vrot.lane.b32.xlu1 %v2724_v18, %s2506_s18  ;;  %5265 = vst [vmem:[#allocation11_spill] sm:$0xff] %v2728_v21 }
  0xb9   : > { %v207_v19 = vpop.permute.xlu0 %206  ;;  %v355_v33 = vpop.permute.xlu1 %354 }
  0xba   : > { %v212_v22 = vmin.f32 %v150_v0, %v207_v19  ;;  %v214_v23 = vmax.f32 %v150_v0, %v207_v19  ;;  %v2763_v36 = vmin.f32 %v2657_v4, %v355_v33  ;;  %v2772_v38 = vmax.f32 %v2657_v4, %v355_v33 }
  0xbc   : > { %192 = vrot.lane.b32.xlu1 %v2728_v21, %s2506_s18  ;;  %218 = vrot.lane.b32.xlu0 %v212_v22, %s2506_s18  ;;  %5268 = vst [vmem:[#allocation14_spill] sm:$0xff] %v2763_v36  ;;  %5269 = vst [vmem:[#allocation15_spill] sm:$0xff] %v2772_v38 }
  0xbd   : > { %v313_v25 = vpop.permute.xlu0 %312  ;;  %v2774_v39 = vpop.permute.xlu1 %650 }
  0xbe   : > { %v2735_v26 = vmin.f32 %v152_v3, %v313_v25  ;;  %v2737_v29 = vmax.f32 %v152_v3, %v313_v25 }
  0xc0   : > { %220 = vrot.lane.b32.xlu1 %v213_v24, %s2506_s18  ;;  %230 = vrot.lane.b32.xlu0 %v214_v23, %s2506_s18 }
  0xc1   : > { %v353_v31 = vpop.permute.xlu0 %352  ;;  %v661_v42 = vpop.permute.xlu1 %660 }
  0xc2   : > { %v2750_v32 = vmin.f32 %v2667_v6, %v353_v31  ;;  %v2756_v35 = vmax.f32 %v2667_v6, %v353_v31  ;;  %v2795_v44 = vmin.f32 %v2663_v5, %v661_v42  ;;  %v2802_v45 = vmax.f32 %v2663_v5, %v661_v42 }
  0xc4   : > { %232 = vrot.lane.b32.xlu1 %v215_v28, %s2506_s18  ;;  %324 = vrot.lane.b32.xlu0 %v2735_v26, %s2506_s18  ;;  %5266 = vst [vmem:[#allocation12_spill] sm:$0xff] %v2750_v32  ;;  %5267 = vst [vmem:[#allocation13_spill] sm:$0xff] %v2756_v35 }
  0xc5   : > { %v2765_v37 = vpop.permute.xlu0 %648  ;;  %5271 = vst [vmem:[#allocation17_spill] sm:$0xff] %v2802_v45  ;;  %v793_v48 = vpop.permute.xlu1 %792 }
  0xc6   : > { %v2823_v50 = vmin.f32 %v2679_v8, %v793_v48  ;;  %v2833_v54 = vmax.f32 %v2679_v8, %v793_v48 }
  0xc8   : > { %326 = vrot.lane.b32.xlu1 %v2743_v30, %s2506_s18  ;;  %336 = vrot.lane.b32.xlu0 %v2737_v29, %s2506_s18  ;;  %5274 = vst [vmem:[#allocation20_spill] sm:$0xff] %v2823_v50  ;;  %5275 = vst [vmem:[#allocation21_spill] sm:$0xff] %v2833_v54 }
  0xc9   : > { %v659_v40 = vpop.permute.xlu0 %658  ;;  %v1587_v52 = vpop.permute.xlu1 %1586 }
  0xca   : > { %v2785_v41 = vmin.f32 %v2674_v7, %v659_v40  ;;  %v2788_v43 = vmax.f32 %v2674_v7, %v659_v40  ;;  %v2843_v56 = vmin.f32 %v2686_v9, %v1587_v52  ;;  %v2853_v60 = vmax.f32 %v2686_v9, %v1587_v52 }
  0xcc   : > { %338 = vrot.lane.b32.xlu1 %v2753_v34, %s2506_s18  ;;  %364 = vrot.lane.b32.xlu0 %v2750_v32, %s2507_s30  ;;  %5270 = vst [vmem:[#allocation16_spill] sm:$0xff] %v2788_v43 }
  0xcd   : > { %v791_v46 = vpop.permute.xlu0 %790  ;;  %v1479_v57 = vpop.permute.xlu1 %1478 }
  0xce   : > { %v2813_v47 = vmin.f32 %v2691_v10, %v791_v46  ;;  %v2816_v49 = vmax.f32 %v2691_v10, %v791_v46  ;;  %v2850_v58 = vmin.f32 %v2696_v11, %v1479_v57  ;;  %v2856_v61 = vmax.f32 %v2696_v11, %v1479_v57 }
  0xd0   : > { %366 = vrot.lane.b32.xlu1 %v2763_v36, %s2507_s30  ;;  %376 = vrot.lane.b32.xlu0 %v2756_v35, %s2507_s30  ;;  %5272 = vst [vmem:[#allocation18_spill] sm:$0xff] %v2813_v47  ;;  %5273 = vst [vmem:[#allocation19_spill] sm:$0xff] %v2816_v49 }
  0xd1   : > { %v1585_v51 = vpop.permute.xlu0 %1584  ;;  %v1439_v2 = vpop.permute.xlu1 %1438 }
  0xd2   : > { %v2830_v53 = vmin.f32 %v2701_v12, %v1585_v51  ;;  %v2836_v55 = vmax.f32 %v2701_v12, %v1585_v51  ;;  %v1444_v5 = vmin.f32 %v2691_v10, %v1439_v2  ;;  %v1446_v7 = vmax.f32 %v2691_v10, %v1439_v2 }
  0xd4   : > { %378 = vrot.lane.b32.xlu1 %v2772_v38, %s2507_s30  ;;  %622 = vrot.lane.b32.xlu0 %v2750_v32, %s2506_s18 }
  0xd5   : > { %v1477_v59 = vpop.permute.xlu0 %1476 }
  0xd6   : > { %v2863_v62 = vmin.f32 %v2708_v13, %v1477_v59  ;;  %v2870_v63 = vmax.f32 %v2708_v13, %v1477_v59 }
  0xd8   : > { %624 = vrot.lane.b32.xlu1 %v2763_v36, %s2506_s18  ;;  %632 = vrot.lane.b32.xlu0 %v2756_v35, %s2506_s18 }
  0xd9   : > { %v1441_v0 = vpop.permute.xlu0 %1440 }
  0xda   : > { %v1445_v1 = vmin.f32 %v2679_v8, %v1441_v0  ;;  %v1447_v3 = vmax.f32 %v2679_v8, %v1441_v0 }
  0xdc   : > { %634 = vrot.lane.b32.xlu1 %v2772_v38, %s2506_s18  ;;  %670 = vrot.lane.b32.xlu0 %v2785_v41, %s2507_s30 }
  0xe0   : > { %672 = vrot.lane.b32.xlu1 %v2795_v44, %s2507_s30  ;;  %682 = vrot.lane.b32.xlu0 %v2788_v43, %s2507_s30 }
  0xe4   : > { %684 = vrot.lane.b32.xlu1 %v2802_v45, %s2507_s30  ;;  %764 = vrot.lane.b32.xlu0 %v2785_v41, %s2506_s18 }
  0xe8   : > { %766 = vrot.lane.b32.xlu1 %v2795_v44, %s2506_s18  ;;  %774 = vrot.lane.b32.xlu0 %v2788_v43, %s2506_s18 }
  0xec   : > { %776 = vrot.lane.b32.xlu1 %v2802_v45, %s2506_s18  ;;  %802 = vrot.lane.b32.xlu0 %v2813_v47, %s2506_s18 }
  0xf0   : > { %804 = vrot.lane.b32.xlu1 %v2823_v50, %s2506_s18  ;;  %814 = vrot.lane.b32.xlu0 %v2816_v49, %s2506_s18 }
  0xf4   : > { %816 = vrot.lane.b32.xlu1 %v2833_v54, %s2506_s18  ;;  %1622 = vrot.lane.b32.xlu0 %v2830_v53, %s2506_s18 }
  0xf8   : > { %1624 = vrot.lane.b32.xlu1 %v2843_v56, %s2506_s18  ;;  %1632 = vrot.lane.b32.xlu0 %v2836_v55, %s2506_s18 }
  0xfc   : > { %1634 = vrot.lane.b32.xlu1 %v2853_v60, %s2506_s18  ;;  %1490 = vrot.lane.b32.xlu0 %v2850_v58, %s2506_s18 }
 0x100   : > { %1502 = vrot.lane.b32.xlu0 %v2856_v61, %s2506_s18  ;;  %1488 = vrot.lane.b32.xlu1 %v2863_v62, %s2506_s18 }
 0x104   : > { %1598 = vrot.lane.b32.xlu0 %v2843_v56, %s2507_s30  ;;  %1500 = vrot.lane.b32.xlu1 %v2870_v63, %s2506_s18 }
 0x108   : > { %1610 = vrot.lane.b32.xlu0 %v2853_v60, %s2507_s30  ;;  %1596 = vrot.lane.b32.xlu1 %v2830_v53, %s2507_s30 }
 0x10c   : > { %1608 = vrot.lane.b32.xlu1 %v2836_v55, %s2507_s30  ;;  %1452 = vrot.lane.b32.xlu0 %v1445_v1, %s2506_s18  ;;  %v2958_v1 = vmin.f32 %v2667_v6, %v2765_v37 }
 0x110   : > { %1450 = vrot.lane.b32.xlu1 %v1444_v5, %s2506_s18  ;;  %1464 = vrot.lane.b32.xlu0 %v1447_v3, %s2506_s18 }
 0x114   : > { %1462 = vrot.lane.b32.xlu1 %v1446_v7, %s2506_s18  ;;  %1880 = vrot.lane.b32.xlu0 %v2686_v9, %s2506_s18  ;;  %v2968_v7 = vmax.f32 %v2667_v6, %v2765_v37  ;;  %v2985_v6 = vmax.f32 %v2657_v4, %v2774_v39 }
 0x118   : > { %1878 = vrot.lane.b32.xlu1 %v2701_v12, %s2506_s18 }
 0x126   : > { %v2894_v8 = vpop.permute.xlu1 %178  ;;  %v2896_v11 = vpop.permute.xlu0 %190 }
 0x127   : > { %5276 = vst [vmem:[#allocation22_spill] sm:$0xff] %v2894_v8  ;;  %5277 = vst [vmem:[#allocation23_spill] sm:$0xff] %v2896_v11 }
 0x12a   : > { %v2898_v13 = vpop.permute.xlu1 %180 }
 0x12b   : > { %5278 = vst [vmem:[#allocation24_spill] sm:$0xff] %v2898_v13 }
 0x12e   : > { %v2900_v14 = vpop.permute.xlu1 %192  ;;  %v2902_v10 = vpop.permute.xlu0 %218 }
 0x12f   : > { %5279 = vst [vmem:[#allocation25_spill] sm:$0xff] %v2900_v14  ;;  %v224_v17 = vmin.f32 %v2716_v15, %v2902_v10  ;;  %v226_v43 = vmax.f32 %v2716_v15, %v2902_v10 }
 0x131   : > { %246 = vrot.lane.b32.xlu0 %v224_v17, %s2508_s2  ;;  %v2972_v17 = vmin.f32 %v2657_v4, %v2774_v39 }
 0x132   : > { %v2907_v9 = vpop.permute.xlu1 %220  ;;  %v2909_v19 = vpop.permute.xlu0 %230 }
 0x133   : > { %v225_v12 = vmin.f32 %v2724_v18, %v2907_v9  ;;  %v238_v20 = vmax.f32 %v2718_v16, %v2909_v19 }
 0x135   : > { %248 = vrot.lane.b32.xlu1 %v225_v12, %s2508_s2  ;;  %286 = vrot.lane.b32.xlu0 %v238_v20, %s2508_s2 }
 0x136   : > { %v2917_v22 = vpop.permute.xlu1 %232  ;;  %v2919_v23 = vpop.permute.xlu0 %324 }
 0x137   : > { %v239_v24 = vmax.f32 %v2728_v21, %v2917_v22 }
 0x139   : > { %288 = vrot.lane.b32.xlu1 %v239_v24, %s2508_s2 }
 0x13a   : > { %v2924_v25 = vpop.permute.xlu1 %326  ;;  %v2926_v27 = vpop.permute.xlu0 %336 }
 0x13e   : > { %v2928_v28 = vpop.permute.xlu1 %338  ;;  %v2930_v31 = vpop.permute.xlu0 %364 }
 0x13f   : > { %v370_v33 = vmin.f32 %v2735_v26, %v2930_v31 }
 0x141   : > { %392 = vrot.lane.b32.xlu0 %v370_v33, %s2508_s2 }
 0x142   : > { %v2935_v40 = vpop.permute.xlu1 %366  ;;  %v2937_v42 = vpop.permute.xlu0 %376 }
 0x143   : > { %v371_v46 = vmin.f32 %v2743_v30, %v2935_v40  ;;  %v384_v48 = vmax.f32 %v2737_v29, %v2937_v42 }
 0x145   : > { %394 = vrot.lane.b32.xlu1 %v371_v46, %s2508_s2  ;;  %432 = vrot.lane.b32.xlu0 %v384_v48, %s2508_s2 }
 0x146   : > { %v2945_v51 = vpop.permute.xlu1 %378  ;;  %v2947_v52 = vpop.permute.xlu0 %622 }
 0x147   : > { %5280 = vst [vmem:[#allocation26_spill] sm:$0xff] %v2947_v52  ;;  %v385_v57 = vmax.f32 %v2753_v34, %v2945_v51 }
 0x149   : > { %434 = vrot.lane.b32.xlu1 %v385_v57, %s2508_s2 }
 0x14a   : > { %v2952_v59 = vpop.permute.xlu1 %624  ;;  %v2954_v0 = vpop.permute.xlu0 %632 }
 0x14b   : > { %5281 = vst [vmem:[#allocation27_spill] sm:$0xff] %v2952_v59  ;;  %5282 = vst [vmem:[#allocation28_spill] sm:$0xff] %v2954_v0 }
 0x14e   : > { %v2960_v2 = vpop.permute.xlu1 %634  ;;  %v2962_v3 = vpop.permute.xlu0 %670 }
 0x14f   : > { %5283 = vst [vmem:[#allocation29_spill] sm:$0xff] %v2960_v2  ;;  %v676_v5 = vmin.f32 %v2958_v1, %v2962_v3 }
 0x151   : > { %698 = vrot.lane.b32.xlu0 %v676_v5, %s2508_s2 }
 0x152   : > { %v2975_v12 = vpop.permute.xlu1 %672  ;;  %v2977_v20 = vpop.permute.xlu0 %682 }
 0x153   : > { %v677_v24 = vmin.f32 %v2972_v17, %v2975_v12  ;;  %v690_v33 = vmax.f32 %v2968_v7, %v2977_v20 }
 0x155   : > { %700 = vrot.lane.b32.xlu1 %v677_v24, %s2508_s2  ;;  %738 = vrot.lane.b32.xlu0 %v690_v33, %s2508_s2 }
 0x156   : > { %v2989_v37 = vpop.permute.xlu1 %684  ;;  %v2991_v46 = vpop.permute.xlu0 %764 }
 0x157   : > { %v691_v48 = vmax.f32 %v2985_v6, %v2989_v37 }
 0x159   : > { %740 = vrot.lane.b32.xlu1 %v691_v48, %s2508_s2 }
 0x15a   : > { %v2996_v57 = vpop.permute.xlu1 %766  ;;  %v2998_v5 = vpop.permute.xlu0 %774 }
 0x15e   : > { %v3000_v13 = vpop.permute.xlu1 %776  ;;  %v3002_v4 = vpop.permute.xlu0 %802 }
 0x15f   : > { %5284 = vst [vmem:[#allocation30_spill] sm:$0xff] %v3000_v13  ;;  %v808_v39 = vmin.f32 %v2813_v47, %v3002_v4 }
 0x161   : > { %830 = vrot.lane.b32.xlu0 %v808_v39, %s2509_s5 }
 0x162   : > { %v3007_v24 = vpop.permute.xlu1 %804  ;;  %v3009_v33 = vpop.permute.xlu0 %814 }
 0x163   : > { %v809_v48 = vmin.f32 %v2823_v50, %v3007_v24  ;;  %v822_v14 = vmax.f32 %v2816_v49, %v3009_v33 }
 0x165   : > { %832 = vrot.lane.b32.xlu1 %v809_v48, %s2509_s5  ;;  %870 = vrot.lane.b32.xlu0 %v822_v14, %s2509_s5 }
 0x166   : > { %v3017_v11 = vpop.permute.xlu1 %816  ;;  %v3019_v8 = vpop.permute.xlu0 %1622 }
 0x167   : > { %v823_v39 = vmax.f32 %v2833_v54, %v3017_v11  ;;  %v1628_v38 = vmin.f32 %v2830_v53, %v3019_v8 }
 0x169   : > { %872 = vrot.lane.b32.xlu1 %v823_v39, %s2509_s5 }
 0x16a   : > { %v3024_v36 = vpop.permute.xlu1 %1624  ;;  %v3026_v59 = vpop.permute.xlu0 %1632 }
 0x16b   : > { %v1629_v48 = vmin.f32 %v2843_v56, %v3024_v36  ;;  %v1640_v39 = vmax.f32 %v2836_v55, %v3026_v59 }
 0x16d   : > { %1650 = vrot.lane.b32.xlu0 %v1629_v48, %s2509_s5  ;;  %1648 = vrot.lane.b32.xlu1 %v1628_v38, %s2509_s5 }
 0x16e   : > { %v3034_v14 = vpop.permute.xlu1 %1634  ;;  %v3036_v2 = vpop.permute.xlu0 %1490 }
 0x16f   : > { %v1641_v32 = vmax.f32 %v2853_v60, %v3034_v14  ;;  %v1495_v48 = vmin.f32 %v2850_v58, %v3036_v2 }
 0x171   : > { %1690 = vrot.lane.b32.xlu0 %v1641_v32, %s2509_s5  ;;  %1688 = vrot.lane.b32.xlu1 %v1640_v39, %s2509_s5  ;;  %v236_v32 = vmin.f32 %v2718_v16, %v2909_v19  ;;  %v237_v39 = vmin.f32 %v2728_v21, %v2917_v22  ;;  %v382_v22 = vmin.f32 %v2737_v29, %v2937_v42 }
 0x172   : > { %v3044_v52 = vpop.permute.xlu1 %1488  ;;  %v3050_v35 = vpop.permute.xlu0 %1502  ;;  %v383_v21 = vmin.f32 %v2753_v34, %v2945_v51 }
 0x173   : > { %v1494_v38 = vmin.f32 %v2863_v62, %v3044_v52  ;;  %v1509_v45 = vmax.f32 %v2856_v61, %v3050_v35  ;;  %v240_v16 = vmin.f32 %v236_v32, %v226_v43 }
 0x175   : > { %1516 = vrot.lane.b32.xlu1 %v1494_v38, %s2509_s5  ;;  %1518 = vrot.lane.b32.xlu0 %v1495_v48, %s2509_s5  ;;  %v227_v48 = vmax.f32 %v2724_v18, %v2907_v9  ;;  %v242_v38 = vmax.f32 %v236_v32, %v226_v43  ;;  %v372_v9 = vmax.f32 %v2735_v26, %v2930_v31 }
 0x176   : > { %v3054_v0 = vpop.permute.xlu1 %1500  ;;  %v688_v43 = vmin.f32 %v2968_v7, %v2977_v20  ;;  %v689_v31 = vmin.f32 %v2985_v6, %v2989_v37 }
 0x177   : > { %v1508_v13 = vmax.f32 %v2870_v63, %v3054_v0  ;;  %v243_v19 = vmax.f32 %v237_v39, %v227_v48  ;;  %v241_v10 = vmin.f32 %v237_v39, %v227_v48  ;;  %v386_v42 = vmin.f32 %v382_v22, %v372_v9  ;;  %v3094_v48 = vpop.permute.xlu0 %1598 }
 0x179   : > { %1556 = vrot.lane.b32.xlu1 %v1508_v13, %s2509_s5  ;;  %1558 = vrot.lane.b32.xlu0 %v1509_v45, %s2509_s5  ;;  %v373_v45 = vmax.f32 %v2743_v30, %v2935_v40  ;;  %v388_v13 = vmax.f32 %v382_v22, %v372_v9  ;;  %v678_v40 = vmax.f32 %v2958_v1, %v2962_v3 }
 0x17a   : > { %v820_v1 = vmin.f32 %v2816_v49, %v3009_v33  ;;  %v821_v3 = vmin.f32 %v2833_v54, %v3017_v11  ;;  %v3106_v20 = vpop.permute.xlu1 %1596  ;;  %v1631_v9 = vmax.f32 %v2843_v56, %v3024_v36  ;;  %v1506_v36 = vmin.f32 %v2870_v63, %v3054_v0 }
 0x17b   : > { %v387_v51 = vmin.f32 %v383_v21, %v373_v45  ;;  %v694_v32 = vmax.f32 %v688_v43, %v678_v40 }
 0x17d   : > { %260 = vrot.lane.b32.xlu1 %v243_v19, %s2508_s2  ;;  %258 = vrot.lane.b32.xlu0 %v242_v38, %s2508_s2  ;;  %v389_v19 = vmax.f32 %v383_v21, %v373_v45  ;;  %v692_v21 = vmin.f32 %v688_v43, %v678_v40  ;;  %v3110_v38 = vpop.permute.xlu0 %1610 }
 0x17e   : > { %v3118_v22 = vpop.permute.xlu1 %1608 }
 0x17f   : > { %v3264_v49 = vmax.f32 %v2870_v63, %v3118_v22 }
 0x181   : > { %276 = vrot.lane.b32.xlu1 %v241_v10, %s2508_s2  ;;  %274 = vrot.lane.b32.xlu0 %v240_v16, %s2508_s2  ;;  %v679_v16 = vmax.f32 %v2972_v17, %v2975_v12  ;;  %v810_v17 = vmax.f32 %v2813_v47, %v3002_v4  ;;  %v811_v12 = vmax.f32 %v2823_v50, %v3007_v24  ;;  %v3124_v45 = vpop.permute.xlu0 %1452  ;;  %v5318_v50 = vld [vmem:[#allocation28_spill] sm:$0xff] }
 0x182   : > { %v1638_v4 = vmin.f32 %v2836_v55, %v3026_v59  ;;  %v1639_v24 = vmin.f32 %v2853_v60, %v3034_v14  ;;  %v1630_v10 = vmax.f32 %v2830_v53, %v3019_v8  ;;  %5285 = vst [vmem:[#allocation31_spill] sm:$0xff] %v3124_v45  ;;  %v3128_v55 = vpop.permute.xlu1 %1450  ;;  %v1507_v53 = vmin.f32 %v2856_v61, %v3050_v35 }
 0x183   : > { %v695_v39 = vmax.f32 %v689_v31, %v679_v16  ;;  %v693_v7 = vmin.f32 %v689_v31, %v679_v16  ;;  %v826_v6 = vmax.f32 %v820_v1, %v810_v17  ;;  %v827_v37 = vmax.f32 %v821_v3, %v811_v12  ;;  %5286 = vst [vmem:[#allocation32_spill] sm:$0xff] %v3128_v55 }
 0x184   : > { %v824_v11 = vmin.f32 %v820_v1, %v810_v17  ;;  %v825_v33 = vmin.f32 %v821_v3, %v811_v12  ;;  %v1642_v60 = vmin.f32 %v1638_v4, %v1630_v10  ;;  %v1643_v59 = vmin.f32 %v1639_v24, %v1631_v9  ;;  %5307 = vst [vmem:[#allocation47_spill] sm:$0xff] %v3264_v49 }
 0x185   : > { %406 = vrot.lane.b32.xlu1 %v389_v19, %s2508_s2  ;;  %404 = vrot.lane.b32.xlu0 %v388_v13, %s2508_s2  ;;  %v1644_v13 = vmax.f32 %v1638_v4, %v1630_v10  ;;  %v1645_v19 = vmax.f32 %v1639_v24, %v1631_v9  ;;  %v3136_v56 = vpop.permute.xlu0 %1464  ;;  %v1497_v8 = vmax.f32 %v2850_v58, %v3036_v2 }
 0x186   : > { %5287 = vst [vmem:[#allocation33_spill] sm:$0xff] %v3136_v56  ;;  %v1496_v14 = vmax.f32 %v2863_v62, %v3044_v52  ;;  %v3144_v43 = vpop.permute.xlu1 %1462  ;;  %v3172_v1 = vmin.f32 %v2743_v30, %v2924_v25  ;;  %v3176_v3 = vmax.f32 %v2737_v29, %v2926_v27 }
 0x187   : > { %5288 = vst [vmem:[#allocation34_spill] sm:$0xff] %v3144_v43  ;;  %v1511_v0 = vmin.f32 %v1507_v53, %v1497_v8 }
 0x188   : > { %v1510_v31 = vmin.f32 %v1506_v36, %v1496_v14 }
 0x189   : > { %422 = vrot.lane.b32.xlu1 %v387_v51, %s2508_s2  ;;  %420 = vrot.lane.b32.xlu0 %v386_v42, %s2508_s2  ;;  %v1513_v42 = vmax.f32 %v1507_v53, %v1497_v8  ;;  %v1512_v51 = vmax.f32 %v1506_v36, %v1496_v14  ;;  %v3146_v35 = vpop.permute.xlu0 %1880  ;;  %v3216_v53 = vmin.f32 %v2795_v44, %v2996_v57  ;;  %v5297_v36 = vld [vmem:[#allocation16_spill] sm:$0xff] }
 0x18a   : > { %5289 = vst [vmem:[#allocation35_spill] sm:$0xff] %v3146_v35  ;;  %v3150_v2 = vpop.permute.xlu1 %1878  ;;  %v3220_v8 = vmax.f32 %v5297_v36, %v2998_v5 }
 0x18b   : > { %5290 = vst [vmem:[#allocation36_spill] sm:$0xff] %v3150_v2 }
 0x18d   : > { %712 = vrot.lane.b32.xlu1 %v695_v39, %s2508_s2  ;;  %710 = vrot.lane.b32.xlu0 %v694_v32, %s2508_s2  ;;  %v3162_v32 = vmin.f32 %v2735_v26, %v2919_v23 }
 0x191   : > { %728 = vrot.lane.b32.xlu1 %v693_v7, %s2508_s2  ;;  %726 = vrot.lane.b32.xlu0 %v692_v21, %s2508_s2 }
 0x195   : > { %844 = vrot.lane.b32.xlu1 %v827_v37, %s2509_s5  ;;  %842 = vrot.lane.b32.xlu0 %v826_v6, %s2509_s5 }
 0x199   : > { %860 = vrot.lane.b32.xlu1 %v825_v33, %s2509_s5  ;;  %858 = vrot.lane.b32.xlu0 %v824_v11, %s2509_s5  ;;  %v3189_v11 = vmax.f32 %v2753_v34, %v2928_v28 }
 0x19d   : > { %1660 = vrot.lane.b32.xlu1 %v1644_v13, %s2509_s5  ;;  %1662 = vrot.lane.b32.xlu0 %v1645_v19, %s2509_s5  ;;  %v3206_v13 = vmin.f32 %v2785_v41, %v2991_v46 }
 0x19f   : > { %5295 = vst [vmem:[#allocation41_spill] sm:$0xff] %v3206_v13 }
 0x1a1   : > { %1676 = vrot.lane.b32.xlu1 %v1642_v60, %s2509_s5  ;;  %1678 = vrot.lane.b32.xlu0 %v1643_v59, %s2509_s5 }
 0x1a3   : > { %v3152_v40 = vpop.permute.xlu0 %246 }
 0x1a4   : > { %5291 = vst [vmem:[#allocation37_spill] sm:$0xff] %v3152_v40  ;;  %v3260_v40 = vmax.f32 %v2856_v61, %v3110_v38 }
 0x1a5   : > { %1528 = vrot.lane.b32.xlu1 %v1512_v51, %s2509_s5  ;;  %1530 = vrot.lane.b32.xlu0 %v1513_v42, %s2509_s5 }
 0x1a6   : > { %5306 = vst [vmem:[#allocation46_spill] sm:$0xff] %v3260_v40 }
 0x1a7   : > { %v3156_v52 = vpop.permute.xlu1 %248  ;;  %v3158_v16 = vpop.permute.xlu0 %286 }
 0x1a8   : > { %5292 = vst [vmem:[#allocation38_spill] sm:$0xff] %v3156_v52  ;;  %5293 = vst [vmem:[#allocation39_spill] sm:$0xff] %v3158_v16 }
 0x1a9   : > { %1544 = vrot.lane.b32.xlu1 %v1510_v31, %s2509_s5  ;;  %1546 = vrot.lane.b32.xlu0 %v1511_v0, %s2509_s5  ;;  %v5298_v31 = vld [vmem:[#allocation30_spill] sm:$0xff] }
 0x1ab   : > { %v3164_v39 = vpop.permute.xlu1 %288 }
 0x1ac   : > { %5294 = vst [vmem:[#allocation40_spill] sm:$0xff] %v3164_v39  ;;  %v3247_v39 = vmin.f32 %v2863_v62, %v3106_v20 }
 0x1ae   : > { %5303 = vst [vmem:[#allocation43_spill] sm:$0xff] %v3247_v39 }
 0x1b3   : > { %v3166_v21 = vpop.permute.xlu0 %392 }
 0x1b4   : > { %v398_v7 = vmin.f32 %v3162_v32, %v3166_v21 }
 0x1b6   : > { %460 = vrot.lane.b32.xlu0 %v398_v7, %s2504_s25  ;;  %v5299_v7 = vld [vmem:[#allocation17_spill] sm:$0xff] }
 0x1b7   : > { %v3179_v17 = vpop.permute.xlu1 %394  ;;  %v3181_v12 = vpop.permute.xlu0 %432 }
 0x1b8   : > { %v399_v6 = vmin.f32 %v3172_v1, %v3179_v17  ;;  %v440_v37 = vmax.f32 %v3176_v3, %v3181_v12 }
 0x1ba   : > { %462 = vrot.lane.b32.xlu1 %v399_v6, %s2504_s25  ;;  %568 = vrot.lane.b32.xlu0 %v440_v37, %s2504_s25  ;;  %v3233_v6 = vmax.f32 %v5299_v7, %v5298_v31 }
 0x1bb   : > { %v3193_v33 = vpop.permute.xlu1 %434 }
 0x1bc   : > { %v441_v4 = vmax.f32 %v3189_v11, %v3193_v33  ;;  %5300 = vst [vmem:[#allocation16_spill] sm:$0xff] %v3233_v6 }
 0x1be   : > { %570 = vrot.lane.b32.xlu1 %v441_v4, %s2504_s25 }
 0x1c3   : > { %v3198_v24 = vpop.permute.xlu0 %698 }
 0x1c7   : > { %v3200_v10 = vpop.permute.xlu1 %700  ;;  %v3202_v9 = vpop.permute.xlu0 %738 }
 0x1cb   : > { %v3208_v19 = vpop.permute.xlu1 %740 }
 0x1d3   : > { %v3210_v60 = vpop.permute.xlu0 %830 }
 0x1d4   : > { %5296 = vst [vmem:[#allocation42_spill] sm:$0xff] %v3210_v60  ;;  %v836_v59 = vmin.f32 %v3206_v13, %v3210_v60  ;;  %v5320_v60 = vld [vmem:[#allocation26_spill] sm:$0xff] }
 0x1d6   : > { %898 = vrot.lane.b32.xlu0 %v836_v59, %s2504_s25  ;;  %v3243_v59 = vmin.f32 %v2850_v58, %v3094_v48 }
 0x1d7   : > { %v3223_v14 = vpop.permute.xlu1 %832  ;;  %v3225_v42 = vpop.permute.xlu0 %870 }
 0x1d8   : > { %v837_v51 = vmin.f32 %v3216_v53, %v3223_v14  ;;  %v878_v0 = vmax.f32 %v3220_v8, %v3225_v42  ;;  %5302 = vst [vmem:[#allocation17_spill] sm:$0xff] %v3243_v59 }
 0x1da   : > { %900 = vrot.lane.b32.xlu1 %v837_v51, %s2504_s25  ;;  %1006 = vrot.lane.b32.xlu0 %v878_v0, %s2504_s25 }
 0x1db   : > { %v3237_v37 = vpop.permute.xlu1 %872 }
 0x1dc   : > { %5301 = vst [vmem:[#allocation30_spill] sm:$0xff] %v3237_v37  ;;  %v879_v4 = vmax.f32 %v3233_v6, %v3237_v37 }
 0x1de   : > { %1008 = vrot.lane.b32.xlu1 %v879_v4, %s2504_s25 }
 0x1df   : > { %v3250_v16 = vpop.permute.xlu1 %1648  ;;  %v3252_v51 = vpop.permute.xlu0 %1650 }
 0x1e0   : > { %5304 = vst [vmem:[#allocation44_spill] sm:$0xff] %v3250_v16  ;;  %5305 = vst [vmem:[#allocation45_spill] sm:$0xff] %v3252_v51  ;;  %v1654_v0 = vmin.f32 %v3247_v39, %v3250_v16  ;;  %v1655_v52 = vmin.f32 %v3243_v59, %v3252_v51  ;;  %v439_v59 = vmin.f32 %v3189_v11, %v3193_v33 }
 0x1e1   : > { %v400_v39 = vmax.f32 %v3162_v32, %v3166_v21 }
 0x1e2   : > { %1716 = vrot.lane.b32.xlu1 %v1654_v0, %s2504_s25  ;;  %1718 = vrot.lane.b32.xlu0 %v1655_v52, %s2504_s25 }
 0x1e3   : > { %v3268_v4 = vpop.permute.xlu1 %1688  ;;  %v3270_v43 = vpop.permute.xlu0 %1690 }
 0x1e4   : > { %5308 = vst [vmem:[#allocation48_spill] sm:$0xff] %v3268_v4  ;;  %5309 = vst [vmem:[#allocation49_spill] sm:$0xff] %v3270_v43  ;;  %v1696_v18 = vmax.f32 %v3264_v49, %v3268_v4  ;;  %v1697_v54 = vmax.f32 %v3260_v40, %v3270_v43  ;;  %v5324_v40 = vld [vmem:[#allocation15_spill] sm:$0xff] }
 0x1e6   : > { %1824 = vrot.lane.b32.xlu1 %v1696_v18, %s2504_s25  ;;  %1826 = vrot.lane.b32.xlu0 %v1697_v54, %s2504_s25  ;;  %v342_v18 = vmin.f32 %v2737_v29, %v2926_v27  ;;  %v343_v54 = vmin.f32 %v2753_v34, %v2928_v28  ;;  %v5321_v29 = vld [vmem:[#allocation12_spill] sm:$0xff] }
 0x1e7   : > { %v3278_v56 = vpop.permute.xlu1 %1516  ;;  %v3280_v15 = vpop.permute.xlu0 %1518  ;;  %v3306_v27 = vmin.f32 %v5321_v29, %v5320_v60  ;;  %v630_v34 = vmax.f32 %v5321_v29, %v5320_v60  ;;  %v401_v60 = vmax.f32 %v3172_v1, %v3179_v17  ;;  %v438_v29 = vmin.f32 %v3176_v3, %v3181_v12 }
 0x1e8   : > { %5310 = vst [vmem:[#allocation50_spill] sm:$0xff] %v3278_v56  ;;  %5311 = vst [vmem:[#allocation51_spill] sm:$0xff] %v3280_v15  ;;  %v332_v15 = vmax.f32 %v2735_v26, %v2919_v23 }
 0x1e9   : > { %5322 = vst [vmem:[#allocation28_spill] sm:$0xff] %v3306_v27 }
 0x1ea   : > { %v346_v13 = vmin.f32 %v342_v18, %v332_v15 }
 0x1eb   : > { %v3282_v0 = vpop.permute.xlu1 %1556  ;;  %v3284_v52 = vpop.permute.xlu0 %1558 }
 0x1ec   : > { %5312 = vst [vmem:[#allocation52_spill] sm:$0xff] %v3282_v0  ;;  %5313 = vst [vmem:[#allocation53_spill] sm:$0xff] %v3284_v52  ;;  %v333_v52 = vmax.f32 %v2743_v30, %v2924_v25  ;;  %v5323_v25 = vld [vmem:[#allocation29_spill] sm:$0xff] }
 0x1ed   : > { %v639_v43 = vmin.f32 %v5324_v40, %v5323_v25 }
 0x1ee   : > { %v349_v56 = vmax.f32 %v343_v54, %v333_v52 }
 0x1ef   : > { %v3286_v35 = vpop.permute.xlu1 %260  ;;  %v3288_v2 = vpop.permute.xlu0 %258 }
 0x1f0   : > { %5314 = vst [vmem:[#allocation54_spill] sm:$0xff] %v3286_v35  ;;  %5315 = vst [vmem:[#allocation55_spill] sm:$0xff] %v3288_v2  ;;  %v348_v2 = vmax.f32 %v342_v18, %v332_v15  ;;  %v5325_v15 = vld [vmem:[#allocation27_spill] sm:$0xff]  ;;  %v5326_v18 = vld [vmem:[#allocation14_spill] sm:$0xff] }
 0x1f1   : > { %v631_v16 = vmax.f32 %v5326_v18, %v5325_v15 }
 0x1f3   : > { %v3290_v47 = vpop.permute.xlu1 %276  ;;  %v3292_v55 = vpop.permute.xlu0 %274  ;;  %v3354_v12 = vmax.f32 %v639_v43, %v631_v16 }
 0x1f4   : > { %5316 = vst [vmem:[#allocation56_spill] sm:$0xff] %v3290_v47  ;;  %5317 = vst [vmem:[#allocation57_spill] sm:$0xff] %v3292_v55  ;;  %v5319_v47 = vld [vmem:[#allocation13_spill] sm:$0xff]  ;;  %v347_v55 = vmin.f32 %v343_v54, %v333_v52  ;;  %v3316_v54 = vmin.f32 %v5326_v18, %v5325_v15  ;;  %v3356_v15 = vmin.f32 %v639_v43, %v631_v16 }
 0x1f5   : > { %v638_v45 = vmin.f32 %v5319_v47, %v5318_v50  ;;  %v3328_v11 = vmax.f32 %v5319_v47, %v5318_v50  ;;  %v3348_v47 = vmax.f32 %v5324_v40, %v5323_v25  ;;  %v3352_v50 = vmax.f32 %v3306_v27, %v3198_v24  ;;  %5331 = vst [vmem:[#allocation15_spill] sm:$0xff] %v3354_v12 }
 0x1f6   : > { %v3364_v40 = vmax.f32 %v3316_v54, %v3200_v10 }
 0x1f7   : > { %v407_v0 = vpop.permute.xlu1 %406  ;;  %v405_v35 = vpop.permute.xlu0 %404  ;;  %v3332_v49 = vmax.f32 %v638_v45, %v630_v34  ;;  %v3344_v17 = vmin.f32 %v638_v45, %v630_v34  ;;  %5330 = vst [vmem:[#allocation29_spill] sm:$0xff] %v3352_v50  ;;  %v3368_v34 = vmin.f32 %v3328_v11, %v3202_v9 }
 0x1f8   : > { %v411_v26 = vmin.f32 %v349_v56, %v407_v0  ;;  %v410_v23 = vmin.f32 %v348_v2, %v405_v35  ;;  %5332 = vst [vmem:[#allocation27_spill] sm:$0xff] %v3364_v40 }
 0x1f9   : > { %5327 = vst [vmem:[#allocation13_spill] sm:$0xff] %v3332_v49  ;;  %5333 = vst [vmem:[#allocation14_spill] sm:$0xff] %v3368_v34 }
 0x1fa   : > { %v3334_v4 = vmax.f32 %v411_v26, %v401_v60  ;;  %v3336_v32 = vmax.f32 %v410_v23, %v400_v39  ;;  %v415_v25 = vmin.f32 %v411_v26, %v401_v60  ;;  %v414_v27 = vmin.f32 %v410_v23, %v400_v39 }
 0x1fb   : > { %v423_v28 = vpop.permute.xlu1 %422  ;;  %v421_v30 = vpop.permute.xlu0 %420  ;;  %v3388_v39 = vmin.f32 %v3348_v47, %v3208_v19  ;;  %v413_v26 = vmax.f32 %v349_v56, %v407_v0 }
 0x1fc   : > { %v429_v51 = vmax.f32 %v347_v55, %v423_v28  ;;  %v428_v52 = vmax.f32 %v346_v13, %v421_v30  ;;  %v427_v18 = vmin.f32 %v347_v55, %v423_v28  ;;  %v426_v6 = vmin.f32 %v346_v13, %v421_v30 }
 0x1fd   : > { %5336 = vst [vmem:[#allocation60_spill] sm:$0xff] %v3388_v39 }
 0x1fe   : > { %v3330_v33 = vmin.f32 %v439_v59, %v429_v51  ;;  %v3338_v21 = vmin.f32 %v438_v29, %v428_v52  ;;  %v445_v23 = vmax.f32 %v439_v59, %v429_v51  ;;  %v449_v30 = vmax.f32 %v427_v18, %v415_v25 }
 0x1ff   : > { %v3340_v1 = vpop.permute.xlu1 %712  ;;  %v3342_v3 = vpop.permute.xlu0 %710  ;;  %v444_v60 = vmax.f32 %v438_v29, %v428_v52  ;;  %v412_v51 = vmax.f32 %v348_v2, %v405_v35  ;;  %v780_v35 = vmin.f32 %v5297_v36, %v2998_v5  ;;  %v781_v2 = vmin.f32 %v5299_v7, %v5298_v31 }
 0x200   : > { %5328 = vst [vmem:[#allocation26_spill] sm:$0xff] %v3340_v1  ;;  %5329 = vst [vmem:[#allocation12_spill] sm:$0xff] %v3342_v3  ;;  %v453_v37 = vmax.f32 %v3330_v33, %v3334_v4  ;;  %v452_v45 = vmax.f32 %v3338_v21, %v3336_v32  ;;  %v3372_v55 = vmin.f32 %v3354_v12, %v3340_v1 }
 0x201   : > { %v3376_v43 = vmin.f32 %v3332_v49, %v3342_v3  ;;  %v457_v0 = vmax.f32 %v445_v23, %v413_v26  ;;  %v456_v29 = vmax.f32 %v444_v60, %v412_v51  ;;  %v1614_v5 = vmin.f32 %v2870_v63, %v3118_v22 }
 0x202   : > { %5334 = vst [vmem:[#allocation58_spill] sm:$0xff] %v3372_v55  ;;  %474 = vrot.lane.b32.xlu1 %v453_v37, %s2504_s25  ;;  %472 = vrot.lane.b32.xlu0 %v452_v45, %s2504_s25  ;;  %v448_v45 = vmax.f32 %v426_v6, %v414_v27  ;;  %v723_v12 = vmax.f32 %v3372_v55, %v3364_v40 }
 0x203   : > { %5335 = vst [vmem:[#allocation59_spill] sm:$0xff] %v3376_v43  ;;  %v3380_v16 = vpop.permute.xlu1 %728  ;;  %v3382_v13 = vpop.permute.xlu0 %726  ;;  %v722_v1 = vmax.f32 %v3376_v43, %v3352_v50  ;;  %v772_v43 = vmax.f32 %v2785_v41, %v2991_v46  ;;  %v447_v36 = vmin.f32 %v427_v18, %v415_v25  ;;  %v1604_v41 = vmax.f32 %v2863_v62, %v3106_v20  ;;  %v5344_v18 = vld [vmem:[#allocation16_spill] sm:$0xff] }
 0x204   : > { %v3392_v28 = vmax.f32 %v3356_v15, %v3380_v16  ;;  %v3396_v37 = vmax.f32 %v3344_v17, %v3382_v13  ;;  %v455_v62 = vmin.f32 %v445_v23, %v413_v26  ;;  %v5345_v23 = vld [vmem:[#allocation48_spill] sm:$0xff] }
 0x205   : > { %v786_v46 = vmax.f32 %v780_v35, %v772_v43  ;;  %v3452_v20 = vmin.f32 %v1614_v5, %v1604_v41 }
 0x206   : > { %5337 = vst [vmem:[#allocation61_spill] sm:$0xff] %v3392_v28  ;;  %5338 = vst [vmem:[#allocation62_spill] sm:$0xff] %v3396_v37  ;;  %v749_v3 = vmin.f32 %v3388_v39, %v3392_v28  ;;  %v748_v59 = vmin.f32 %v3368_v34, %v3396_v37  ;;  %490 = vrot.lane.b32.xlu1 %v449_v30, %s2504_s25  ;;  %488 = vrot.lane.b32.xlu0 %v448_v45, %s2504_s25 }
 0x207   : > { %v3410_v52 = vpop.permute.xlu1 %844  ;;  %v3412_v56 = vpop.permute.xlu0 %842 }
 0x208   : > { %v3414_v49 = vmax.f32 %v749_v3, %v723_v12  ;;  %v3416_v34 = vmax.f32 %v748_v59, %v722_v1  ;;  %v3432_v31 = vmin.f32 %v749_v3, %v723_v12  ;;  %v3434_v7 = vmin.f32 %v748_v59, %v722_v1  ;;  %v5343_v12 = vld [vmem:[#allocation30_spill] sm:$0xff] }
 0x209   : > { %v454_v3 = vmin.f32 %v444_v60, %v412_v51  ;;  %v877_v25 = vmin.f32 %v5344_v18, %v5343_v12  ;;  %v848_v60 = vmin.f32 %v786_v46, %v3412_v56 }
 0x20a   : > { %5339 = vst [vmem:[#allocation63_spill] sm:$0xff] %v3414_v49  ;;  %5340 = vst [vmem:[#allocation64_spill] sm:$0xff] %v3416_v34  ;;  %502 = vrot.lane.b32.xlu1 %v457_v0, %s2504_s25  ;;  %500 = vrot.lane.b32.xlu0 %v456_v29, %s2504_s25  ;;  %v773_v49 = vmax.f32 %v2795_v44, %v2996_v57  ;;  %v1615_v34 = vmin.f32 %v2856_v61, %v3110_v38 }
 0x20b   : > { %v861_v30 = vpop.permute.xlu1 %860  ;;  %v859_v45 = vpop.permute.xlu0 %858  ;;  %5341 = vst [vmem:[#allocation65_spill] sm:$0xff] %v3432_v31  ;;  %5342 = vst [vmem:[#allocation66_spill] sm:$0xff] %v3434_v7  ;;  %v1605_v0 = vmax.f32 %v2850_v58, %v3094_v48  ;;  %v446_v29 = vmin.f32 %v426_v6, %v414_v27  ;;  %v784_v38 = vmin.f32 %v780_v35, %v772_v43  ;;  %v5347_v35 = vld [vmem:[#allocation44_spill] sm:$0xff]  ;;  %v5353_v7 = vld [vmem:[#allocation42_spill] sm:$0xff] }
 0x20c   : > { %v785_v44 = vmin.f32 %v781_v2, %v773_v49  ;;  %v787_v63 = vmax.f32 %v781_v2, %v773_v49  ;;  %v3450_v48 = vmax.f32 %v1614_v5, %v1604_v41  ;;  %v839_v6 = vmax.f32 %v3216_v53, %v3223_v14  ;;  %v5348_v2 = vld [vmem:[#allocation43_spill] sm:$0xff]  ;;  %v5351_v41 = vld [vmem:[#allocation49_spill] sm:$0xff] }
 0x20d   : > { %v3446_v22 = vmax.f32 %v1615_v34, %v1605_v0  ;;  %v3448_v1 = vmin.f32 %v1615_v34, %v1605_v0  ;;  %v876_v27 = vmin.f32 %v3220_v8, %v3225_v42  ;;  %v866_v49 = vmax.f32 %v784_v38, %v859_v45  ;;  %v5346_v8 = vld [vmem:[#allocation47_spill] sm:$0xff]  ;;  %v5350_v0 = vld [vmem:[#allocation17_spill] sm:$0xff] }
 0x20e   : > { %530 = vrot.lane.b32.xlu1 %v447_v36, %s2504_s25  ;;  %528 = vrot.lane.b32.xlu0 %v446_v29, %s2504_s25  ;;  %v867_v58 = vmax.f32 %v785_v44, %v861_v30  ;;  %v849_v34 = vmin.f32 %v787_v63, %v3410_v52  ;;  %v1694_v42 = vmin.f32 %v5346_v8, %v5345_v23  ;;  %v5349_v36 = vld [vmem:[#allocation45_spill] sm:$0xff] }
 0x20f   : > { %v3441_v61 = vpop.permute.xlu1 %1660  ;;  %v3443_v57 = vpop.permute.xlu0 %1662  ;;  %v1656_v5 = vmax.f32 %v5348_v2, %v5347_v35  ;;  %v1657_v29 = vmax.f32 %v5350_v0, %v5349_v36  ;;  %v5354_v23 = vld [vmem:[#allocation41_spill] sm:$0xff]  ;;  %v880_v31 = vmin.f32 %v876_v27, %v866_v49  ;;  %v5355_v2 = vmin.f32 %v3330_v33, %v3334_v4 }
 0x210   : > { %v1666_v43 = vmin.f32 %v3450_v48, %v3441_v61  ;;  %v3465_v26 = vmin.f32 %v3446_v22, %v3443_v57  ;;  %v881_v18 = vmin.f32 %v877_v25, %v867_v58  ;;  %v838_v8 = vmax.f32 %v5354_v23, %v5353_v7 }
 0x211   : > { %v5356_v7 = vmin.f32 %v3338_v21, %v3336_v32  ;;  %v865_v0 = vmin.f32 %v785_v44, %v861_v30  ;;  %v864_v37 = vmin.f32 %v784_v38, %v859_v45  ;;  %v853_v28 = vmin.f32 %v849_v34, %v839_v6 }
 0x212   : > { %542 = vrot.lane.b32.xlu1 %v455_v62, %s2504_s25  ;;  %540 = vrot.lane.b32.xlu0 %v454_v3, %s2504_s25  ;;  %v5352_v62 = vld [vmem:[#allocation46_spill] sm:$0xff]  ;;  %v855_v3 = vmax.f32 %v849_v34, %v839_v6  ;;  %v3484_v55 = vmax.f32 %v1666_v43, %v1656_v5  ;;  %v3487_v40 = vmax.f32 %v3465_v26, %v1657_v29 }
 0x213   : > { %v1677_v53 = vpop.permute.xlu1 %1676  ;;  %v1679_v14 = vpop.permute.xlu0 %1678  ;;  %v1695_v12 = vmin.f32 %v5352_v62, %v5351_v41  ;;  %v854_v36 = vmax.f32 %v848_v60, %v838_v8  ;;  %v852_v32 = vmin.f32 %v848_v60, %v838_v8  ;;  %v883_v21 = vmax.f32 %v877_v25, %v867_v58 }
 0x214   : > { %v1684_v59 = vmax.f32 %v3452_v20, %v1677_v53  ;;  %v1685_v51 = vmax.f32 %v3448_v1, %v1679_v14  ;;  %v891_v41 = vmax.f32 %v881_v18, %v855_v3  ;;  %v887_v30 = vmax.f32 %v865_v0, %v853_v28 }
 0x215   : > { %v890_v39 = vmax.f32 %v880_v31, %v854_v36  ;;  %v882_v44 = vmax.f32 %v876_v27, %v866_v49  ;;  %v850_v45 = vmax.f32 %v786_v46, %v3412_v56  ;;  %v889_v56 = vmin.f32 %v881_v18, %v855_v3 }
 0x216   : > { %v3482_v50 = vmin.f32 %v1694_v42, %v1684_v59  ;;  %v3489_v35 = vmin.f32 %v1695_v12, %v1685_v51  ;;  %558 = vrot.lane.b32.xlu1 %v5355_v2, %s2504_s25  ;;  %556 = vrot.lane.b32.xlu0 %v5356_v7, %s2504_s25  ;;  %v886_v2 = vmax.f32 %v864_v37, %v852_v32 }
 0x217   : > { %v851_v7 = vmax.f32 %v787_v63, %v3410_v52  ;;  %v892_v52 = vmin.f32 %v882_v44, %v850_v45  ;;  %v888_v46 = vmin.f32 %v880_v31, %v854_v36  ;;  %v1682_v63 = vmin.f32 %v3452_v20, %v1677_v53  ;;  %v3525_v6 = vpop.permute.xlu0 %1530  ;;  %v3533_v20 = vpop.permute.xlu1 %1528 }
 0x218   : > { %v1708_v62 = vmax.f32 %v3482_v50, %v3484_v55  ;;  %v1709_v23 = vmax.f32 %v3489_v35, %v3487_v40  ;;  %v1706_v4 = vmin.f32 %v3482_v50, %v3484_v55  ;;  %v1707_v33 = vmin.f32 %v3489_v35, %v3487_v40 }
 0x219   : > { %v895_v38 = vmax.f32 %v883_v21, %v851_v7  ;;  %v894_v50 = vmax.f32 %v882_v44, %v850_v45  ;;  %v885_v40 = vmin.f32 %v865_v0, %v853_v28  ;;  %v884_v55 = vmin.f32 %v864_v37, %v852_v32  ;;  %v5370_v32 = vld [vmem:[#allocation50_spill] sm:$0xff]  ;;  %v5378_v45 = vld [vmem:[#allocation36_spill] sm:$0xff] }
 0x21a   : > { %912 = vrot.lane.b32.xlu1 %v891_v41, %s2504_s25  ;;  %910 = vrot.lane.b32.xlu0 %v890_v39, %s2504_s25  ;;  %v893_v39 = vmin.f32 %v883_v21, %v851_v7  ;;  %v1683_v28 = vmin.f32 %v3448_v1, %v1679_v14  ;;  %v1670_v37 = vmin.f32 %v1666_v43, %v1656_v5 }
 0x21b   : > { %v1671_v58 = vmin.f32 %v3465_v26, %v1657_v29  ;;  %v1700_v27 = vmax.f32 %v1694_v42, %v1684_v59  ;;  %v1701_v31 = vmax.f32 %v1695_v12, %v1685_v51  ;;  %v1668_v34 = vmax.f32 %v3450_v48, %v3441_v61  ;;  %v3536_v26 = vpop.permute.xlu0 %1546  ;;  %v3540_v61 = vpop.permute.xlu1 %1544  ;;  %v5360_v51 = vld [vmem:[#allocation28_spill] sm:$0xff] }
 0x21c   : > { %v1704_v49 = vmax.f32 %v1682_v63, %v1670_v37  ;;  %v1669_v1 = vmax.f32 %v3446_v22, %v3443_v57  ;;  %v1702_v14 = vmin.f32 %v1682_v63, %v1670_v37  ;;  %v3554_v5 = vmin.f32 %v5360_v51, %v3198_v24  ;;  %v5385_v37 = vld [vmem:[#allocation11_spill] sm:$0xff] }
 0x21d   : > { %v1705_v25 = vmax.f32 %v1683_v28, %v1671_v58  ;;  %v1712_v43 = vmax.f32 %v1700_v27, %v1668_v34  ;;  %v1703_v42 = vmin.f32 %v1683_v28, %v1671_v58  ;;  %v1710_v57 = vmin.f32 %v1700_v27, %v1668_v34  ;;  %v5384_v28 = vld [vmem:[#allocation25_spill] sm:$0xff]  ;;  %v5388_v34 = vld [vmem:[#allocation24_spill] sm:$0xff] }
 0x21e   : > { %928 = vrot.lane.b32.xlu1 %v887_v30, %s2504_s25  ;;  %926 = vrot.lane.b32.xlu0 %v886_v2, %s2504_s25  ;;  %v1713_v53 = vmax.f32 %v1701_v31, %v1669_v1  ;;  %v1711_v60 = vmin.f32 %v1701_v31, %v1669_v1  ;;  %v3566_v8 = vmin.f32 %v3316_v54, %v3200_v10  ;;  %v5366_v54 = vld [vmem:[#allocation31_spill] sm:$0xff]  ;;  %v5386_v27 = vld [vmem:[#allocation33_spill] sm:$0xff]  ;;  %v5389_v1 = vld [vmem:[#allocation10_spill] sm:$0xff] }
 0x21f   : > { %v3570_v3 = vmax.f32 %v3328_v11, %v3202_v9  ;;  %v3583_v10 = vmax.f32 %v3348_v47, %v3208_v19  ;;  %v5367_v11 = vld [vmem:[#allocation20_spill] sm:$0xff]  ;;  %v5372_v19 = vld [vmem:[#allocation51_spill] sm:$0xff]  ;;  %v197_v58 = vmin.f32 %v5385_v37, %v5384_v28 }
 0x220   : > { %v1457_v41 = vmin.f32 %v5367_v11, %v5366_v54 }
 0x221   : > { %5362 = vst [vmem:[#allocation44_spill] sm:$0xff] %v3570_v3  ;;  %5364 = vst [vmem:[#allocation45_spill] sm:$0xff] %v3583_v10 }
 0x222   : > { %940 = vrot.lane.b32.xlu1 %v895_v38, %s2504_s25  ;;  %938 = vrot.lane.b32.xlu0 %v894_v50, %s2504_s25  ;;  %v3599_v47 = vmin.f32 %v1457_v41, %v5372_v19  ;;  %v5379_v50 = vld [vmem:[#allocation35_spill] sm:$0xff] }
 0x224   : > { %5373 = vst [vmem:[#allocation46_spill] sm:$0xff] %v3599_v47 }
 0x226   : > { %968 = vrot.lane.b32.xlu1 %v885_v40, %s2504_s25  ;;  %966 = vrot.lane.b32.xlu0 %v884_v55, %s2504_s25  ;;  %v5380_v55 = vld [vmem:[#allocation22_spill] sm:$0xff] }
 0x228   : > { %v3542_v48 = vpop.permute.xlu0 %460 }
 0x229   : > { %5357 = vst [vmem:[#allocation30_spill] sm:$0xff] %v3542_v48 }
 0x22a   : > { %980 = vrot.lane.b32.xlu1 %v893_v39, %s2504_s25  ;;  %978 = vrot.lane.b32.xlu0 %v892_v52, %s2504_s25  ;;  %v5381_v39 = vld [vmem:[#allocation8_spill] sm:$0xff] }
 0x22b   : > { %v186_v52 = vmax.f32 %v5381_v39, %v5380_v55 }
 0x22c   : > { %v3546_v22 = vpop.permute.xlu1 %462  ;;  %v3549_v59 = vpop.permute.xlu0 %568 }
 0x22d   : > { %5358 = vst [vmem:[#allocation16_spill] sm:$0xff] %v3546_v22  ;;  %5359 = vst [vmem:[#allocation48_spill] sm:$0xff] %v3549_v59 }
 0x22e   : > { %996 = vrot.lane.b32.xlu1 %v889_v56, %s2504_s25  ;;  %994 = vrot.lane.b32.xlu0 %v888_v46, %s2504_s25  ;;  %v5382_v56 = vld [vmem:[#allocation23_spill] sm:$0xff]  ;;  %v5383_v46 = vld [vmem:[#allocation9_spill] sm:$0xff] }
 0x22f   : > { %v196_v63 = vmin.f32 %v5383_v46, %v5382_v56 }
 0x230   : > { %v3557_v29 = vpop.permute.xlu1 %570 }
 0x231   : > { %5361 = vst [vmem:[#allocation47_spill] sm:$0xff] %v3557_v29  ;;  %v202_v51 = vmax.f32 %v196_v63, %v186_v52 }
 0x232   : > { %1728 = vrot.lane.b32.xlu1 %v1708_v62, %s2504_s25  ;;  %1730 = vrot.lane.b32.xlu0 %v1709_v23, %s2504_s25  ;;  %v5368_v62 = vld [vmem:[#allocation32_spill] sm:$0xff]  ;;  %v5369_v23 = vld [vmem:[#allocation18_spill] sm:$0xff] }
 0x236   : > { %1744 = vrot.lane.b32.xlu1 %v1704_v49, %s2504_s25  ;;  %1746 = vrot.lane.b32.xlu0 %v1705_v25, %s2504_s25  ;;  %v5387_v49 = vld [vmem:[#allocation21_spill] sm:$0xff]  ;;  %v184_v25 = vmin.f32 %v5381_v39, %v5380_v55 }
 0x237   : > { %v1469_v31 = vmin.f32 %v5387_v49, %v5386_v27  ;;  %v1471_v55 = vmax.f32 %v5387_v49, %v5386_v27  ;;  %v5397_v27 = vld [vmem:[#allocation57_spill] sm:$0xff] }
 0x23a   : > { %1756 = vrot.lane.b32.xlu1 %v1712_v43, %s2504_s25  ;;  %1758 = vrot.lane.b32.xlu0 %v1713_v53, %s2504_s25  ;;  %v187_v43 = vmax.f32 %v5389_v1, %v5388_v34  ;;  %v5390_v53 = vld [vmem:[#allocation34_spill] sm:$0xff] }
 0x23e   : > { %1784 = vrot.lane.b32.xlu1 %v1702_v14, %s2504_s25  ;;  %1786 = vrot.lane.b32.xlu0 %v1703_v42, %s2504_s25  ;;  %v5391_v14 = vld [vmem:[#allocation19_spill] sm:$0xff] }
 0x23f   : > { %v1468_v42 = vmin.f32 %v5391_v14, %v5390_v53 }
 0x242   : > { %1796 = vrot.lane.b32.xlu1 %v1710_v57, %s2504_s25  ;;  %1798 = vrot.lane.b32.xlu0 %v1711_v60, %s2504_s25  ;;  %v198_v57 = vmax.f32 %v5383_v46, %v5382_v56  ;;  %v200_v60 = vmin.f32 %v196_v63, %v186_v52 }
 0x244   : > { %v282_v49 = vmax.f32 %v200_v60, %v5397_v27 }
 0x246   : > { %1812 = vrot.lane.b32.xlu1 %v1706_v4, %s2504_s25  ;;  %1814 = vrot.lane.b32.xlu0 %v1707_v33, %s2504_s25  ;;  %v1456_v4 = vmin.f32 %v5369_v23, %v5368_v62 }
 0x248   : > { %v3560_v12 = vpop.permute.xlu0 %898  ;;  %v3596_v21 = vmin.f32 %v1456_v4, %v5370_v32 }
 0x249   : > { %v904_v18 = vmin.f32 %v3554_v5, %v3560_v12 }
 0x24a   : > { %5371 = vst [vmem:[#allocation49_spill] sm:$0xff] %v3596_v21 }
 0x24b   : > { %1062 = vrot.lane.b32.xlu0 %v904_v18, %s2506_s18  ;;  %v1459_v18 = vmax.f32 %v5367_v11, %v5366_v54  ;;  %v1470_v54 = vmax.f32 %v5391_v14, %v5390_v53  ;;  %v5392_v11 = vld [vmem:[#allocation37_spill] sm:$0xff]  ;;  %v5400_v14 = vld [vmem:[#allocation55_spill] sm:$0xff] }
 0x24c   : > { %v3573_v24 = vpop.permute.xlu1 %900  ;;  %v3575_v35 = vpop.permute.xlu0 %1006  ;;  %v3653_v56 = vmin.f32 %v184_v25, %v5392_v11 }
 0x24d   : > { %5363 = vst [vmem:[#allocation43_spill] sm:$0xff] %v3575_v35  ;;  %v905_v36 = vmin.f32 %v3566_v8, %v3573_v24  ;;  %v1014_v0 = vmax.f32 %v3570_v3, %v3575_v35  ;;  %v3646_v39 = vmax.f32 %v1469_v31, %v1459_v18  ;;  %v3648_v52 = vmin.f32 %v1469_v31, %v1459_v18 }
 0x24e   : > { %5393 = vst [vmem:[#allocation20_spill] sm:$0xff] %v3653_v56  ;;  %v264_v18 = vmin.f32 %v202_v51, %v5400_v14 }
 0x24f   : > { %1064 = vrot.lane.b32.xlu1 %v905_v36, %s2506_s18  ;;  %1332 = vrot.lane.b32.xlu0 %v1014_v0, %s2506_s18  ;;  %v185_v36 = vmin.f32 %v5389_v1, %v5388_v34  ;;  %v199_v0 = vmax.f32 %v5385_v37, %v5384_v28  ;;  %v5396_v37 = vld [vmem:[#allocation56_spill] sm:$0xff]  ;;  %v5398_v34 = vld [vmem:[#allocation39_spill] sm:$0xff] }
 0x250   : > { %v3587_v9 = vpop.permute.xlu1 %1008  ;;  %v292_v1 = vmin.f32 %v198_v57, %v5398_v34 }
 0x251   : > { %5365 = vst [vmem:[#allocation17_spill] sm:$0xff] %v3587_v9  ;;  %v1015_v33 = vmax.f32 %v3583_v10, %v3587_v9 }
 0x253   : > { %1334 = vrot.lane.b32.xlu1 %v1015_v33, %s2506_s18  ;;  %v201_v33 = vmin.f32 %v197_v58, %v187_v43 }
 0x254   : > { %v3602_v30 = vpop.permute.xlu1 %1716  ;;  %v3604_v44 = vpop.permute.xlu0 %1718 }
 0x255   : > { %5374 = vst [vmem:[#allocation42_spill] sm:$0xff] %v3602_v30  ;;  %5375 = vst [vmem:[#allocation41_spill] sm:$0xff] %v3604_v44  ;;  %v3608_v2 = vmin.f32 %v3596_v21, %v3602_v30  ;;  %v3612_v7 = vmin.f32 %v3599_v47, %v3604_v44  ;;  %v281_v47 = vmin.f32 %v201_v33, %v5396_v37 }
 0x256   : > { %v280_v44 = vmin.f32 %v200_v60, %v5397_v27  ;;  %v298_v21 = vmax.f32 %v292_v1, %v282_v49 }
 0x257   : > { %5376 = vst [vmem:[#allocation28_spill] sm:$0xff] %v3608_v2  ;;  %5377 = vst [vmem:[#allocation31_spill] sm:$0xff] %v3612_v7  ;;  %v1884_v38 = vmin.f32 %v3608_v2, %v5378_v45  ;;  %v1885_v40 = vmin.f32 %v3612_v7, %v5379_v50  ;;  %v3677_v7 = vmax.f32 %v1456_v4, %v5370_v32  ;;  %v5408_v4 = vld [vmem:[#allocation53_spill] sm:$0xff] }
 0x258   : > { %v3680_v50 = vmax.f32 %v1457_v41, %v5372_v19  ;;  %v296_v45 = vmin.f32 %v292_v1, %v282_v49  ;;  %v1563_v32 = vmin.f32 %v1471_v55, %v5408_v4  ;;  %v3694_v30 = vmax.f32 %v1471_v55, %v5408_v4 }
 0x259   : > { %1974 = vrot.lane.b32.xlu0 %v1884_v38, %s2508_s2  ;;  %1976 = vrot.lane.b32.xlu1 %v1885_v40, %s2508_s2  ;;  %v1458_v38 = vmax.f32 %v5369_v23, %v5368_v62  ;;  %v203_v40 = vmax.f32 %v197_v58, %v187_v43  ;;  %v254_v62 = vmax.f32 %v184_v25, %v5392_v11  ;;  %v5394_v23 = vld [vmem:[#allocation38_spill] sm:$0xff] }
 0x25a   : > { %v3661_v28 = vmin.f32 %v185_v36, %v5394_v23  ;;  %v283_v58 = vmax.f32 %v201_v33, %v5396_v37  ;;  %v255_v31 = vmax.f32 %v185_v36, %v5394_v23  ;;  %v5399_v43 = vld [vmem:[#allocation54_spill] sm:$0xff]  ;;  %v5404_v36 = vld [vmem:[#allocation52_spill] sm:$0xff]  ;;  %5409 = vst [vmem:[#allocation23_spill] sm:$0xff] %v3694_v30  ;;  %v266_v37 = vmax.f32 %v202_v51, %v5400_v14  ;;  %v5418_v30 = vld [vmem:[#allocation27_spill] sm:$0xff] }
 0x25b   : > { %v3655_v46 = vmax.f32 %v1468_v42, %v1458_v38  ;;  %v3657_v63 = vmin.f32 %v1468_v42, %v1458_v38  ;;  %v265_v53 = vmin.f32 %v203_v40, %v5399_v43  ;;  %v3670_v42 = vmax.f32 %v198_v57, %v5398_v34  ;;  %v5402_v38 = vld [vmem:[#allocation40_spill] sm:$0xff]  ;;  %v5416_v14 = vld [vmem:[#allocation62_spill] sm:$0xff] }
 0x25c   : > { %5395 = vst [vmem:[#allocation32_spill] sm:$0xff] %v3661_v28  ;;  %v293_v25 = vmin.f32 %v199_v0, %v5402_v38  ;;  %v3674_v11 = vmax.f32 %v199_v0, %v5402_v38  ;;  %v1562_v23 = vmin.f32 %v1470_v54, %v5404_v36  ;;  %v3686_v57 = vmax.f32 %v1470_v54, %v5404_v36  ;;  %v3688_v0 = vpop.permute.xlu1 %1824  ;;  %v3690_v38 = vpop.permute.xlu0 %1826 }
 0x25d   : > { %5401 = vst [vmem:[#allocation18_spill] sm:$0xff] %v3670_v42  ;;  %5406 = vst [vmem:[#allocation22_spill] sm:$0xff] %v3688_v0  ;;  %v269_v41 = vmin.f32 %v265_v53, %v255_v31  ;;  %v268_v19 = vmin.f32 %v264_v18, %v254_v62  ;;  %v267_v60 = vmax.f32 %v203_v40, %v5399_v43  ;;  %v5415_v43 = vld [vmem:[#allocation60_spill] sm:$0xff]  ;;  %v5421_v0 = vld [vmem:[#allocation59_spill] sm:$0xff] }
 0x25e   : > { %5403 = vst [vmem:[#allocation50_spill] sm:$0xff] %v3674_v11  ;;  %5405 = vst [vmem:[#allocation51_spill] sm:$0xff] %v3686_v57  ;;  %v297_v34 = vmin.f32 %v293_v25, %v283_v58  ;;  %v299_v2 = vmax.f32 %v293_v25, %v283_v58  ;;  %v271_v33 = vmax.f32 %v265_v53, %v255_v31  ;;  %v5414_v31 = vld [vmem:[#allocation61_spill] sm:$0xff]  ;;  %v5419_v57 = vld [vmem:[#allocation58_spill] sm:$0xff] }
 0x25f   : > { %5407 = vst [vmem:[#allocation8_spill] sm:$0xff] %v3690_v38  ;;  %v270_v54 = vmax.f32 %v264_v18, %v254_v62  ;;  %v3698_v58 = vmin.f32 %v281_v47, %v269_v41  ;;  %v3700_v27 = vmax.f32 %v281_v47, %v269_v41  ;;  %v3702_v25 = vmin.f32 %v280_v44, %v268_v19  ;;  %v5417_v18 = vld [vmem:[#allocation14_spill] sm:$0xff] }
 0x260   : > { %v3704_v36 = vmax.f32 %v280_v44, %v268_v19  ;;  %v3706_v38 = vmax.f32 %v297_v34, %v271_v33  ;;  %v3714_v40 = vmax.f32 %v299_v2, %v267_v60  ;;  %v733_v51 = vmin.f32 %v3356_v15, %v3380_v16  ;;  %v5420_v16 = vld [vmem:[#allocation29_spill] sm:$0xff] }
 0x261   : > { %5410 = vst [vmem:[#allocation9_spill] sm:$0xff] %v3698_v58  ;;  %5411 = vst [vmem:[#allocation25_spill] sm:$0xff] %v3700_v27  ;;  %v3710_v55 = vmax.f32 %v296_v45, %v270_v54  ;;  %v732_v47 = vmin.f32 %v3344_v17, %v3382_v13  ;;  %v3720_v62 = vmax.f32 %v298_v21, %v266_v37 }
 0x262   : > { %5412 = vst [vmem:[#allocation11_spill] sm:$0xff] %v3702_v25  ;;  %5413 = vst [vmem:[#allocation33_spill] sm:$0xff] %v3704_v36  ;;  %v3722_v44 = vmin.f32 %v299_v2, %v267_v60  ;;  %v751_v53 = vmax.f32 %v5415_v43, %v5414_v31  ;;  %v750_v4 = vmax.f32 %v5417_v18, %v5416_v14  ;;  %v5422_v60 = vld [vmem:[#allocation26_spill] sm:$0xff]  ;;  %v5423_v31 = vld [vmem:[#allocation15_spill] sm:$0xff] }
 0x263   : > { %v3728_v41 = vmin.f32 %v298_v21, %v266_v37  ;;  %v3730_v19 = vmin.f32 %v297_v34, %v271_v33  ;;  %v721_v15 = vmin.f32 %v5419_v57, %v5418_v30  ;;  %v720_v17 = vmin.f32 %v5421_v0, %v5420_v16  ;;  %v5424_v14 = vld [vmem:[#allocation12_spill] sm:$0xff]  ;;  %v5425_v21 = vld [vmem:[#allocation13_spill] sm:$0xff] }
 0x264   : > { %v1552_v13 = vmax.f32 %v3657_v63, %v3540_v61  ;;  %v1553_v2 = vmax.f32 %v3648_v52, %v3536_v26  ;;  %v719_v43 = vmax.f32 %v5423_v31, %v5422_v60  ;;  %v718_v37 = vmax.f32 %v5425_v21, %v5424_v14 }
 0x265   : > { %v1534_v34 = vmin.f32 %v3655_v46, %v3533_v20  ;;  %v1535_v30 = vmin.f32 %v3646_v39, %v3525_v6  ;;  %v3752_v33 = vmin.f32 %v296_v45, %v270_v54  ;;  %v3754_v18 = vmax.f32 %v733_v51, %v721_v15 }
 0x266   : > { %v3756_v16 = vmax.f32 %v732_v47, %v720_v17  ;;  %v3758_v60 = vmin.f32 %v733_v51, %v721_v15  ;;  %v1550_v31 = vmin.f32 %v3657_v63, %v3540_v61  ;;  %v1551_v14 = vmin.f32 %v3648_v52, %v3536_v26 }
 0x267   : > { %v3764_v21 = vmax.f32 %v751_v53, %v719_v43  ;;  %v3766_v10 = vmax.f32 %v750_v4, %v718_v37  ;;  %v1566_v9 = vmin.f32 %v1562_v23, %v1552_v13  ;;  %v1568_v3 = vmax.f32 %v1562_v23, %v1552_v13 }
 0x268   : > { %5428 = vst [vmem:[#allocation10_spill] sm:$0xff] %v3758_v60  ;;  %v3768_v45 = vmin.f32 %v1563_v32, %v1553_v2  ;;  %v3770_v54 = vmin.f32 %v732_v47, %v720_v17  ;;  %v1538_v35 = vmin.f32 %v1534_v34, %v3677_v7  ;;  %v1539_v51 = vmin.f32 %v1535_v30, %v3680_v50 }
 0x269   : > { %v1569_v15 = vmax.f32 %v1563_v32, %v1553_v2  ;;  %v3774_v63 = vmin.f32 %v751_v53, %v719_v43  ;;  %v1536_v26 = vmax.f32 %v3655_v46, %v3533_v20  ;;  %v1540_v52 = vmax.f32 %v1534_v34, %v3677_v7 }
 0x26a   : > { %v3780_v23 = vmax.f32 %v1535_v30, %v3680_v50  ;;  %v3782_v13 = vmin.f32 %v750_v4, %v718_v37  ;;  %v1537_v47 = vmax.f32 %v3646_v39, %v3525_v6  ;;  %v3786_v17 = vmax.f32 %v1550_v31, %v1538_v35 }
 0x26b   : > { %v3788_v32 = vmax.f32 %v1551_v14, %v1539_v51  ;;  %v3790_v2 = vmin.f32 %v1550_v31, %v1538_v35  ;;  %v3792_v53 = vmax.f32 %v1566_v9, %v1540_v52  ;;  %v3798_v7 = vmax.f32 %v1568_v3, %v1536_v26 }
 0x26c   : > { %v3796_v20 = vmax.f32 %v3768_v45, %v3780_v23  ;;  %v3800_v50 = vmin.f32 %v1551_v14, %v1539_v51  ;;  %v3806_v4 = vmax.f32 %v1569_v15, %v1537_v47  ;;  %v3808_v35 = vmin.f32 %v1568_v3, %v1536_v26 }
 0x26d   : > { %v3812_v43 = vmax.f32 %v3653_v56, %v3542_v48  ;;  %v3816_v37 = vmax.f32 %v3661_v28, %v3546_v22  ;;  %v3820_v30 = vmin.f32 %v1569_v15, %v1537_v47  ;;  %v3822_v31 = vmin.f32 %v1566_v9, %v1540_v52 }
 0x26e   : > { %5429 = vst [vmem:[#allocation34_spill] sm:$0xff] %v3800_v50  ;;  %5431 = vst [vmem:[#allocation37_spill] sm:$0xff] %v3808_v35  ;;  %v574_v15 = vmin.f32 %v3670_v42, %v3549_v59  ;;  %v575_v9 = vmin.f32 %v3674_v11, %v3557_v29  ;;  %v906_v52 = vmax.f32 %v3554_v5, %v3560_v12 }
 0x26f   : > { %5432 = vst [vmem:[#allocation38_spill] sm:$0xff] %v3812_v43  ;;  %5433 = vst [vmem:[#allocation56_spill] sm:$0xff] %v3816_v37  ;;  %v907_v47 = vmax.f32 %v3566_v8, %v3573_v24 }
 0x270   : > { %5435 = vst [vmem:[#allocation39_spill] sm:$0xff] %v3820_v30  ;;  %5436 = vst [vmem:[#allocation54_spill] sm:$0xff] %v3822_v31  ;;  %v5443_v31 = vld [vmem:[#allocation63_spill] sm:$0xff] }
 0x274   : > { %v3708_v49 = vpop.permute.xlu1 %474  ;;  %v3712_v1 = vpop.permute.xlu0 %472 }
 0x275   : > { %v3826_v14 = vmin.f32 %v3706_v38, %v3708_v49  ;;  %v3830_v3 = vmin.f32 %v3710_v55, %v3712_v1  ;;  %v481_v28 = vmax.f32 %v3706_v38, %v3708_v49  ;;  %v480_v22 = vmax.f32 %v3710_v55, %v3712_v1 }
 0x277   : > { %5437 = vst [vmem:[#allocation55_spill] sm:$0xff] %v3826_v14  ;;  %5438 = vst [vmem:[#allocation40_spill] sm:$0xff] %v3830_v3  ;;  %v485_v12 = vmax.f32 %v3826_v14, %v3816_v37  ;;  %v484_v8 = vmax.f32 %v3830_v3, %v3812_v43 }
 0x278   : > { %v3748_v57 = vpop.permute.xlu1 %490  ;;  %v3750_v0 = vpop.permute.xlu0 %488 }
 0x279   : > { %5426 = vst [vmem:[#allocation21_spill] sm:$0xff] %v3748_v57  ;;  %5427 = vst [vmem:[#allocation24_spill] sm:$0xff] %v3750_v0  ;;  %v497_v51 = vmax.f32 %v3700_v27, %v3748_v57  ;;  %v496_v26 = vmax.f32 %v3704_v36, %v3750_v0 }
 0x27c   : > { %v503_v60 = vpop.permute.xlu1 %502  ;;  %v501_v61 = vpop.permute.xlu0 %500 }
 0x27d   : > { %v507_v46 = vmin.f32 %v3714_v40, %v503_v60  ;;  %v506_v6 = vmin.f32 %v3720_v62, %v501_v61  ;;  %v3859_v49 = vmax.f32 %v3714_v40, %v503_v60  ;;  %v3862_v55 = vmax.f32 %v3720_v62, %v501_v61 }
 0x27f   : > { %v511_v56 = vmin.f32 %v507_v46, %v497_v51  ;;  %v510_v36 = vmin.f32 %v506_v6, %v496_v26  ;;  %v513_v48 = vmax.f32 %v507_v46, %v497_v51  ;;  %v512_v42 = vmax.f32 %v506_v6, %v496_v26  ;;  %5439 = vst [vmem:[#allocation52_spill] sm:$0xff] %v3859_v49 }
 0x280   : > { %v3804_v39 = vpop.permute.xlu1 %530  ;;  %v3818_v34 = vpop.permute.xlu0 %528  ;;  %5440 = vst [vmem:[#allocation53_spill] sm:$0xff] %v3862_v55 }
 0x281   : > { %5430 = vst [vmem:[#allocation19_spill] sm:$0xff] %v3804_v39  ;;  %5434 = vst [vmem:[#allocation57_spill] sm:$0xff] %v3818_v34  ;;  %v537_v11 = vmax.f32 %v3698_v58, %v3804_v39  ;;  %v536_v24 = vmax.f32 %v3702_v25, %v3818_v34  ;;  %v3864_v59 = vmax.f32 %v511_v56, %v485_v12 }
 0x282   : > { %v3866_v58 = vmax.f32 %v510_v36, %v484_v8  ;;  %v3870_v3 = vmax.f32 %v513_v48, %v481_v28  ;;  %v3872_v40 = vmax.f32 %v512_v42, %v480_v22  ;;  %v522_v60 = vmin.f32 %v512_v42, %v480_v22 }
 0x284   : > { %v543_v0 = vpop.permute.xlu1 %542  ;;  %v541_v5 = vpop.permute.xlu0 %540 }
 0x285   : > { %v547_v29 = vmin.f32 %v3722_v44, %v543_v0  ;;  %v546_v38 = vmin.f32 %v3728_v41, %v541_v5  ;;  %v549_v57 = vmax.f32 %v3722_v44, %v543_v0  ;;  %v548_v22 = vmax.f32 %v3728_v41, %v541_v5 }
 0x287   : > { %v551_v1 = vmin.f32 %v547_v29, %v537_v11  ;;  %v553_v46 = vmax.f32 %v547_v29, %v537_v11  ;;  %v550_v6 = vmin.f32 %v546_v38, %v536_v24  ;;  %v552_v51 = vmax.f32 %v546_v38, %v536_v24 }
 0x288   : > { %v559_v26 = vpop.permute.xlu1 %558  ;;  %v557_v34 = vpop.permute.xlu0 %556  ;;  %v523_v11 = vmin.f32 %v513_v48, %v481_v28  ;;  %v519_v48 = vmin.f32 %v511_v56, %v485_v12  ;;  %v5444_v28 = vld [vmem:[#allocation64_spill] sm:$0xff] }
 0x289   : > { %v563_v39 = vmin.f32 %v3730_v19, %v559_v26  ;;  %v565_v25 = vmax.f32 %v3730_v19, %v559_v26  ;;  %v562_v62 = vmin.f32 %v3752_v33, %v557_v34  ;;  %v564_v29 = vmax.f32 %v3752_v33, %v557_v34 }
 0x28a   : > { %v518_v33 = vmin.f32 %v510_v36, %v484_v8 }
 0x28b   : > { %v579_v61 = vmin.f32 %v575_v9, %v565_v25  ;;  %v581_v24 = vmax.f32 %v575_v9, %v565_v25  ;;  %v3876_v38 = vmin.f32 %v563_v39, %v551_v1  ;;  %v585_v43 = vmax.f32 %v563_v39, %v551_v1 }
 0x28c   : > { %v578_v14 = vmin.f32 %v574_v15, %v564_v29  ;;  %v580_v37 = vmax.f32 %v574_v15, %v564_v29  ;;  %v3878_v27 = vmin.f32 %v562_v62, %v550_v6  ;;  %v584_v19 = vmax.f32 %v562_v62, %v550_v6  ;;  %v913_v26 = vpop.permute.xlu1 %912  ;;  %v911_v35 = vpop.permute.xlu0 %910 }
 0x28d   : > { %5441 = vst [vmem:[#allocation61_spill] sm:$0xff] %v3876_v38  ;;  %v917_v30 = vmin.f32 %v5443_v31, %v913_v26  ;;  %v3882_v50 = vmin.f32 %v579_v61, %v553_v46  ;;  %v916_v42 = vmin.f32 %v5444_v28, %v911_v35  ;;  %v3892_v44 = vmin.f32 %v581_v24, %v549_v57 }
 0x28e   : > { %5442 = vst [vmem:[#allocation60_spill] sm:$0xff] %v3878_v27  ;;  %v3886_v25 = vmin.f32 %v578_v14, %v552_v51  ;;  %v3898_v41 = vmin.f32 %v580_v37, %v548_v22  ;;  %v919_v5 = vmax.f32 %v5443_v31, %v913_v26  ;;  %v589_v12 = vmax.f32 %v579_v61, %v553_v46 }
 0x28f   : > { %v921_v39 = vmin.f32 %v917_v30, %v907_v47  ;;  %v923_v34 = vmax.f32 %v917_v30, %v907_v47  ;;  %v3890_v15 = vmax.f32 %v3882_v50, %v3864_v59  ;;  %v920_v0 = vmin.f32 %v916_v42, %v906_v52 }
 0x290   : > { %v922_v9 = vmax.f32 %v916_v42, %v906_v52  ;;  %v929_v1 = vpop.permute.xlu1 %928  ;;  %v3896_v56 = vmax.f32 %v3886_v25, %v3866_v58  ;;  %v927_v30 = vpop.permute.xlu0 %926  ;;  %v3904_v47 = vmax.f32 %v3892_v44, %v3870_v3  ;;  %v918_v8 = vmax.f32 %v5444_v28, %v911_v35 }
 0x291   : > { %5445 = vst [vmem:[#allocation62_spill] sm:$0xff] %v3890_v15  ;;  %v933_v36 = vmin.f32 %v3754_v18, %v929_v1  ;;  %v932_v52 = vmin.f32 %v3756_v16, %v927_v30  ;;  %v3910_v6 = vmax.f32 %v3898_v41, %v3872_v40  ;;  %v588_v62 = vmax.f32 %v578_v14, %v552_v51 }
 0x292   : > { %5446 = vst [vmem:[#allocation14_spill] sm:$0xff] %v3896_v56  ;;  %5447 = vst [vmem:[#allocation27_spill] sm:$0xff] %v3904_v47  ;;  %v3916_v26 = vmax.f32 %v589_v12, %v523_v11  ;;  %v3918_v42 = vmax.f32 %v585_v43, %v519_v48  ;;  %v3928_v28 = vmax.f32 %v584_v19, %v518_v33 }
 0x293   : > { %5448 = vst [vmem:[#allocation58_spill] sm:$0xff] %v3910_v6  ;;  %v3912_v29 = vmin.f32 %v933_v36, %v921_v39  ;;  %v3914_v31 = vmax.f32 %v933_v36, %v921_v39  ;;  %v3920_v27 = vmin.f32 %v932_v52, %v920_v0  ;;  %v3922_v46 = vmax.f32 %v932_v52, %v920_v0 }
 0x294   : > { %5450 = vst [vmem:[#allocation59_spill] sm:$0xff] %v3916_v26  ;;  %5451 = vst [vmem:[#allocation26_spill] sm:$0xff] %v3918_v42  ;;  %v3924_v35 = vpop.permute.xlu1 %940  ;;  %v3926_v61 = vmax.f32 %v588_v62, %v522_v60  ;;  %v935_v14 = vmax.f32 %v3754_v18, %v929_v1  ;;  %v3933_v39 = vpop.permute.xlu0 %938  ;;  %v3935_v36 = vmax.f32 %v581_v24, %v549_v57  ;;  %v5471_v1 = vld [vmem:[#allocation49_spill] sm:$0xff] }
 0x295   : > { %5449 = vst [vmem:[#allocation29_spill] sm:$0xff] %v3914_v31  ;;  %5452 = vst [vmem:[#allocation15_spill] sm:$0xff] %v3922_v46  ;;  %v945_v51 = vmin.f32 %v3764_v21, %v3924_v35  ;;  %v3937_v42 = vmax.f32 %v580_v37, %v548_v22  ;;  %v934_v0 = vmax.f32 %v3756_v16, %v927_v30 }
 0x296   : > { %5453 = vst [vmem:[#allocation12_spill] sm:$0xff] %v3926_v61  ;;  %5454 = vst [vmem:[#allocation13_spill] sm:$0xff] %v3928_v28  ;;  %v944_v52 = vmin.f32 %v3766_v10, %v3933_v39  ;;  %v3942_v26 = vmin.f32 %v589_v12, %v523_v11  ;;  %v3944_v61 = vmin.f32 %v588_v62, %v522_v60 }
 0x297   : > { %5455 = vst [vmem:[#allocation63_spill] sm:$0xff] %v3935_v36  ;;  %5456 = vst [vmem:[#allocation64_spill] sm:$0xff] %v3937_v42  ;;  %v949_v28 = vmin.f32 %v945_v51, %v935_v14  ;;  %v951_v18 = vmax.f32 %v945_v51, %v935_v14  ;;  %v3950_v6 = vmin.f32 %v585_v43, %v519_v48  ;;  %v5465_v43 = vld [vmem:[#allocation43_spill] sm:$0xff] }
 0x298   : > { %5457 = vst [vmem:[#allocation67_spill] sm:$0xff] %v3942_v26  ;;  %5458 = vst [vmem:[#allocation68_spill] sm:$0xff] %v3944_v61  ;;  %v948_v24 = vmin.f32 %v944_v52, %v934_v0  ;;  %v950_v37 = vmax.f32 %v944_v52, %v934_v0  ;;  %v969_v22 = vpop.permute.xlu1 %968  ;;  %v3952_v16 = vmin.f32 %v584_v19, %v518_v33  ;;  %v967_v62 = vpop.permute.xlu0 %966  ;;  %v5466_v19 = vld [vmem:[#allocation44_spill] sm:$0xff]  ;;  %v5467_v33 = vld [vmem:[#allocation10_spill] sm:$0xff] }
 0x299   : > { %5459 = vst [vmem:[#allocation69_spill] sm:$0xff] %v3950_v6  ;;  %v3954_v30 = vmin.f32 %v949_v28, %v923_v34  ;;  %v3956_v11 = vmax.f32 %v949_v28, %v923_v34  ;;  %v3958_v60 = vmin.f32 %v951_v18, %v919_v5  ;;  %v3960_v12 = vmax.f32 %v951_v18, %v919_v5  ;;  %v5468_v28 = vld [vmem:[#allocation17_spill] sm:$0xff]  ;;  %v5478_v61 = vld [vmem:[#allocation36_spill] sm:$0xff] }
 0x29a   : > { %5460 = vst [vmem:[#allocation70_spill] sm:$0xff] %v3952_v16  ;;  %v3962_v14 = vmin.f32 %v948_v24, %v922_v9  ;;  %v3964_v51 = vmax.f32 %v948_v24, %v922_v9  ;;  %v3966_v57 = vmin.f32 %v950_v37, %v918_v8  ;;  %v3968_v0 = vmax.f32 %v950_v37, %v918_v8  ;;  %v5469_v9 = vld [vmem:[#allocation45_spill] sm:$0xff]  ;;  %v5470_v24 = vld [vmem:[#allocation42_spill] sm:$0xff] }
 0x29b   : > { %5461 = vst [vmem:[#allocation71_spill] sm:$0xff] %v3956_v11  ;;  %5462 = vst [vmem:[#allocation72_spill] sm:$0xff] %v3960_v12  ;;  %v1012_v48 = vmin.f32 %v5466_v19, %v5465_v43  ;;  %v3973_v52 = vmin.f32 %v5467_v33, %v969_v22  ;;  %v3976_v34 = vmin.f32 %v3770_v54, %v967_v62 }
 0x29c   : > { %5463 = vst [vmem:[#allocation73_spill] sm:$0xff] %v3964_v51  ;;  %5464 = vst [vmem:[#allocation74_spill] sm:$0xff] %v3968_v0  ;;  %v3980_v5 = vmin.f32 %v3768_v45, %v3780_v23  ;;  %v1013_v18 = vmin.f32 %v5469_v9, %v5468_v28  ;;  %v3986_v8 = vmax.f32 %v5471_v1, %v5470_v24  ;;  %v981_v37 = vpop.permute.xlu1 %980  ;;  %v979_v9 = vpop.permute.xlu0 %978 }
 0x29d   : > { %v3990_v43 = vmin.f32 %v3935_v36, %v3859_v49  ;;  %v3994_v19 = vmin.f32 %v3937_v42, %v3862_v55  ;;  %v975_v24 = vmax.f32 %v5467_v33, %v969_v22  ;;  %v985_v16 = vmin.f32 %v3774_v63, %v981_v37 }
 0x29e   : > { %v4010_v45 = vmin.f32 %v3892_v44, %v3870_v3  ;;  %v4014_v23 = vmin.f32 %v3898_v41, %v3872_v40  ;;  %v4018_v28 = vmin.f32 %v3882_v50, %v3864_v59  ;;  %v4022_v22 = vmin.f32 %v3886_v25, %v3866_v58  ;;  %v5479_v3 = vld [vmem:[#allocation28_spill] sm:$0xff]  ;;  %v5481_v40 = vld [vmem:[#allocation46_spill] sm:$0xff] }
 0x29f   : > { %5472 = vst [vmem:[#allocation43_spill] sm:$0xff] %v3990_v43  ;;  %5473 = vst [vmem:[#allocation44_spill] sm:$0xff] %v3994_v19  ;;  %v974_v43 = vmax.f32 %v3770_v54, %v967_v62  ;;  %v984_v19 = vmin.f32 %v3782_v13, %v979_v9  ;;  %v989_v54 = vmin.f32 %v985_v16, %v975_v24 }
 0x2a0   : > { %5474 = vst [vmem:[#allocation10_spill] sm:$0xff] %v4010_v45  ;;  %5475 = vst [vmem:[#allocation17_spill] sm:$0xff] %v4014_v23  ;;  %v991_v62 = vmax.f32 %v985_v16, %v975_v24  ;;  %v997_v6 = vpop.permute.xlu1 %996  ;;  %v4026_v44 = vmax.f32 %v5479_v3, %v5478_v61  ;;  %v5480_v45 = vld [vmem:[#allocation41_spill] sm:$0xff]  ;;  %v995_v50 = vpop.permute.xlu0 %994  ;;  %v987_v58 = vmax.f32 %v3774_v63, %v981_v37  ;;  %v5483_v16 = vld [vmem:[#allocation66_spill] sm:$0xff] }
 0x2a1   : > { %5476 = vst [vmem:[#allocation45_spill] sm:$0xff] %v4018_v28  ;;  %5477 = vst [vmem:[#allocation42_spill] sm:$0xff] %v4022_v22  ;;  %v988_v33 = vmin.f32 %v984_v19, %v974_v43  ;;  %v990_v1 = vmax.f32 %v984_v19, %v974_v43  ;;  %v1725_v41 = vmax.f32 %v5481_v40, %v5480_v45  ;;  %v5482_v23 = vld [vmem:[#allocation65_spill] sm:$0xff] }
 0x2a2   : > { %v1001_v26 = vmin.f32 %v5482_v23, %v997_v6  ;;  %v1003_v59 = vmax.f32 %v5482_v23, %v997_v6  ;;  %v986_v25 = vmax.f32 %v3782_v13, %v979_v9  ;;  %v1000_v24 = vmin.f32 %v5483_v16, %v995_v50 }
 0x2a3   : > { %v1002_v43 = vmax.f32 %v5483_v16, %v995_v50 }
 0x2a4   : > { %v1017_v19 = vmin.f32 %v1013_v18, %v1003_v59  ;;  %v1019_v22 = vmax.f32 %v1013_v18, %v1003_v59  ;;  %v4036_v61 = vmin.f32 %v1001_v26, %v989_v54  ;;  %v4038_v3 = vmax.f32 %v1001_v26, %v989_v54  ;;  %v1729_v23 = vpop.permute.xlu1 %1728  ;;  %v1731_v18 = vpop.permute.xlu0 %1730  ;;  %v5489_v26 = vld [vmem:[#allocation35_spill] sm:$0xff]  ;;  %v5492_v54 = vld [vmem:[#allocation22_spill] sm:$0xff] }
 0x2a5   : > { %v1016_v45 = vmin.f32 %v1012_v48, %v1002_v43  ;;  %v1018_v40 = vmax.f32 %v1012_v48, %v1002_v43  ;;  %v4040_v28 = vmin.f32 %v1000_v24, %v988_v33  ;;  %v4042_v6 = vmax.f32 %v1000_v24, %v988_v33 }
 0x2a6   : > { %5484 = vst [vmem:[#allocation49_spill] sm:$0xff] %v4036_v61  ;;  %v4044_v63 = vmin.f32 %v1017_v19, %v991_v62  ;;  %v4046_v13 = vmax.f32 %v1017_v19, %v991_v62  ;;  %v4048_v37 = vmin.f32 %v1019_v22, %v987_v58  ;;  %v4050_v9 = vmax.f32 %v1019_v22, %v987_v58 }
 0x2a7   : > { %5485 = vst [vmem:[#allocation36_spill] sm:$0xff] %v4040_v28  ;;  %v1039_v48 = vmax.f32 %v4036_v61, %v3914_v31  ;;  %v4060_v59 = vmin.f32 %v1016_v45, %v990_v1  ;;  %v4062_v62 = vmax.f32 %v1016_v45, %v990_v1  ;;  %v4064_v50 = vmin.f32 %v1018_v40, %v986_v25  ;;  %v5490_v1 = vld [vmem:[#allocation31_spill] sm:$0xff] }
 0x2a8   : > { %5486 = vst [vmem:[#allocation28_spill] sm:$0xff] %v4044_v63  ;;  %v4066_v22 = vmax.f32 %v1018_v40, %v986_v25  ;;  %v1038_v16 = vmax.f32 %v4040_v28, %v3922_v46  ;;  %v1745_v19 = vpop.permute.xlu1 %1744  ;;  %v4078_v45 = vmax.f32 %v5490_v1, %v5489_v26  ;;  %v5493_v25 = vld [vmem:[#allocation51_spill] sm:$0xff]  ;;  %v1734_v58 = vmin.f32 %v3792_v53, %v1729_v23  ;;  %v1747_v55 = vpop.permute.xlu0 %1746 }
 0x2a9   : > { %5487 = vst [vmem:[#allocation41_spill] sm:$0xff] %v4060_v59  ;;  %5488 = vst [vmem:[#allocation46_spill] sm:$0xff] %v4064_v50  ;;  %v4082_v40 = vmin.f32 %v5493_v25, %v5492_v54  ;;  %v1735_v33 = vmin.f32 %v3796_v20, %v1731_v18  ;;  %v4088_v24 = vmax.f32 %v3764_v21, %v3924_v35 }
 0x2aa   : > { %5491 = vst [vmem:[#allocation65_spill] sm:$0xff] %v4078_v45  ;;  %v1750_v43 = vmin.f32 %v3786_v17, %v1745_v19  ;;  %v1752_v42 = vmax.f32 %v3786_v17, %v1745_v19  ;;  %v1751_v26 = vmin.f32 %v3788_v32, %v1747_v55  ;;  %v1738_v1 = vmin.f32 %v1734_v58, %v3986_v8 }
 0x2ab   : > { %v1740_v49 = vmax.f32 %v1734_v58, %v3986_v8  ;;  %v1739_v36 = vmin.f32 %v1735_v33, %v1725_v41  ;;  %v1741_v47 = vmax.f32 %v1735_v33, %v1725_v41  ;;  %v1047_v38 = vmax.f32 %v4044_v63, %v3956_v11 }
 0x2ac   : > { %v1046_v56 = vmax.f32 %v4060_v59, %v3964_v51  ;;  %v1757_v21 = vpop.permute.xlu1 %1756  ;;  %v1055_v35 = vmax.f32 %v4048_v37, %v3960_v12  ;;  %v1054_v17 = vmax.f32 %v4064_v50, %v3968_v0  ;;  %v1770_v19 = vmin.f32 %v1750_v43, %v1738_v1  ;;  %v1759_v41 = vpop.permute.xlu0 %1758 }
 0x2ad   : > { %v4103_v15 = vmax.f32 %v1750_v43, %v1738_v1  ;;  %v1771_v25 = vmin.f32 %v1751_v26, %v1739_v36  ;;  %v4105_v8 = vmax.f32 %v1751_v26, %v1739_v36  ;;  %v1753_v33 = vmax.f32 %v3788_v32, %v1747_v55  ;;  %1076 = vrot.lane.b32.xlu1 %v1047_v38, %s2506_s18  ;;  %v5494_v55 = vld [vmem:[#allocation8_spill] sm:$0xff]  ;;  %v5495_v38 = vld [vmem:[#allocation23_spill] sm:$0xff] }
 0x2ae   : > { %1074 = vrot.lane.b32.xlu0 %v1046_v56, %s2506_s18  ;;  %v1762_v58 = vmin.f32 %v3798_v7, %v1757_v21  ;;  %v1763_v54 = vmin.f32 %v3806_v4, %v1759_v41  ;;  %v4114_v46 = vmax.f32 %v3766_v10, %v3933_v39  ;;  %v4124_v56 = vmin.f32 %v5495_v38, %v5494_v55 }
 0x2af   : > { %v1736_v26 = vmax.f32 %v3792_v53, %v1729_v23  ;;  %v1737_v32 = vmax.f32 %v3796_v20, %v1731_v18  ;;  %v4134_v38 = vmax.f32 %v3798_v7, %v1757_v21  ;;  %v5496_v18 = vld [vmem:[#allocation34_spill] sm:$0xff] }
 0x2b0   : > { %v1766_v1 = vmin.f32 %v1762_v58, %v1752_v42  ;;  %v1767_v28 = vmin.f32 %v1763_v54, %v1753_v33  ;;  %v1785_v31 = vpop.permute.xlu1 %1784  ;;  %v1768_v10 = vmax.f32 %v1762_v58, %v1752_v42  ;;  %v1787_v61 = vpop.permute.xlu0 %1786  ;;  %v4138_v42 = vmax.f32 %v3806_v4, %v1759_v41 }
 0x2b1   : > { %v1790_v39 = vmin.f32 %v3790_v2, %v1785_v31  ;;  %1092 = vrot.lane.b32.xlu1 %v1039_v48, %s2506_s18  ;;  %v1769_v23 = vmax.f32 %v1763_v54, %v1753_v33  ;;  %v1792_v36 = vmax.f32 %v3790_v2, %v1785_v31  ;;  %v5498_v31 = vld [vmem:[#allocation39_spill] sm:$0xff] }
 0x2b2   : > { %v1774_v55 = vmin.f32 %v1766_v1, %v1740_v49  ;;  %v1776_v53 = vmax.f32 %v1766_v1, %v1740_v49  ;;  %v4140_v58 = vmin.f32 %v1767_v28, %v1741_v47  ;;  %v4142_v45 = vmax.f32 %v1767_v28, %v1741_v47  ;;  %1090 = vrot.lane.b32.xlu0 %v1038_v16, %s2506_s18  ;;  %v5497_v1 = vld [vmem:[#allocation37_spill] sm:$0xff]  ;;  %v5499_v47 = vld [vmem:[#allocation54_spill] sm:$0xff] }
 0x2b3   : > { %v4146_v20 = vmin.f32 %v1790_v39, %v1770_v19  ;;  %v4148_v7 = vmax.f32 %v1790_v39, %v1770_v19  ;;  %v1791_v49 = vmin.f32 %v5496_v18, %v1787_v61  ;;  %v1778_v48 = vmin.f32 %v1768_v10, %v1736_v26 }
 0x2b4   : > { %v1797_v21 = vpop.permute.xlu1 %1796  ;;  %v1799_v41 = vpop.permute.xlu0 %1798  ;;  %v1780_v28 = vmax.f32 %v1768_v10, %v1736_v26  ;;  %v4162_v33 = vmin.f32 %v1769_v23, %v1737_v32  ;;  %v4164_v39 = vmax.f32 %v1769_v23, %v1737_v32  ;;  %v1793_v10 = vmax.f32 %v5496_v18, %v1787_v61 }
 0x2b5   : > { %v1802_v4 = vmin.f32 %v5497_v1, %v1797_v21  ;;  %v4156_v16 = vmin.f32 %v1791_v49, %v1771_v25  ;;  %v4158_v2 = vmax.f32 %v1791_v49, %v1771_v25  ;;  %1104 = vrot.lane.b32.xlu1 %v1055_v35, %s2506_s18  ;;  %v1803_v19 = vmin.f32 %v5498_v31, %v1799_v41 }
 0x2b6   : > { %1102 = vrot.lane.b32.xlu0 %v1054_v17, %s2506_s18  ;;  %v1804_v25 = vmax.f32 %v5497_v1, %v1797_v21  ;;  %v5500_v18 = vmax.f32 %v3973_v52, %v3912_v29  ;;  %v5501_v32 = vmax.f32 %v3976_v34, %v3920_v27  ;;  %v1805_v26 = vmax.f32 %v5498_v31, %v1799_v41 }
 0x2b7   : > { %v1806_v23 = vmin.f32 %v1802_v4, %v1792_v36  ;;  %v1808_v12 = vmax.f32 %v1802_v4, %v1792_v36  ;;  %v1807_v61 = vmin.f32 %v1803_v19, %v1793_v10  ;;  %v1809_v35 = vmax.f32 %v1803_v19, %v1793_v10 }
 0x2b8   : > { %v1813_v49 = vpop.permute.xlu1 %1812  ;;  %v1815_v54 = vpop.permute.xlu0 %1814 }
 0x2b9   : > { %v1818_v17 = vmin.f32 %v5499_v47, %v1813_v49  ;;  %v1820_v43 = vmax.f32 %v5499_v47, %v1813_v49  ;;  %1132 = vrot.lane.b32.xlu1 %v5500_v18, %s2506_s18  ;;  %v1819_v21 = vmin.f32 %v3980_v5, %v1815_v54  ;;  %v1821_v1 = vmax.f32 %v3980_v5, %v1815_v54 }
 0x2ba   : > { %1130 = vrot.lane.b32.xlu0 %v5501_v32, %s2506_s18 }
 0x2bb   : > { %v1834_v47 = vmin.f32 %v4082_v40, %v1820_v43  ;;  %v1836_v49 = vmax.f32 %v4082_v40, %v1820_v43  ;;  %v1838_v36 = vmin.f32 %v1818_v17, %v1806_v23  ;;  %v1840_v4 = vmax.f32 %v1818_v17, %v1806_v23 }
 0x2bc   : > { %v1835_v18 = vmin.f32 %v4124_v56, %v1821_v1  ;;  %v1837_v51 = vmax.f32 %v4124_v56, %v1821_v1  ;;  %v1839_v11 = vmin.f32 %v1819_v21, %v1807_v61  ;;  %v5502_v40 = vmax.f32 %v4046_v13, %v3958_v60 }
 0x2bd   : > { %v1842_v59 = vmin.f32 %v1834_v47, %v1808_v12  ;;  %v1844_v5 = vmax.f32 %v1834_v47, %v1808_v12  ;;  %v1846_v54 = vmin.f32 %v1836_v49, %v1804_v25  ;;  %v1854_v63 = vmin.f32 %v1838_v36, %v4103_v15 }
 0x2be   : > { %v1856_v32 = vmax.f32 %v1838_v36, %v4103_v15  ;;  %v1858_v0 = vmin.f32 %v1840_v4, %v1774_v55  ;;  %v1860_v50 = vmax.f32 %v1840_v4, %v1774_v55  ;;  %1144 = vrot.lane.b32.xlu1 %v5502_v40, %s2506_s18  ;;  %v5503_v12 = vmax.f32 %v4062_v62, %v3966_v57 }
 0x2bf   : > { %v1862_v43 = vmin.f32 %v1842_v59, %v1776_v53  ;;  %v1864_v41 = vmax.f32 %v1842_v59, %v1776_v53  ;;  %v1866_v31 = vmin.f32 %v1844_v5, %v1778_v48  ;;  %v1868_v19 = vmax.f32 %v1844_v5, %v1778_v48 }
 0x2c0   : > { %1142 = vrot.lane.b32.xlu0 %v5503_v12, %s2506_s18  ;;  %v1848_v56 = vmax.f32 %v1836_v49, %v1804_v25  ;;  %v1870_v10 = vmin.f32 %v1846_v54, %v1780_v28  ;;  %v1872_v23 = vmax.f32 %v1846_v54, %v1780_v28  ;;  %v1841_v15 = vmax.f32 %v1819_v21, %v1807_v61 }
 0x2c1   : > { %v1888_v55 = vmin.f32 %v1864_v41, %v4026_v44  ;;  %v1890_v17 = vmax.f32 %v1864_v41, %v4026_v44  ;;  %v4208_v1 = vmin.f32 %v1860_v50, %v1868_v19  ;;  %v4210_v47 = vmax.f32 %v1860_v50, %v1868_v19 }
 0x2c2   : > { %v1920_v59 = vmin.f32 %v1858_v0, %v1866_v31  ;;  %v1922_v53 = vmax.f32 %v1858_v0, %v1866_v31  ;;  %v1924_v48 = vmin.f32 %v1862_v43, %v1870_v10  ;;  %v4212_v36 = vmax.f32 %v1862_v43, %v1870_v10 }
 0x2c3   : > { %v5504_v25 = vmax.f32 %v4038_v3, %v3954_v30  ;;  %v1892_v28 = vmin.f32 %v1856_v32, %v1888_v55  ;;  %v4218_v61 = vmax.f32 %v1856_v32, %v1888_v55  ;;  %v4220_v21 = vmin.f32 %v1872_v23, %v1890_v17 }
 0x2c4   : > { %v4222_v44 = vmax.f32 %v1872_v23, %v1890_v17  ;;  %v5505_v50 = vmax.f32 %v4042_v6, %v3962_v14  ;;  %v4228_v0 = vmin.f32 %v1854_v63, %v1920_v59  ;;  %v4230_v49 = vmax.f32 %v1854_v63, %v1920_v59 }
 0x2c5   : > { %1160 = vrot.lane.b32.xlu1 %v5504_v25, %s2506_s18  ;;  %v1843_v4 = vmin.f32 %v1835_v18, %v1809_v35  ;;  %v1845_v5 = vmax.f32 %v1835_v18, %v1809_v35  ;;  %v1847_v54 = vmin.f32 %v1837_v51, %v1805_v26  ;;  %v1849_v40 = vmax.f32 %v1837_v51, %v1805_v26  ;;  %v5508_v18 = vld [vmem:[#allocation65_spill] sm:$0xff] }
 0x2c6   : > { %1158 = vrot.lane.b32.xlu0 %v5505_v50, %s2506_s18  ;;  %v1855_v32 = vmin.f32 %v1839_v11, %v4105_v8  ;;  %v1857_v43 = vmax.f32 %v1839_v11, %v4105_v8  ;;  %v1859_v41 = vmin.f32 %v1841_v15, %v4140_v58  ;;  %v1861_v31 = vmax.f32 %v1841_v15, %v4140_v58 }
 0x2c7   : > { %v1863_v19 = vmin.f32 %v1843_v4, %v4142_v45  ;;  %v1865_v12 = vmax.f32 %v1843_v4, %v4142_v45  ;;  %v5506_v63 = vmax.f32 %v4050_v9, %v4088_v24  ;;  %v4243_v35 = vmax.f32 %v1848_v56, %v4134_v38 }
 0x2c8   : > { %v1867_v51 = vmin.f32 %v1845_v5, %v4162_v33  ;;  %v1869_v11 = vmax.f32 %v1845_v5, %v4162_v33  ;;  %v1871_v8 = vmin.f32 %v1847_v54, %v4164_v39  ;;  %v5507_v58 = vmax.f32 %v4066_v22, %v4114_v46 }
 0x2c9   : > { %1172 = vrot.lane.b32.xlu1 %v5506_v63, %s2506_s18  ;;  %v1873_v45 = vmax.f32 %v1847_v54, %v4164_v39  ;;  %v4254_v26 = vmax.f32 %v1849_v40, %v4138_v42  ;;  %v1889_v10 = vmin.f32 %v1865_v12, %v5508_v18  ;;  %v1891_v23 = vmax.f32 %v1865_v12, %v5508_v18 }
 0x2ca   : > { %1170 = vrot.lane.b32.xlu0 %v5507_v58, %s2506_s18  ;;  %v1901_v15 = vmin.f32 %v1861_v31, %v1869_v11  ;;  %v1903_v55 = vmax.f32 %v1861_v31, %v1869_v11  ;;  %v1921_v17 = vmin.f32 %v1859_v41, %v1867_v51  ;;  %v1923_v33 = vmax.f32 %v1859_v41, %v1867_v51 }
 0x2cb   : > { %v1893_v59 = vmin.f32 %v1857_v43, %v1889_v10  ;;  %v1895_v25 = vmax.f32 %v1857_v43, %v1889_v10  ;;  %v1897_v50 = vmin.f32 %v1873_v45, %v1891_v23  ;;  %v4258_v4 = vmax.f32 %v1873_v45, %v1891_v23 }
 0x2cc   : > { %v5509_v39 = vmin.f32 %v3973_v52, %v3912_v29  ;;  %v1925_v5 = vmin.f32 %v1863_v19, %v1871_v8  ;;  %v1927_v54 = vmax.f32 %v1863_v19, %v1871_v8  ;;  %v4264_v63 = vmin.f32 %v1855_v32, %v1921_v17 }
 0x2cd   : > { %v4266_v58 = vmax.f32 %v1855_v32, %v1921_v17  ;;  %v5510_v41 = vmin.f32 %v3976_v34, %v3920_v27  ;;  %v4274_v43 = vmax.f32 %v4243_v35, %v4222_v44  ;;  %v4278_v31 = vmax.f32 %v4254_v26, %v4258_v4 }
 0x2ce   : > { %1226 = vrot.lane.b32.xlu1 %v5509_v39, %s2506_s18  ;;  %v5511_v29 = vmin.f32 %v4046_v13, %v3958_v60  ;;  %v4286_v52 = vmax.f32 %v4208_v1, %v4218_v61  ;;  %v4288_v32 = vmin.f32 %v1924_v48, %v1922_v53  ;;  %v1874_v27 = vmin.f32 %v1848_v56, %v4134_v38 }
 0x2cf   : > { %1224 = vrot.lane.b32.xlu0 %v5510_v41, %s2506_s18  ;;  %v1875_v34 = vmin.f32 %v1849_v40, %v4138_v42  ;;  %v5512_v19 = vmin.f32 %v4062_v62, %v3966_v57  ;;  %v4296_v12 = vmax.f32 %v1901_v15, %v1895_v25  ;;  %v4298_v51 = vmin.f32 %v1925_v5, %v1923_v33 }
 0x2d0   : > { %v1954_v60 = vmax.f32 %v4288_v32, %v4286_v52  ;;  %v4303_v13 = vmax.f32 %v4148_v7, %v1892_v28  ;;  %v4306_v11 = vmax.f32 %v4158_v2, %v1893_v59  ;;  %v4309_v38 = vmin.f32 %v4148_v7, %v1892_v28 }
 0x2d1   : > { %v1955_v57 = vmax.f32 %v4298_v51, %v4296_v12  ;;  %v4314_v62 = vmin.f32 %v4158_v2, %v1893_v59  ;;  %v4318_v42 = vmin.f32 %v4210_v47, %v4220_v21  ;;  %v4320_v56 = vmax.f32 %v1924_v48, %v1922_v53 }
 0x2d2   : > { %1238 = vrot.lane.b32.xlu1 %v5511_v29, %s2506_s18  ;;  %v5513_v40 = vmin.f32 %v4038_v3, %v3954_v30  ;;  %v1946_v7 = vmax.f32 %v4228_v0, %v4303_v13  ;;  %v1947_v28 = vmax.f32 %v4264_v63, %v4306_v11  ;;  %v1942_v2 = vmax.f32 %v4146_v20, %v4309_v38 }
 0x2d3   : > { %1236 = vrot.lane.b32.xlu0 %v5512_v19, %s2506_s18  ;;  %v1913_v8 = vmin.f32 %v1903_v55, %v1897_v50  ;;  %v5514_v53 = vmin.f32 %v4042_v6, %v3962_v14  ;;  %v1943_v48 = vmax.f32 %v4156_v16, %v4314_v62  ;;  %v1958_v30 = vmax.f32 %v4320_v56, %v4318_v42 }
 0x2d4   : > { %v1935_v3 = vmax.f32 %v1925_v5, %v1923_v33  ;;  %v1908_v45 = vmin.f32 %v4208_v1, %v4218_v61  ;;  %v1909_v18 = vmin.f32 %v1901_v15, %v1895_v25  ;;  %v1940_v10 = vmin.f32 %v4146_v20, %v4309_v38  ;;  %v5526_v38 = vld [vmem:[#allocation74_spill] sm:$0xff] }
 0x2d5   : > { %v1941_v23 = vmin.f32 %v4156_v16, %v4314_v62  ;;  %v1956_v14 = vmin.f32 %v4320_v56, %v4318_v42  ;;  %v5515_v1 = vmin.f32 %v4050_v9, %v4088_v24  ;;  %v1944_v16 = vmin.f32 %v4228_v0, %v4303_v13  ;;  %v5530_v62 = vld [vmem:[#allocation28_spill] sm:$0xff]  ;;  %v5531_v42 = vld [vmem:[#allocation71_spill] sm:$0xff] }
 0x2d6   : > { %1254 = vrot.lane.b32.xlu1 %v5513_v40, %s2506_s18  ;;  %v1959_v6 = vmax.f32 %v1935_v3, %v1913_v8  ;;  %v1950_v17 = vmax.f32 %v4230_v49, %v1908_v45  ;;  %v1957_v59 = vmin.f32 %v1935_v3, %v1913_v8  ;;  %v1948_v39 = vmin.f32 %v4230_v49, %v1908_v45  ;;  %v5533_v40 = vld [vmem:[#allocation22_spill] sm:$0xff]  ;;  %v5534_v8 = vld [vmem:[#allocation51_spill] sm:$0xff]  ;;  %v5536_v3 = vld [vmem:[#allocation73_spill] sm:$0xff] }
 0x2d7   : > { %1252 = vrot.lane.b32.xlu0 %v5514_v53, %s2506_s18  ;;  %v1951_v61 = vmax.f32 %v4266_v58, %v1909_v18  ;;  %v1949_v20 = vmin.f32 %v4266_v58, %v1909_v18  ;;  %v1945_v15 = vmin.f32 %v4264_v63, %v4306_v11  ;;  %v5516_v33 = vmin.f32 %v4066_v22, %v4114_v46  ;;  %v5525_v11 = vld [vmem:[#allocation46_spill] sm:$0xff] }
 0x2d8   : > { %v1914_v49 = vmax.f32 %v4210_v47, %v4220_v21  ;;  %v1936_v9 = vmin.f32 %v4212_v36, %v1874_v27  ;;  %v1915_v24 = vmax.f32 %v1903_v55, %v1897_v50  ;;  %v1937_v25 = vmin.f32 %v1927_v54, %v1875_v34  ;;  %v5517_v55 = vld [vmem:[#allocation49_spill] sm:$0xff] }
 0x2d9   : > { %v1952_v5 = vmin.f32 %v4288_v32, %v4286_v52  ;;  %v1953_v0 = vmin.f32 %v4298_v51, %v4296_v12  ;;  %v4373_v63 = vmin.f32 %v4243_v35, %v4222_v44  ;;  %v4376_v46 = vmax.f32 %v4212_v36, %v1874_v27  ;;  %v5518_v50 = vld [vmem:[#allocation29_spill] sm:$0xff]  ;;  %v5520_v35 = vld [vmem:[#allocation36_spill] sm:$0xff]  ;;  %v5521_v32 = vld [vmem:[#allocation15_spill] sm:$0xff] }
 0x2da   : > { %1266 = vrot.lane.b32.xlu1 %v5515_v1, %s2506_s18  ;;  %v1960_v22 = vmin.f32 %v1936_v9, %v1914_v49  ;;  %v1961_v58 = vmin.f32 %v1937_v25, %v1915_v24  ;;  %v1962_v47 = vmax.f32 %v1936_v9, %v1914_v49  ;;  %v1963_v21 = vmax.f32 %v1937_v25, %v1915_v24  ;;  %v5523_v51 = vld [vmem:[#allocation72_spill] sm:$0xff]  ;;  %v5547_v49 = vld [vmem:[#allocation33_spill] sm:$0xff]  ;;  %v5548_v24 = vld [vmem:[#allocation38_spill] sm:$0xff] }
 0x2db   : > { %1264 = vrot.lane.b32.xlu0 %v5516_v33, %s2506_s18  ;;  %v5519_v41 = vmin.f32 %v5517_v55, %v5518_v50  ;;  %v1966_v29 = vmax.f32 %v4376_v46, %v4373_v63  ;;  %v1917_v52 = vmin.f32 %v4254_v26, %v4258_v4  ;;  %v1939_v44 = vmax.f32 %v1927_v54, %v1875_v34  ;;  %v5528_v4 = vld [vmem:[#allocation8_spill] sm:$0xff]  ;;  %v5529_v54 = vld [vmem:[#allocation23_spill] sm:$0xff]  ;;  %v5550_v55 = vld [vmem:[#allocation62_spill] sm:$0xff] }
 0x2dc   : > { %v1964_v36 = vmin.f32 %v4376_v46, %v4373_v63  ;;  %v5522_v27 = vmin.f32 %v5520_v35, %v5521_v32  ;;  %v5524_v13 = vmin.f32 %v4048_v37, %v5523_v51  ;;  %v5527_v26 = vmin.f32 %v5525_v11, %v5526_v38  ;;  %v5535_v37 = vld [vmem:[#allocation41_spill] sm:$0xff]  ;;  %v5546_v33 = vld [vmem:[#allocation24_spill] sm:$0xff] }
 0x2dd   : > { %v1967_v19 = vmax.f32 %v1939_v44, %v1917_v52  ;;  %v1965_v12 = vmin.f32 %v1939_v44, %v1917_v52  ;;  %v1833_v34 = vmax.f32 %v5529_v54, %v5528_v4  ;;  %v5532_v56 = vmin.f32 %v5530_v62, %v5531_v42  ;;  %v5549_v25 = vld [vmem:[#allocation40_spill] sm:$0xff]  ;;  %v5552_v35 = vld [vmem:[#allocation61_spill] sm:$0xff]  ;;  %v5554_v42 = vld [vmem:[#allocation19_spill] sm:$0xff] }
 0x2de   : > { %1294 = vrot.lane.b32.xlu1 %v5519_v41, %s2506_s18  ;;  %v4408_v53 = vmax.f32 %v5534_v8, %v5533_v40  ;;  %v5537_v45 = vmin.f32 %v5535_v37, %v5536_v3  ;;  %v494_v9 = vmin.f32 %v5547_v49, %v5546_v33  ;;  %v5553_v51 = vld [vmem:[#allocation60_spill] sm:$0xff]  ;;  %v5556_v8 = vld [vmem:[#allocation57_spill] sm:$0xff] }
 0x2df   : > { %1292 = vrot.lane.b32.xlu0 %v5522_v27, %s2506_s18  ;;  %v1971_v18 = vmax.f32 %v1833_v34, %v4278_v31 }
 0x2e0   : > { %v1970_v1 = vmax.f32 %v4408_v53, %v4274_v43 }
 0x2e2   : > { %1306 = vrot.lane.b32.xlu1 %v5524_v13, %s2506_s18 }
 0x2e3   : > { %1304 = vrot.lane.b32.xlu0 %v5527_v26, %s2506_s18 }
 0x2e6   : > { %1322 = vrot.lane.b32.xlu1 %v5532_v56, %s2506_s18  ;;  %v5555_v56 = vld [vmem:[#allocation9_spill] sm:$0xff] }
 0x2e7   : > { %1320 = vrot.lane.b32.xlu0 %v5537_v45, %s2506_s18  ;;  %v4498_v40 = vmin.f32 %v5555_v56, %v5554_v42 }
 0x2ea   : > { %1986 = vrot.lane.b32.xlu1 %v1971_v18, %s2508_s2 }
 0x2eb   : > { %1984 = vrot.lane.b32.xlu0 %v1970_v1, %s2508_s2  ;;  %v5558_v1 = vld [vmem:[#allocation27_spill] sm:$0xff] }
 0x2ee   : > { %1998 = vrot.lane.b32.xlu1 %v1955_v57, %s2508_s2  ;;  %v4441_v57 = vpop.permute.xlu1 %1064 }
 0x2ef   : > { %1996 = vrot.lane.b32.xlu0 %v1954_v60, %s2508_s2  ;;  %v4439_v60 = vpop.permute.xlu0 %1062 }
 0x2f2   : > { %2012 = vrot.lane.b32.xlu1 %v1947_v28, %s2508_s2  ;;  %v4449_v28 = vpop.permute.xlu1 %1334 }
 0x2f3   : > { %2010 = vrot.lane.b32.xlu0 %v1946_v7, %s2508_s2  ;;  %v4447_v7 = vpop.permute.xlu0 %1332 }
 0x2f6   : > { %2038 = vrot.lane.b32.xlu1 %v1943_v48, %s2508_s2  ;;  %v5539_v48 = vld [vmem:[#allocation25_spill] sm:$0xff] }
 0x2f7   : > { %2036 = vrot.lane.b32.xlu0 %v1942_v2, %s2508_s2  ;;  %v5538_v2 = vld [vmem:[#allocation21_spill] sm:$0xff] }
 0x2fa   : > { %2050 = vrot.lane.b32.xlu1 %v1959_v6, %s2508_s2  ;;  %v5541_v6 = vld [vmem:[#allocation55_spill] sm:$0xff] }
 0x2fb   : > { %2048 = vrot.lane.b32.xlu0 %v1958_v30, %s2508_s2  ;;  %v495_v30 = vmin.f32 %v5539_v48, %v5538_v2 }
 0x2fe   : > { %2064 = vrot.lane.b32.xlu1 %v1951_v61, %s2508_s2 }
 0x2ff   : > { %2062 = vrot.lane.b32.xlu0 %v1950_v17, %s2508_s2 }
 0x302   : > { %2092 = vrot.lane.b32.xlu1 %v1941_v23, %s2508_s2  ;;  %v4457_v23 = vpop.permute.xlu0 %1974 }
 0x303   : > { %2090 = vrot.lane.b32.xlu0 %v1940_v10, %s2508_s2  ;;  %v4455_v10 = vpop.permute.xlu1 %1976 }
 0x306   : > { %2104 = vrot.lane.b32.xlu1 %v1957_v59, %s2508_s2  ;;  %v5542_v59 = vld [vmem:[#allocation30_spill] sm:$0xff] }
 0x307   : > { %2102 = vrot.lane.b32.xlu0 %v1956_v14, %s2508_s2  ;;  %v5540_v14 = vld [vmem:[#allocation56_spill] sm:$0xff] }
 0x308   : > { %v483_v17 = vmin.f32 %v5541_v6, %v5540_v14 }
 0x30a   : > { %2118 = vrot.lane.b32.xlu1 %v1949_v20, %s2508_s2  ;;  %v5544_v20 = vld [vmem:[#allocation16_spill] sm:$0xff]  ;;  %v4508_v6 = vmin.f32 %v495_v30, %v483_v17 }
 0x30b   : > { %2116 = vrot.lane.b32.xlu0 %v1948_v39, %s2508_s2  ;;  %v5543_v39 = vld [vmem:[#allocation20_spill] sm:$0xff] }
 0x30c   : > { %v4463_v61 = vmin.f32 %v5543_v39, %v5542_v59  ;;  %v5560_v39 = vld [vmem:[#allocation58_spill] sm:$0xff] }
 0x30e   : > { %2144 = vrot.lane.b32.xlu1 %v1945_v15, %s2508_s2  ;;  %v1070_v63 = vmax.f32 %v4463_v61, %v4439_v60 }
 0x30f   : > { %2142 = vrot.lane.b32.xlu0 %v1944_v16, %s2508_s2  ;;  %v5545_v16 = vld [vmem:[#allocation32_spill] sm:$0xff] }
 0x310   : > { %v4467_v15 = vmin.f32 %v5545_v16, %v5544_v20 }
 0x312   : > { %2156 = vrot.lane.b32.xlu1 %v1961_v58, %s2508_s2  ;;  %v1071_v46 = vmax.f32 %v4467_v15, %v4441_v57 }
 0x313   : > { %2154 = vrot.lane.b32.xlu0 %v1960_v22, %s2508_s2 }
 0x316   : > { %2170 = vrot.lane.b32.xlu1 %v1953_v0, %s2508_s2  ;;  %v4474_v0 = vmax.f32 %v495_v30, %v483_v17 }
 0x317   : > { %2168 = vrot.lane.b32.xlu0 %v1952_v5, %s2508_s2  ;;  %v482_v5 = vmin.f32 %v5549_v25, %v5548_v24 }
 0x318   : > { %v601_v32 = vmax.f32 %v5552_v35, %v4474_v0 }
 0x319   : > { %v4510_v59 = vmin.f32 %v494_v9, %v482_v5 }
 0x31a   : > { %2024 = vrot.lane.b32.xlu1 %v1963_v21, %s2508_s2  ;;  %v1969_v21 = vmin.f32 %v1833_v34, %v4278_v31 }
 0x31b   : > { %2022 = vrot.lane.b32.xlu0 %v1962_v47, %s2508_s2  ;;  %v1968_v47 = vmin.f32 %v4408_v53, %v4274_v43  ;;  %v5557_v53 = vld [vmem:[#allocation11_spill] sm:$0xff] }
 0x31c   : > { %v4502_v37 = vmin.f32 %v5557_v53, %v5556_v8 }
 0x31e   : > { %2076 = vrot.lane.b32.xlu1 %v1967_v19, %s2508_s2 }
 0x31f   : > { %2074 = vrot.lane.b32.xlu0 %v1966_v29, %s2508_s2  ;;  %v1077_v22 = vpop.permute.xlu1 %1076  ;;  %v5551_v29 = vld [vmem:[#allocation14_spill] sm:$0xff] }
 0x320   : > { %v1075_v58 = vpop.permute.xlu0 %1074  ;;  %v1081_v50 = vmin.f32 %v5550_v55, %v1077_v22  ;;  %v1083_v41 = vmax.f32 %v5550_v55, %v1077_v22  ;;  %v596_v22 = vmax.f32 %v4502_v37, %v4510_v59 }
 0x321   : > { %v1080_v52 = vmin.f32 %v5551_v29, %v1075_v58  ;;  %v1082_v44 = vmax.f32 %v5551_v29, %v1075_v58 }
 0x322   : > { %2130 = vrot.lane.b32.xlu1 %v1965_v12, %s2508_s2  ;;  %v1085_v27 = vmin.f32 %v1081_v50, %v1071_v46  ;;  %v1087_v19 = vmax.f32 %v1081_v50, %v1071_v46 }
 0x323   : > { %2128 = vrot.lane.b32.xlu0 %v1964_v36, %s2508_s2  ;;  %v4488_v36 = vmax.f32 %v494_v9, %v482_v5  ;;  %v1084_v43 = vmin.f32 %v1080_v52, %v1070_v63  ;;  %v1086_v12 = vmax.f32 %v1080_v52, %v1070_v63  ;;  %v1093_v31 = vpop.permute.xlu1 %1092  ;;  %v597_v63 = vmax.f32 %v4498_v40, %v4508_v6 }
 0x324   : > { %v1097_v11 = vmin.f32 %v601_v32, %v1093_v31  ;;  %v1099_v38 = vmax.f32 %v601_v32, %v1093_v31  ;;  %v1091_v26 = vpop.permute.xlu0 %1090 }
 0x325   : > { %v600_v13 = vmax.f32 %v5553_v51, %v4488_v36 }
 0x326   : > { %2182 = vrot.lane.b32.xlu1 %v1969_v21, %s2508_s2  ;;  %v1117_v34 = vmin.f32 %v1097_v11, %v1085_v27  ;;  %v1119_v62 = vmax.f32 %v1097_v11, %v1085_v27 }
 0x327   : > { %2180 = vrot.lane.b32.xlu0 %v1968_v47, %s2508_s2  ;;  %v1096_v4 = vmin.f32 %v600_v13, %v1091_v26  ;;  %v1098_v54 = vmax.f32 %v600_v13, %v1091_v26  ;;  %v1105_v18 = vpop.permute.xlu1 %1104 }
 0x328   : > { %v1109_v2 = vmin.f32 %v5558_v1, %v1105_v18  ;;  %v4506_v48 = vmax.f32 %v5558_v1, %v1105_v18  ;;  %v1103_v14 = vpop.permute.xlu0 %1102 }
 0x329   : > { %v1116_v3 = vmin.f32 %v1096_v4, %v1084_v43  ;;  %v1118_v45 = vmax.f32 %v1096_v4, %v1084_v43  ;;  %v1108_v20 = vmin.f32 %v5560_v39, %v1103_v14  ;;  %v4514_v16 = vmax.f32 %v5560_v39, %v1103_v14  ;;  %v5565_v14 = vld [vmem:[#allocation13_spill] sm:$0xff] }
 0x32a   : > { %5559 = vst [vmem:[#allocation66_spill] sm:$0xff] %v4506_v48  ;;  %v1113_v33 = vmin.f32 %v1109_v2, %v1099_v38  ;;  %v1115_v49 = vmax.f32 %v1109_v2, %v1099_v38 }
 0x32b   : > { %5561 = vst [vmem:[#allocation35_spill] sm:$0xff] %v4514_v16  ;;  %v1112_v24 = vmin.f32 %v1108_v20, %v1098_v54  ;;  %v1114_v25 = vmax.f32 %v1108_v20, %v1098_v54  ;;  %v1133_v46 = vpop.permute.xlu1 %1132 }
 0x32c   : > { %v1121_v30 = vmin.f32 %v1113_v33, %v1087_v19  ;;  %v4520_v17 = vmax.f32 %v1113_v33, %v1087_v19  ;;  %v4522_v9 = vmin.f32 %v1115_v49, %v1083_v41  ;;  %v4524_v5 = vmax.f32 %v1115_v49, %v1083_v41  ;;  %v1131_v58 = vpop.permute.xlu0 %1130 }
 0x32d   : > { %v1120_v47 = vmin.f32 %v1112_v24, %v1086_v12  ;;  %v4526_v21 = vmax.f32 %v1112_v24, %v1086_v12  ;;  %v4528_v55 = vmin.f32 %v1114_v25, %v1082_v44  ;;  %v4530_v50 = vmax.f32 %v1114_v25, %v1082_v44  ;;  %v5562_v12 = vld [vmem:[#allocation59_spill] sm:$0xff]  ;;  %v5563_v44 = vld [vmem:[#allocation12_spill] sm:$0xff] }
 0x32e   : > { %v1137_v29 = vmin.f32 %v597_v63, %v1133_v46  ;;  %v1139_v52 = vmax.f32 %v597_v63, %v1133_v46  ;;  %v1136_v32 = vmin.f32 %v596_v22, %v1131_v58  ;;  %v1138_v27 = vmax.f32 %v596_v22, %v1131_v58  ;;  %v5566_v46 = vld [vmem:[#allocation63_spill] sm:$0xff]  ;;  %v5567_v22 = vld [vmem:[#allocation52_spill] sm:$0xff] }
 0x32f   : > { %v5568_v58 = vmax.f32 %v5566_v46, %v5567_v22 }
 0x330   : > { %v1145_v43 = vpop.permute.xlu1 %1144  ;;  %v4532_v31 = vmin.f32 %v1137_v29, %v1117_v34  ;;  %v4534_v19 = vmax.f32 %v1137_v29, %v1117_v34  ;;  %v4536_v13 = vmin.f32 %v1136_v32, %v1116_v3  ;;  %v4538_v41 = vmax.f32 %v1136_v32, %v1116_v3  ;;  %v5564_v34 = vld [vmem:[#allocation26_spill] sm:$0xff] }
 0x331   : > { %v1149_v38 = vmin.f32 %v5562_v12, %v1145_v43  ;;  %v1151_v26 = vmax.f32 %v5562_v12, %v1145_v43  ;;  %v5572_v12 = vld [vmem:[#allocation53_spill] sm:$0xff] }
 0x332   : > { %v1143_v11 = vpop.permute.xlu0 %1142 }
 0x333   : > { %v1148_v4 = vmin.f32 %v5563_v44, %v1143_v11  ;;  %v1150_v54 = vmax.f32 %v5563_v44, %v1143_v11  ;;  %v1153_v42 = vmin.f32 %v1149_v38, %v1139_v52  ;;  %v1155_v56 = vmax.f32 %v1149_v38, %v1139_v52  ;;  %v5571_v11 = vld [vmem:[#allocation64_spill] sm:$0xff] }
 0x334   : > { %v5573_v38 = vmax.f32 %v5571_v11, %v5572_v12 }
 0x335   : > { %v1152_v8 = vmin.f32 %v1148_v4, %v1138_v27  ;;  %v1154_v53 = vmax.f32 %v1148_v4, %v1138_v27 }
 0x337   : > { %v1161_v18 = vpop.permute.xlu1 %1160 }
 0x338   : > { %v1165_v1 = vmin.f32 %v5564_v34, %v1161_v18  ;;  %v1167_v2 = vmax.f32 %v5564_v34, %v1161_v18  ;;  %v1159_v3 = vpop.permute.xlu0 %1158 }
 0x339   : > { %v1164_v39 = vmin.f32 %v5565_v14, %v1159_v3  ;;  %v1166_v20 = vmax.f32 %v5565_v14, %v1159_v3 }
 0x33a   : > { %v1183_v33 = vmin.f32 %v1165_v1, %v1153_v42  ;;  %v1185_v49 = vmax.f32 %v1165_v1, %v1153_v42 }
 0x33b   : > { %v1182_v24 = vmin.f32 %v1164_v39, %v1152_v8  ;;  %v1184_v25 = vmax.f32 %v1164_v39, %v1152_v8  ;;  %v1173_v63 = vpop.permute.xlu1 %1172 }
 0x33c   : > { %v1177_v29 = vmin.f32 %v5568_v58, %v1173_v63  ;;  %v1171_v52 = vpop.permute.xlu0 %1170  ;;  %v4551_v32 = vmax.f32 %v1183_v33, %v1119_v62  ;;  %v4553_v27 = vmin.f32 %v1185_v49, %v1121_v30  ;;  %v4555_v43 = vmin.f32 %v1183_v33, %v1119_v62 }
 0x33d   : > { %v1176_v44 = vmin.f32 %v5573_v38, %v1171_v52  ;;  %v4560_v4 = vmax.f32 %v1182_v24, %v1118_v45  ;;  %v4562_v42 = vmin.f32 %v1184_v25, %v1120_v47  ;;  %v4564_v8 = vmin.f32 %v1182_v24, %v1118_v45 }
 0x33e   : > { %5569 = vst [vmem:[#allocation31_spill] sm:$0xff] %v4551_v32  ;;  %5570 = vst [vmem:[#allocation34_spill] sm:$0xff] %v4555_v43  ;;  %v1179_v18 = vmin.f32 %v1177_v29, %v1167_v2  ;;  %v1181_v34 = vmax.f32 %v1177_v29, %v1167_v2  ;;  %v4566_v1 = vmax.f32 %v1185_v49, %v1121_v30 }
 0x33f   : > { %5574 = vst [vmem:[#allocation37_spill] sm:$0xff] %v4560_v4  ;;  %5575 = vst [vmem:[#allocation39_spill] sm:$0xff] %v4562_v42  ;;  %v4568_v3 = vmax.f32 %v1184_v25, %v1120_v47  ;;  %v1178_v14 = vmin.f32 %v1176_v44, %v1166_v20  ;;  %v1180_v39 = vmax.f32 %v1176_v44, %v1166_v20  ;;  %v5586_v44 = vld [vmem:[#allocation68_spill] sm:$0xff] }
 0x340   : > { %5576 = vst [vmem:[#allocation54_spill] sm:$0xff] %v4564_v8  ;;  %5577 = vst [vmem:[#allocation65_spill] sm:$0xff] %v4566_v1  ;;  %v595_v62 = vmin.f32 %v4498_v40, %v4508_v6  ;;  %v1227_v33 = vpop.permute.xlu1 %1226  ;;  %v594_v63 = vmin.f32 %v4502_v37, %v4510_v59  ;;  %v1187_v46 = vmin.f32 %v1179_v18, %v1155_v56 }
 0x341   : > { %5578 = vst [vmem:[#allocation49_spill] sm:$0xff] %v4568_v3  ;;  %v1189_v22 = vmax.f32 %v1179_v18, %v1155_v56  ;;  %v1191_v58 = vmin.f32 %v1181_v34, %v1151_v26  ;;  %v4574_v45 = vmax.f32 %v1181_v34, %v1151_v26  ;;  %v1225_v24 = vpop.permute.xlu0 %1224  ;;  %v1186_v2 = vmin.f32 %v1178_v14, %v1154_v53 }
 0x342   : > { %v1188_v30 = vmax.f32 %v1178_v14, %v1154_v53  ;;  %v1190_v49 = vmin.f32 %v1180_v39, %v1150_v54  ;;  %v4576_v47 = vmax.f32 %v1180_v39, %v1150_v54  ;;  %v4578_v25 = vmin.f32 %v595_v62, %v1227_v33  ;;  %v5585_v54 = vld [vmem:[#allocation67_spill] sm:$0xff]  ;;  %v5594_v39 = vld [vmem:[#allocation48_spill] sm:$0xff] }
 0x343   : > { %5579 = vst [vmem:[#allocation29_spill] sm:$0xff] %v4574_v45  ;;  %v1233_v20 = vmax.f32 %v595_v62, %v1227_v33  ;;  %v4580_v29 = vmin.f32 %v594_v63, %v1225_v24  ;;  %v1232_v40 = vmax.f32 %v594_v63, %v1225_v24  ;;  %v4583_v37 = vmax.f32 %v1187_v46, %v4520_v17 }
 0x344   : > { %5580 = vst [vmem:[#allocation36_spill] sm:$0xff] %v4576_v47  ;;  %v1239_v6 = vpop.permute.xlu1 %1238  ;;  %v4586_v59 = vmax.f32 %v1186_v2, %v4526_v21  ;;  %v4589_v26 = vmax.f32 %v1191_v58, %v4524_v5  ;;  %v4592_v56 = vmax.f32 %v1190_v49, %v4530_v50  ;;  %v4597_v12 = vmax.f32 %v1189_v22, %v4522_v9 }
 0x345   : > { %5581 = vst [vmem:[#allocation15_spill] sm:$0xff] %v4583_v37  ;;  %v1243_v53 = vmin.f32 %v5585_v54, %v1239_v6  ;;  %v1245_v52 = vmax.f32 %v5585_v54, %v1239_v6  ;;  %v1237_v11 = vpop.permute.xlu0 %1236  ;;  %v4600_v38 = vmax.f32 %v1188_v30, %v4528_v55  ;;  %v4605_v14 = vmin.f32 %v1189_v22, %v4522_v9  ;;  %v5588_v22 = vld [vmem:[#allocation69_spill] sm:$0xff] }
 0x346   : > { %5582 = vst [vmem:[#allocation72_spill] sm:$0xff] %v4586_v59  ;;  %5583 = vst [vmem:[#allocation46_spill] sm:$0xff] %v4589_v26  ;;  %v1242_v18 = vmin.f32 %v5586_v44, %v1237_v11  ;;  %v1244_v34 = vmax.f32 %v5586_v44, %v1237_v11  ;;  %v4610_v63 = vmin.f32 %v1188_v30, %v4528_v55 }
 0x347   : > { %5584 = vst [vmem:[#allocation74_spill] sm:$0xff] %v4592_v56  ;;  %v1247_v62 = vmin.f32 %v1243_v53, %v1233_v20  ;;  %v1249_v33 = vmax.f32 %v1243_v53, %v1233_v20  ;;  %v4616_v11 = vmin.f32 %v4574_v45, %v4506_v48  ;;  %v4620_v9 = vmin.f32 %v4576_v47, %v4514_v16 }
 0x348   : > { %v1246_v6 = vmin.f32 %v1242_v18, %v1232_v40  ;;  %v1248_v54 = vmax.f32 %v1242_v18, %v1232_v40  ;;  %v1255_v3 = vpop.permute.xlu1 %1254  ;;  %v4625_v30 = vmin.f32 %v1191_v58, %v4524_v5  ;;  %v4628_v53 = vmin.f32 %v1190_v49, %v4530_v50  ;;  %v5589_v40 = vld [vmem:[#allocation70_spill] sm:$0xff] }
 0x349   : > { %5587 = vst [vmem:[#allocation8_spill] sm:$0xff] %v4620_v9  ;;  %v1259_v44 = vmin.f32 %v5588_v22, %v1255_v3  ;;  %v1261_v20 = vmax.f32 %v5588_v22, %v1255_v3  ;;  %v1253_v55 = vpop.permute.xlu0 %1252  ;;  %v4647_v22 = vmin.f32 %v1187_v46, %v4520_v17  ;;  %v5595_v50 = vld [vmem:[#allocation18_spill] sm:$0xff]  ;;  %v5598_v17 = vld [vmem:[#allocation44_spill] sm:$0xff] }
 0x34a   : > { %v1258_v18 = vmin.f32 %v5589_v40, %v1253_v55  ;;  %v1260_v24 = vmax.f32 %v5589_v40, %v1253_v55  ;;  %v4650_v55 = vmin.f32 %v1186_v2, %v4526_v21  ;;  %v5597_v5 = vld [vmem:[#allocation50_spill] sm:$0xff]  ;;  %v598_v40 = vmin.f32 %v5553_v51, %v4488_v36 }
 0x34b   : > { %v1279_v9 = vmin.f32 %v1259_v44, %v1247_v62  ;;  %v4636_v42 = vmax.f32 %v1259_v44, %v1247_v62  ;;  %5590 = vst [vmem:[#allocation23_spill] sm:$0xff] %v4647_v22  ;;  %v5592_v62 = vld [vmem:[#allocation43_spill] sm:$0xff]  ;;  %v599_v22 = vmin.f32 %v5552_v35, %v4474_v0 }
 0x34c   : > { %v1278_v3 = vmin.f32 %v1258_v18, %v1246_v6  ;;  %v4642_v58 = vmax.f32 %v1258_v18, %v1246_v6  ;;  %v4644_v49 = vpop.permute.xlu1 %1266  ;;  %5591 = vst [vmem:[#allocation28_spill] sm:$0xff] %v4650_v55  ;;  %v576_v6 = vmax.f32 %v5595_v50, %v5594_v39  ;;  %v5596_v18 = vld [vmem:[#allocation47_spill] sm:$0xff]  ;;  %v1068_v39 = vmin.f32 %v4463_v61, %v4439_v60 }
 0x34d   : > { %v1271_v44 = vmin.f32 %v5592_v62, %v4644_v49  ;;  %v4656_v1 = vpop.permute.xlu0 %1264  ;;  %v577_v16 = vmax.f32 %v5597_v5, %v5596_v18  ;;  %v1069_v5 = vmin.f32 %v4467_v15, %v4441_v57 }
 0x34e   : > { %5593 = vst [vmem:[#allocation71_spill] sm:$0xff] %v4656_v1  ;;  %v1270_v46 = vmin.f32 %v5598_v17, %v4656_v1  ;;  %v1338_v57 = vmin.f32 %v576_v6, %v4447_v7 }
 0x34f   : > { %v1275_v2 = vmin.f32 %v1271_v44, %v1261_v20  ;;  %v1277_v55 = vmax.f32 %v1271_v44, %v1261_v20  ;;  %v1339_v15 = vmin.f32 %v577_v16, %v4449_v28  ;;  %v5602_v16 = vld [vmem:[#allocation10_spill] sm:$0xff] }
 0x350   : > { %v1274_v50 = vmin.f32 %v1270_v46, %v1260_v24  ;;  %v1276_v18 = vmax.f32 %v1270_v46, %v1260_v24  ;;  %v1295_v47 = vpop.permute.xlu1 %1294  ;;  %v4693_v24 = vmax.f32 %v1069_v5, %v4455_v10  ;;  %v5604_v5 = vld [vmem:[#allocation17_spill] sm:$0xff] }
 0x351   : > { %v4674_v48 = vmin.f32 %v1275_v2, %v1249_v33  ;;  %v4676_v21 = vmax.f32 %v1275_v2, %v1249_v33  ;;  %v4678_v20 = vmin.f32 %v1277_v55, %v1245_v52  ;;  %v4680_v44 = vmax.f32 %v1277_v55, %v1245_v52  ;;  %v1293_v0 = vpop.permute.xlu0 %1292 }
 0x352   : > { %v4682_v35 = vmin.f32 %v1274_v50, %v1248_v54  ;;  %v4684_v36 = vmax.f32 %v1274_v50, %v1248_v54  ;;  %v4686_v60 = vmin.f32 %v1276_v18, %v1244_v34  ;;  %v4688_v61 = vmax.f32 %v1276_v18, %v1244_v34 }
 0x353   : > { %v1299_v51 = vmin.f32 %v599_v22, %v1295_v47  ;;  %v1298_v33 = vmin.f32 %v598_v40, %v1293_v0  ;;  %v4696_v52 = vmax.f32 %v1068_v39, %v4457_v23  ;;  %v1301_v55 = vmax.f32 %v599_v22, %v1295_v47 }
 0x354   : > { %5599 = vst [vmem:[#allocation22_spill] sm:$0xff] %v4682_v35  ;;  %v1300_v46 = vmax.f32 %v598_v40, %v1293_v0  ;;  %v1307_v54 = vpop.permute.xlu1 %1306 }
 0x355   : > { %v4698_v2 = vmin.f32 %v1299_v51, %v1279_v9  ;;  %v4700_v50 = vmax.f32 %v1299_v51, %v1279_v9  ;;  %v4702_v34 = vmin.f32 %v1298_v33, %v1278_v3  ;;  %v4704_v7 = vmax.f32 %v1298_v33, %v1278_v3  ;;  %v1305_v28 = vpop.permute.xlu0 %1304  ;;  %v5607_v3 = vld [vmem:[#allocation42_spill] sm:$0xff] }
 0x356   : > { %v1311_v6 = vmin.f32 %v5602_v16, %v1307_v54  ;;  %v4708_v10 = vmax.f32 %v5602_v16, %v1307_v54  ;;  %v1310_v23 = vmin.f32 %v5604_v5, %v1305_v28  ;;  %v4712_v47 = vmax.f32 %v5604_v5, %v1305_v28  ;;  %v5606_v54 = vld [vmem:[#allocation45_spill] sm:$0xff] }
 0x357   : > { %5600 = vst [vmem:[#allocation51_spill] sm:$0xff] %v4700_v50  ;;  %5601 = vst [vmem:[#allocation41_spill] sm:$0xff] %v4704_v7 }
 0x358   : > { %5603 = vst [vmem:[#allocation73_spill] sm:$0xff] %v4708_v10  ;;  %5605 = vst [vmem:[#allocation21_spill] sm:$0xff] %v4712_v47  ;;  %v1315_v39 = vmin.f32 %v1311_v6, %v1301_v55  ;;  %v1317_v18 = vmax.f32 %v1311_v6, %v1301_v55  ;;  %v1314_v0 = vmin.f32 %v1310_v23, %v1300_v46  ;;  %v1323_v33 = vpop.permute.xlu1 %1322 }
 0x359   : > { %v1316_v51 = vmax.f32 %v1310_v23, %v1300_v46  ;;  %v1327_v28 = vmin.f32 %v5606_v54, %v1323_v33  ;;  %v1329_v16 = vmax.f32 %v5606_v54, %v1323_v33  ;;  %v1321_v5 = vpop.permute.xlu0 %1320 }
 0x35a   : > { %v1326_v45 = vmin.f32 %v5607_v3, %v1321_v5  ;;  %v1328_v40 = vmax.f32 %v5607_v3, %v1321_v5 }
 0x35b   : > { %v1341_v6 = vmin.f32 %v1339_v15, %v1329_v16  ;;  %v4734_v23 = vmax.f32 %v1339_v15, %v1329_v16  ;;  %v1345_v33 = vmin.f32 %v1327_v28, %v1315_v39  ;;  %v4736_v54 = vmax.f32 %v1327_v28, %v1315_v39 }
 0x35c   : > { %v1340_v22 = vmin.f32 %v1338_v57, %v1328_v40  ;;  %v4738_v43 = vmax.f32 %v1338_v57, %v1328_v40  ;;  %v1344_v9 = vmin.f32 %v1326_v45, %v1314_v0  ;;  %v4740_v8 = vmax.f32 %v1326_v45, %v1314_v0  ;;  %v1987_v7 = vpop.permute.xlu1 %1986 }
 0x35d   : > { %v1349_v3 = vmin.f32 %v1341_v6, %v1317_v18  ;;  %v1351_v5 = vmax.f32 %v1341_v6, %v1317_v18  ;;  %v1353_v55 = vmin.f32 %v4734_v23, %v4708_v10  ;;  %v1985_v15 = vpop.permute.xlu0 %1984  ;;  %v4754_v40 = vmin.f32 %v1345_v33, %v4636_v42 }
 0x35e   : > { %5608 = vst [vmem:[#allocation25_spill] sm:$0xff] %v4738_v43  ;;  %5609 = vst [vmem:[#allocation56_spill] sm:$0xff] %v4740_v8  ;;  %v1348_v16 = vmin.f32 %v1340_v22, %v1316_v51  ;;  %v1350_v50 = vmax.f32 %v1340_v22, %v1316_v51  ;;  %v1352_v39 = vmin.f32 %v4738_v43, %v4712_v47 }
 0x35f   : > { %v4751_v45 = vmin.f32 %v1349_v3, %v4676_v21  ;;  %5611 = vst [vmem:[#allocation30_spill] sm:$0xff] %v4754_v40  ;;  %v4757_v18 = vmin.f32 %v1353_v55, %v4680_v44  ;;  %v4760_v0 = vmin.f32 %v1344_v9, %v4642_v58  ;;  %v4769_v6 = vmin.f32 %v1351_v5, %v4678_v20 }
 0x360   : > { %v4763_v22 = vmin.f32 %v1348_v16, %v4684_v36  ;;  %v1999_v51 = vpop.permute.xlu1 %1998  ;;  %v4766_v28 = vmin.f32 %v1352_v39, %v4688_v61  ;;  %v4772_v57 = vmin.f32 %v1350_v50, %v4686_v60  ;;  %v1397_v47 = vmax.f32 %v4754_v40, %v4551_v32 }
 0x361   : > { %5610 = vst [vmem:[#allocation55_spill] sm:$0xff] %v4751_v45  ;;  %5612 = vst [vmem:[#allocation20_spill] sm:$0xff] %v4757_v18  ;;  %v1413_v46 = vmax.f32 %v4751_v45, %v4583_v37  ;;  %v1429_v43 = vmax.f32 %v4757_v18, %v4589_v26  ;;  %v1396_v1 = vmax.f32 %v4760_v0, %v4560_v4  ;;  %v1997_v17 = vpop.permute.xlu0 %1996 }
 0x362   : > { %5613 = vst [vmem:[#allocation16_spill] sm:$0xff] %v4760_v0  ;;  %5614 = vst [vmem:[#allocation32_spill] sm:$0xff] %v4763_v22  ;;  %v1412_v8 = vmax.f32 %v4763_v22, %v4586_v59  ;;  %v1428_v35 = vmax.f32 %v4766_v28, %v4592_v56  ;;  %v1421_v10 = vmax.f32 %v4769_v6, %v4597_v12 }
 0x363   : > { %5615 = vst [vmem:[#allocation24_spill] sm:$0xff] %v4766_v28  ;;  %v1420_v45 = vmax.f32 %v4772_v57, %v4600_v38  ;;  %v1991_v37 = vmin.f32 %v1413_v46, %v1987_v7  ;;  %v2003_v40 = vmax.f32 %v1397_v47, %v1999_v51  ;;  %v2002_v32 = vmax.f32 %v1396_v1, %v1997_v17 }
 0x364   : > { %v4791_v18 = vmax.f32 %v1349_v3, %v4676_v21  ;;  %v1990_v0 = vmin.f32 %v1412_v8, %v1985_v15  ;;  %v2013_v4 = vpop.permute.xlu1 %2012  ;;  %v4794_v26 = vmax.f32 %v1348_v16, %v4684_v36  ;;  %v4797_v22 = vmax.f32 %v1345_v33, %v4636_v42 }
 0x365   : > { %v4800_v59 = vmax.f32 %v1353_v55, %v4680_v44  ;;  %v1993_v28 = vmax.f32 %v1991_v37, %v4693_v24  ;;  %v2005_v56 = vmin.f32 %v1429_v43, %v2003_v40  ;;  %v2004_v7 = vmin.f32 %v1428_v35, %v2002_v32  ;;  %v2011_v21 = vpop.permute.xlu0 %2010 }
 0x366   : > { %v5616_v1 = vmax.f32 %v4698_v2, %v4534_v19  ;;  %v1992_v8 = vmax.f32 %v1990_v0, %v4696_v52  ;;  %v5617_v36 = vmax.f32 %v4702_v34, %v4538_v41  ;;  %v1417_v42 = vmax.f32 %v4791_v18, %v4605_v14 }
 0x367   : > { %v1416_v44 = vmax.f32 %v4794_v26, %v4610_v63  ;;  %v4814_v37 = vmin.f32 %v2005_v56, %v1993_v28  ;;  %v1401_v43 = vmax.f32 %v4797_v22, %v4553_v27  ;;  %v4827_v55 = vmax.f32 %v1344_v9, %v4642_v58 }
 0x368   : > { %v2017_v17 = vmax.f32 %v5616_v1, %v2013_v4  ;;  %v2016_v47 = vmax.f32 %v5617_v36, %v2011_v21  ;;  %v1433_v4 = vmax.f32 %v4800_v59, %v4616_v11  ;;  %v4822_v35 = vmin.f32 %v2004_v7, %v1992_v8  ;;  %v2039_v52 = vpop.permute.xlu1 %2038  ;;  %v5623_v8 = vld [vmem:[#allocation73_spill] sm:$0xff] }
 0x369   : > { %v4830_v46 = vmax.f32 %v1352_v39, %v4688_v61  ;;  %v5618_v56 = vmax.f32 %v4578_v25, %v4532_v31  ;;  %v2037_v33 = vpop.permute.xlu0 %2036  ;;  %v4836_v3 = vmax.f32 %v1351_v5, %v4678_v20  ;;  %v4839_v15 = vmax.f32 %v1350_v50, %v4686_v60  ;;  %v5620_v61 = vld [vmem:[#allocation39_spill] sm:$0xff] }
 0x36a   : > { %v4816_v32 = vmin.f32 %v1421_v10, %v2017_v17  ;;  %v4824_v24 = vmin.f32 %v1420_v45, %v2016_v47  ;;  %v1415_v16 = vmin.f32 %v4791_v18, %v4605_v14  ;;  %v5619_v58 = vmax.f32 %v4580_v29, %v4536_v13  ;;  %v5621_v45 = vld [vmem:[#allocation8_spill] sm:$0xff] }
 0x36b   : > { %v2043_v10 = vmax.f32 %v5618_v56, %v2039_v52  ;;  %v1400_v39 = vmax.f32 %v4827_v55, %v5620_v61  ;;  %v1432_v40 = vmax.f32 %v4830_v46, %v5621_v45  ;;  %v1414_v20 = vmin.f32 %v4794_v26, %v4610_v63  ;;  %v5634_v56 = vld [vmem:[#allocation30_spill] sm:$0xff] }
 0x36c   : > { %v2042_v9 = vmax.f32 %v5619_v58, %v2037_v33  ;;  %v1425_v60 = vmax.f32 %v4836_v3, %v4625_v30  ;;  %v1424_v14 = vmax.f32 %v4839_v15, %v4628_v53  ;;  %v1399_v50 = vmin.f32 %v4797_v22, %v4553_v27  ;;  %v2051_v0 = vpop.permute.xlu1 %2050  ;;  %v5636_v33 = vld [vmem:[#allocation29_spill] sm:$0xff] }
 0x36d   : > { %v4852_v5 = vmax.f32 %v1417_v42, %v2043_v10  ;;  %v1431_v51 = vmin.f32 %v4800_v59, %v4616_v11  ;;  %v1398_v26 = vmin.f32 %v4827_v55, %v5620_v61  ;;  %v1430_v63 = vmin.f32 %v4830_v46, %v5621_v45  ;;  %v2049_v7 = vpop.permute.xlu0 %2048  ;;  %v5626_v42 = vld [vmem:[#allocation56_spill] sm:$0xff]  ;;  %v5633_v46 = vld [vmem:[#allocation31_spill] sm:$0xff]  ;;  %v5635_v10 = vld [vmem:[#allocation65_spill] sm:$0xff] }
 0x36e   : > { %v4860_v18 = vmax.f32 %v1416_v44, %v2042_v9  ;;  %v2055_v28 = vmax.f32 %v1401_v43, %v2051_v0  ;;  %v1423_v1 = vmin.f32 %v4836_v3, %v4625_v30  ;;  %v1422_v27 = vmin.f32 %v4839_v15, %v4628_v53  ;;  %v5625_v53 = vld [vmem:[#allocation22_spill] sm:$0xff]  ;;  %v5628_v44 = vld [vmem:[#allocation71_spill] sm:$0xff]  ;;  %v5631_v43 = vld [vmem:[#allocation21_spill] sm:$0xff] }
 0x36f   : > { %v1419_v22 = vmin.f32 %v4769_v6, %v4597_v12  ;;  %v2054_v17 = vmax.f32 %v1400_v39, %v2049_v7  ;;  %v1418_v59 = vmin.f32 %v4772_v57, %v4600_v38  ;;  %v4878_v11 = vmin.f32 %v4736_v54, %v4674_v48  ;;  %v5627_v6 = vld [vmem:[#allocation44_spill] sm:$0xff]  ;;  %v5630_v57 = vld [vmem:[#allocation25_spill] sm:$0xff]  ;;  %v5637_v3 = vld [vmem:[#allocation66_spill] sm:$0xff] }
 0x370   : > { %v5622_v21 = vmax.f32 %v5592_v62, %v4644_v49  ;;  %v5624_v30 = vmax.f32 %v4734_v23, %v5623_v8  ;;  %v4886_v47 = vmin.f32 %v1433_v4, %v2055_v28  ;;  %v4890_v12 = vmin.f32 %v5626_v42, %v5625_v53  ;;  %v2065_v23 = vpop.permute.xlu1 %2064  ;;  %v5639_v9 = vld [vmem:[#allocation46_spill] sm:$0xff]  ;;  %v5640_v61 = vld [vmem:[#allocation20_spill] sm:$0xff]  ;;  %v5641_v0 = vld [vmem:[#allocation51_spill] sm:$0xff] }
 0x371   : > { %v5629_v38 = vmax.f32 %v5627_v6, %v5628_v44  ;;  %v5632_v52 = vmax.f32 %v5630_v57, %v5631_v43  ;;  %v1395_v49 = vmin.f32 %v5634_v56, %v5633_v46  ;;  %v4900_v62 = vmin.f32 %v1432_v40, %v2054_v17  ;;  %v5642_v28 = vld [vmem:[#allocation34_spill] sm:$0xff]  ;;  %v2063_v40 = vpop.permute.xlu0 %2062  ;;  %v5644_v17 = vld [vmem:[#allocation49_spill] sm:$0xff]  ;;  %v5646_v6 = vld [vmem:[#allocation35_spill] sm:$0xff] }
 0x372   : > { %v1381_v36 = vmin.f32 %v5624_v30, %v5622_v21  ;;  %v1403_v4 = vmin.f32 %v4878_v11, %v5635_v10  ;;  %v5638_v15 = vmax.f32 %v5636_v33, %v5637_v3  ;;  %v1427_v39 = vmin.f32 %v5640_v61, %v5639_v9  ;;  %v5645_v30 = vld [vmem:[#allocation36_spill] sm:$0xff]  ;;  %v5648_v57 = vld [vmem:[#allocation41_spill] sm:$0xff]  ;;  %v5649_v43 = vld [vmem:[#allocation54_spill] sm:$0xff] }
 0x373   : > { %v1380_v55 = vmin.f32 %v5632_v52, %v5629_v38  ;;  %v2059_v45 = vmin.f32 %v4886_v47, %v4852_v5  ;;  %v5643_v7 = vmax.f32 %v5641_v0, %v5642_v28  ;;  %v1402_v8 = vmin.f32 %v4890_v12, %v5644_v17  ;;  %v5651_v56 = vld [vmem:[#allocation37_spill] sm:$0xff]  ;;  %v5652_v33 = vld [vmem:[#allocation16_spill] sm:$0xff] }
 0x374   : > { %v1435_v58 = vmin.f32 %v1381_v36, %v5638_v15  ;;  %v5647_v44 = vmax.f32 %v5645_v30, %v5646_v6  ;;  %v5650_v52 = vmax.f32 %v5648_v57, %v5649_v43  ;;  %v1394_v3 = vmin.f32 %v5652_v33, %v5651_v56  ;;  %v5653_v15 = vld [vmem:[#allocation74_spill] sm:$0xff]  ;;  %v5657_v56 = vld [vmem:[#allocation72_spill] sm:$0xff] }
 0x375   : > { %v2069_v21 = vmax.f32 %v5643_v7, %v2065_v23  ;;  %v5654_v23 = vld [vmem:[#allocation24_spill] sm:$0xff]  ;;  %v1405_v7 = vmax.f32 %v4878_v11, %v5635_v10  ;;  %v4936_v30 = vmax.f32 %v4736_v54, %v4674_v48  ;;  %v5660_v48 = vld [vmem:[#allocation23_spill] sm:$0xff] }
 0x376   : > { %v1434_v38 = vmin.f32 %v1380_v55, %v5647_v44  ;;  %v2068_v46 = vmax.f32 %v5650_v52, %v2063_v40  ;;  %v1426_v9 = vmin.f32 %v5654_v23, %v5653_v15  ;;  %v1404_v55 = vmax.f32 %v4890_v12, %v5644_v17  ;;  %v2093_v40 = vpop.permute.xlu1 %2092  ;;  %v5655_v52 = vld [vmem:[#allocation15_spill] sm:$0xff]  ;;  %v5658_v33 = vld [vmem:[#allocation32_spill] sm:$0xff]  ;;  %v2091_v17 = vpop.permute.xlu0 %2090 }
 0x377   : > { %v4928_v61 = vmin.f32 %v1425_v60, %v2069_v21  ;;  %v4942_v44 = vmax.f32 %v5626_v42, %v5625_v53  ;;  %v5656_v60 = vld [vmem:[#allocation55_spill] sm:$0xff]  ;;  %v5659_v12 = vmin.f32 %v4578_v25, %v4532_v31  ;;  %v1409_v54 = vmax.f32 %v4936_v30, %v5660_v48 }
 0x378   : > { %v4938_v6 = vmin.f32 %v1424_v14, %v2068_v46  ;;  %v1407_v14 = vmin.f32 %v4936_v30, %v5660_v48  ;;  %v5661_v53 = vmin.f32 %v4580_v29, %v4536_v13  ;;  %v5662_v46 = vld [vmem:[#allocation28_spill] sm:$0xff]  ;;  %v5663_v29 = vmin.f32 %v5641_v0, %v5642_v28 }
 0x379   : > { %v2097_v10 = vmax.f32 %v5659_v12, %v2093_v40  ;;  %v1408_v15 = vmax.f32 %v4942_v44, %v5662_v46  ;;  %v1406_v23 = vmin.f32 %v4942_v44, %v5662_v46 }
 0x37a   : > { %v2096_v42 = vmax.f32 %v5661_v53, %v2091_v17  ;;  %v2105_v25 = vpop.permute.xlu1 %2104  ;;  %v2103_v12 = vpop.permute.xlu0 %2102 }
 0x37b   : > { %v4962_v11 = vmax.f32 %v1415_v16, %v2097_v10  ;;  %v2109_v40 = vmax.f32 %v1399_v50, %v2105_v25  ;;  %v2108_v21 = vmax.f32 %v1398_v26, %v2103_v12  ;;  %v5664_v16 = vmin.f32 %v5648_v57, %v5649_v43 }
 0x37c   : > { %v4964_v31 = vmax.f32 %v1414_v20, %v2096_v42 }
 0x37d   : > { %v2111_v36 = vmin.f32 %v1431_v51, %v2109_v40  ;;  %v2110_v30 = vmin.f32 %v1430_v63, %v2108_v21  ;;  %v5665_v51 = vmin.f32 %v4698_v2, %v4534_v19 }
 0x37e   : > { %v2119_v48 = vpop.permute.xlu1 %2118  ;;  %v2117_v53 = vpop.permute.xlu0 %2116 }
 0x37f   : > { %v2113_v13 = vmin.f32 %v2111_v36, %v4962_v11  ;;  %v2123_v17 = vmax.f32 %v5663_v29, %v2119_v48  ;;  %v2112_v44 = vmin.f32 %v2110_v30, %v4964_v31  ;;  %v2122_v20 = vmax.f32 %v5664_v16, %v2117_v53 }
 0x380   : > { %v5666_v36 = vmin.f32 %v4702_v34, %v4538_v41 }
 0x381   : > { %v2125_v10 = vmin.f32 %v1423_v1, %v2123_v17  ;;  %v2124_v50 = vmin.f32 %v1422_v27, %v2122_v20 }
 0x382   : > { %v2145_v42 = vpop.permute.xlu1 %2144  ;;  %v2143_v63 = vpop.permute.xlu0 %2142 }
 0x383   : > { %v2149_v26 = vmax.f32 %v5665_v51, %v2145_v42  ;;  %v2148_v0 = vmax.f32 %v5666_v36, %v2143_v63  ;;  %v5668_v42 = vmin.f32 %v5656_v60, %v5655_v52 }
 0x385   : > { %v2151_v28 = vmax.f32 %v1419_v22, %v2149_v26  ;;  %v2150_v21 = vmax.f32 %v1418_v59, %v2148_v0 }
 0x386   : > { %v2157_v11 = vpop.permute.xlu1 %2156  ;;  %v2155_v31 = vpop.permute.xlu0 %2154 }
 0x387   : > { %v2161_v46 = vmax.f32 %v1403_v4, %v2157_v11  ;;  %v2160_v25 = vmax.f32 %v1402_v8, %v2155_v31 }
 0x389   : > { %v2163_v57 = vmin.f32 %v1435_v58, %v2161_v46  ;;  %v2162_v43 = vmin.f32 %v1434_v38, %v2160_v25 }
 0x38a   : > { %v2171_v1 = vpop.permute.xlu1 %2170  ;;  %v2169_v12 = vpop.permute.xlu0 %2168 }
 0x38b   : > { %v2165_v27 = vmin.f32 %v2163_v57, %v2151_v28  ;;  %v2175_v40 = vmax.f32 %v1395_v49, %v2171_v1  ;;  %v2164_v30 = vmin.f32 %v2162_v43, %v2150_v21  ;;  %v2174_v19 = vmax.f32 %v1394_v3, %v2169_v12 }
 0x38d   : > { %v2177_v2 = vmin.f32 %v1427_v39, %v2175_v40  ;;  %v2176_v48 = vmin.f32 %v1426_v9, %v2174_v19 }
 0x38e   : > { %v2025_v29 = vpop.permute.xlu1 %2024  ;;  %v2023_v41 = vpop.permute.xlu0 %2022 }
 0x38f   : > { %v2029_v17 = vmin.f32 %v1405_v7, %v2025_v29  ;;  %v2028_v34 = vmin.f32 %v1404_v55, %v2023_v41 }
 0x391   : > { %v2031_v22 = vmax.f32 %v2029_v17, %v4816_v32  ;;  %v2030_v59 = vmax.f32 %v2028_v34, %v4824_v24 }
 0x392   : > { %v2077_v4 = vpop.permute.xlu1 %2076  ;;  %v2075_v38 = vpop.permute.xlu0 %2074 }
 0x393   : > { %v2033_v58 = vmax.f32 %v2031_v22, %v4814_v37  ;;  %v2081_v8 = vmin.f32 %v1409_v54, %v2077_v4  ;;  %v2032_v49 = vmax.f32 %v2030_v59, %v4822_v35  ;;  %v2080_v53 = vmin.f32 %v1408_v15, %v2075_v38 }
 0x394   : > { %v5667_v37 = vmin.f32 %v4900_v62, %v4860_v18 }
 0x395   : > { %v2083_v39 = vmax.f32 %v2081_v8, %v4928_v61  ;;  %v2082_v3 = vmax.f32 %v2080_v53, %v4938_v6 }
 0x396   : > { %v2131_v9 = vpop.permute.xlu1 %2130  ;;  %v2129_v24 = vpop.permute.xlu0 %2128 }
 0x397   : > { %v2085_v32 = vmin.f32 %v2083_v39, %v2059_v45  ;;  %v2135_v7 = vmin.f32 %v1407_v14, %v2131_v9  ;;  %v2084_v55 = vmin.f32 %v2082_v3, %v5667_v37  ;;  %v2134_v54 = vmin.f32 %v1406_v23, %v2129_v24 }
 0x398   : > { %v5669_v14 = vmin.f32 %v5658_v33, %v5657_v56 }
 0x399   : > { %v2087_v16 = vmax.f32 %v2085_v32, %v2033_v58  ;;  %v2137_v35 = vmax.f32 %v2135_v7, %v2125_v10  ;;  %v2086_v15 = vmax.f32 %v2084_v55, %v2032_v49  ;;  %v2136_v20 = vmax.f32 %v2134_v54, %v2124_v50 }
 0x39a   : > { %v2183_v61 = vpop.permute.xlu1 %2182  ;;  %v2181_v47 = vpop.permute.xlu0 %2180 }
 0x39b   : > { %v2139_v6 = vmax.f32 %v2137_v35, %v2113_v13  ;;  %v2187_v5 = vmin.f32 %v5668_v42, %v2183_v61  ;;  %v2138_v45 = vmax.f32 %v2136_v20, %v2112_v44  ;;  %v2186_v18 = vmin.f32 %v5669_v14, %v2181_v47 }
 0x39d   : > { %v2189_v62 = vmax.f32 %v2187_v5, %v2177_v2  ;;  %v2188_v23 = vmax.f32 %v2186_v18, %v2176_v48 }
 0x39f   : > { %v2191_v51 = vmin.f32 %v2189_v62, %v2165_v27  ;;  %v2190_v10 = vmin.f32 %v2188_v23, %v2164_v30 }
 0x3a1   : > { %v2193_v13 = vmin.f32 %v2191_v51, %v2139_v6  ;;  %v2192_v50 = vmin.f32 %v2190_v10, %v2138_v45 }
 0x3a3   : > { %v2195_v52 = vmax.f32 %v2193_v13, %v2087_v16  ;;  %v2194_v60 = vmax.f32 %v2192_v50, %v2086_v15 }
 0x3a5   : > { %2198 = vst.msk [vmem:[%s148_s15 + $0x8] sm:$0xff] %vm2196_vm0, %v2195_v52  ;;  %2197 = vst.msk [vmem:[%s148_s15] sm:$0xff] %vm2196_vm0, %v2194_v60 }
 0x3a6   : > { %2430 = shalt.err (!%p2427_p3)
}
 0x3a7   : > { %s2431_s4 = scalar_lea.hbm %s5003_s23, 256  ;;  %s2435_s18 = scalar_lea.hbm %s5054_s1, 768 }
 0x3a8   : > { %p2432_p5 = scmp.ne.s32.totalorder %s5003_s23, %s2431_s4  ;;  %p2436_p0 = scmp.lt.u32.totalorder %s5003_s23, %s5054_s1 }
 0x3a9   : > { %p2437_p2 = scmp.lt.u32.totalorder %s2435_s18, %s2431_s4  ;;  %p2439_p8 = scmp.lt.u32.totalorder %s2431_s4, %s5003_s23 }
 0x3aa   : > { %p2433_p6 = pnand %p2432_p5, %p5670_p9 }
 0x3ab   : > { %p2438_p4 = por %p2437_p2, %p2436_p0 }
 0x3ac   : > { %p2434_p7 = pneg %p2433_p6 }
 0x3ad   : > { %p2440_p11 = por %p2439_p8, %p2438_p4 }
 0x3af   : > { %p2441_p13 = pnand %p2440_p11, %p2434_p7 }
 0x3b1   : > { %2444 = shalt.err (!%p2441_p13)
}
 0x3b2   : > { %s2511_s5 = smov 128   ;;  %s2512_s12 = smov 8  }
 0x3b3   : > { %2317 = dma.vmem_to_hbm [thread:$0]  (%p5670_p9), %s5005_s16, 256, %s5003_s23, %s2200_s9, %s2511_s5, %s2511_s5, %s2512_s12  }
 0x3b4 PF: > { %p2328_p10 = scmp.ge.s32.totalorder %s2499_s11, 2  ;;  %s2230_s13 = sand.u32 1, %s2479_s6  }
 0x3b5   : > { %p5671_p12 = scmp.ne.s32.totalorder %s5259_s21, 0  ;;  %s2231_s15 = scalar_lea.sflag [#allocation4], %s2230_s13 }
 0x3b7   : > { %p2324_p1 = pnand %p2328_p10, %p5671_p12 }
 0x3b9   : > { %2474 = dma.done.wait (!%p2324_p1), %s2231_s15, 256  }
 0x3ba   : > { %2476 = vsyncadd (!%p2324_p1), %s2231_s15, 4294967040  ;;  %s17_s11 = sadd.s32 1, %s2499_s11   ;;  %s5672_s6 = smov %s2483_s7 }
 0x3bb   : > { %p14_p3 = scmp.ge.s32.totalorder %s17_s11, 5   ;;  %s5673_s7 = smov %s2487_s8 }
 0x3bc   : > { %s5674_s8 = smov %s2579_s20  ;;  %s5675_s9 = smov %s2495_s10 }
 0x3bd   : > { %s5676_s10 = smov %s5678_s14  ;;  %16 = sbr.rel (!%p14_p3) target bundleno = 6 (0x6), region = 69 }
 0x3c4   :  { %2236 = vsyncpa [#allocation3], 1 }
 0x3c5   :  { %2238 = vsyncpa [#allocation3 + $0x1], 1 }
 0x3c6   :  { %2239 = vsyncpa [#allocation4], 1 }
 0x3c7   :  { %2241 = vsyncpa [#allocation4 + $0x1], 1 }

</bundles_post_ra>
